<compile_context>
chip_gen: v5e
topology: v5e:2x2
jax: 0.10.0
libtpu: 0.0.40
codegen_flags: <defaults>
</compile_context>

<pallas_src>
import jax
import jax.numpy as jnp
from jax.experimental import pallas as pl
from jax.experimental.pallas import tpu as pltpu

PATCH = 8          # stand-in patch size for the embedding net
EMB_DIM = 1024     # per-branch embedding dim (fc input is 2048 = 2 * 1024)
HID_DIM = 512
OUT_DIM = 2
LANE = 128


def _round_up(x, m):
    return (x + m - 1) // m * m


# ----------------------------- Pallas kernel -------------------------------

def _fused_kernel(m1_ref, m2_ref, w_e_ref, b_e_ref,
                  w1a_ref, w1b_ref, b1_ref, alpha_ref,
                  w2_ref, b2_ref, out_ref):
    """Fused siamese forward for one batch tile.

    embed : e_k = (mean patch)_k @ W_e + b_e     (mean folded before matmul)
    head  : h   = e1 @ W1a + e2 @ W1b + b1       (== cat(e1,e2) @ W1 + b1)
            h   = PReLU(h)
            out = h @ W2 + b2                    (output dim zero-padded to 128)
    """
    e1 = jnp.dot(m1_ref[...], w_e_ref[...],
                 preferred_element_type=jnp.float32) + b_e_ref[...]
    e2 = jnp.dot(m2_ref[...], w_e_ref[...],
                 preferred_element_type=jnp.float32) + b_e_ref[...]

    h = (jnp.dot(e1.astype(jnp.bfloat16), w1a_ref[...],
                 preferred_element_type=jnp.float32)
         + jnp.dot(e2.astype(jnp.bfloat16), w1b_ref[...],
                   preferred_element_type=jnp.float32)
         + b1_ref[...])

    a = alpha_ref[0, 0]                       # PReLU, single shared alpha (SMEM)
    h = jnp.where(h > 0, h, a * h)

    out_ref[...] = (jnp.dot(h.astype(jnp.bfloat16), w2_ref[...],
                            preferred_element_type=jnp.float32)
                    + b2_ref[...]).astype(out_ref.dtype)


# ------------------------------ wrappers ------------------------------------

def _mean_patches(x):
    """NCHW [B,C,H,W] -> mean over non-overlapping PxP patches -> [B, C*P*P].

    Exact fold of the token mean-pool through the (linear) patch-embed:
    mean_n(patch_n) @ W == mean_n(patch_n @ W). Avoids the full patch
    transpose (no extra HBM round-trip of the image tensor).
    """
    B, C, H, W = x.shape
    nh, nw = H // PATCH, W // PATCH
    x = x.reshape(B, C, nh, PATCH, nw, PATCH)
    m = jnp.mean(x, axis=(2, 4))              # [B, C, P, P], matches (c, ph, pw)
    return m.reshape(B, C * PATCH * PATCH)


def init_params(key, patch_dim):
    """Deterministic parameter init (PyTorch-style uniform fan-in bounds)."""
    ks = jax.random.split(key, 7)

    def lin(k, fan_in, shape):
        bound = 1.0 / jnp.sqrt(jnp.float32(fan_in))
        return jax.random.uniform(k, shape, jnp.float32, -bound, bound)

    return dict(
        w_embed=lin(ks[0], patch_dim, (patch_dim, EMB_DIM)),
        b_embed=lin(ks[1], patch_dim, (1, EMB_DIM)),
        w1a=lin(ks[2], 2 * EMB_DIM, (EMB_DIM, HID_DIM)),   # W1[:1024, :]
        w1b=lin(ks[3], 2 * EMB_DIM, (EMB_DIM, HID_DIM)),   # W1[1024:, :]
        b1=lin(ks[4], 2 * EMB_DIM, (1, HID_DIM)),
        alpha=jnp.full((1, 1), 0.25, jnp.float32),         # PReLU default init
        w2=lin(ks[5], HID_DIM, (HID_DIM, OUT_DIM)),
        b2=lin(ks[6], HID_DIM, (1, OUT_DIM)),
    )


def _siamese_forward(xs, params):
    """xs: [2, B, C, H, W] float32 -> logits [B, 2] float32."""
    _, B, C, H, W = xs.shape
    K = C * PATCH * PATCH
    Kp = _round_up(K, LANE)                  # lane-aligned matmul K
    OUTP = _round_up(OUT_DIM, LANE)          # lane-dense output stores

    # Batch tile: <=128 rows, multiple of 8 (or full), "parallel" grid axis.
    TB = min(128, _round_up(B, 8))
    Bp = _round_up(B, TB)
    nb = Bp // TB

    # --- wrapper-side prep: mean-fold, pad, cast to bf16 ---------------------
    def prep_branch(x):
        m = _mean_patches(x)                                  # [B, K] f32
        m = jnp.pad(m, ((0, Bp - B), (0, Kp - K)))
        return m.astype(jnp.bfloat16)

    m1 = prep_branch(xs[0])
    m2 = prep_branch(xs[1])

    w_e = jnp.pad(params["w_embed"], ((0, Kp - K), (0, 0))).astype(jnp.bfloat16)
    b_e = params["b_embed"]                                   # [1, 1024] f32
    w1a = params["w1a"].astype(jnp.bfloat16)
    w1b = params["w1b"].astype(jnp.bfloat16)
    b1 = params["b1"]                                         # [1, 512] f32
    alpha = params["alpha"]                                   # (1, 1) f32 -> SMEM
    w2 = jnp.pad(params["w2"],
                 ((0, 0), (0, OUTP - OUT_DIM))).astype(jnp.bfloat16)
    b2 = jnp.pad(params["b2"], ((0, 0), (0, OUTP - OUT_DIM))) # [1, 128] f32

    tile_map = lambda i: (i, 0)      # batch-tiled operands
    full_map = lambda i: (0, 0)      # weights/biases: resident across the grid

    flops = 2 * Bp * (2 * Kp * EMB_DIM + 2 * EMB_DIM * HID_DIM
                      + HID_DIM * OUTP)
    bytes_accessed = (2 * Bp * Kp * 2                          # mean patches (bf16)
                      + (Kp * EMB_DIM + 2 * EMB_DIM * HID_DIM
                         + HID_DIM * OUTP) * 2                 # bf16 weights
                      + (EMB_DIM + HID_DIM + OUTP + 1) * 4     # f32 biases + alpha
                      + Bp * OUTP * 4)                         # f32 output

    out = pl.pallas_call(
        _fused_kernel,
        out_shape=jax.ShapeDtypeStruct((Bp, OUTP), jnp.float32),
        grid=(nb,),
        in_specs=[
            pl.BlockSpec((TB, Kp), tile_map),                  # m1
            pl.BlockSpec((TB, Kp), tile_map),                  # m2
            pl.BlockSpec((Kp, EMB_DIM), full_map),             # w_embed
            pl.BlockSpec((1, EMB_DIM), full_map),              # b_embed
            pl.BlockSpec((EMB_DIM, HID_DIM), full_map),        # w1a
            pl.BlockSpec((EMB_DIM, HID_DIM), full_map),        # w1b
            pl.BlockSpec((1, HID_DIM), full_map),              # b1
            pl.BlockSpec(memory_space=pltpu.MemorySpace.SMEM), # alpha (scalar)
            pl.BlockSpec((HID_DIM, OUTP), full_map),           # w2
            pl.BlockSpec((1, OUTP), full_map),                 # b2
        ],
        out_specs=pl.BlockSpec((TB, OUTP), tile_map),
        compiler_params=pltpu.CompilerParams(
            dimension_semantics=("parallel",)),
        cost_estimate=pl.CostEstimate(
            flops=flops, transcendentals=0, bytes_accessed=bytes_accessed),
    )(m1, m2, w_e, b_e, w1a, w1b, b1, alpha, w2, b2)

    return out[:B, :OUT_DIM]


siamese_forward = jax.jit(_siamese_forward)


if __name__ == "__main__":
    B, C, H, W = 2, 3, 16, 16
    key = jax.random.PRNGKey(0)
    k_x, k_p = jax.random.split(key)

    xs = jax.random.normal(k_x, (2, B, C, H, W), jnp.float32)
    params = init_params(k_p, C * PATCH * PATCH)

    out = siamese_forward(xs, params)
    jax.block_until_ready(out)
    assert out.shape == (B, OUT_DIM) and out.dtype == jnp.float32
    print("KERNEL_OK")
</pallas_src>

<mosaic_0001>
module attributes {stable_mosaic.version = 11 : i64} {
  func.func @_fused_kernel(%arg0: i32, %arg1: memref<8x256xbf16, #tpu.memory_space<vmem>>, %arg2: memref<8x256xbf16, #tpu.memory_space<vmem>>, %arg3: memref<256x1024xbf16, #tpu.memory_space<vmem>>, %arg4: memref<1x1024xf32, #tpu.memory_space<vmem>>, %arg5: memref<1024x512xbf16, #tpu.memory_space<vmem>>, %arg6: memref<1024x512xbf16, #tpu.memory_space<vmem>>, %arg7: memref<1x512xf32, #tpu.memory_space<vmem>>, %arg8: memref<1x1xf32, #tpu.memory_space<smem>>, %arg9: memref<512x128xbf16, #tpu.memory_space<vmem>>, %arg10: memref<1x128xf32, #tpu.memory_space<vmem>>, %arg11: memref<8x128xf32, #tpu.memory_space<vmem>>) attributes {dimension_semantics = [#tpu.dimension_semantics<parallel>], iteration_bounds = array<i64: 1>, scalar_prefetch = 0 : i64, scratch_operands = 0 : i64, tpu.core_type = #tpu.core_type<tc>, window_params = [{transform_indices = @transform_0, window_bounds = array<i64: 8, 256>}, {transform_indices = @transform_1, window_bounds = array<i64: 8, 256>}, {pipeline_mode = #tpu.pipeline_mode<synchronous>, transform_indices = @transform_2, window_bounds = array<i64: 256, 1024>}, {pipeline_mode = #tpu.pipeline_mode<synchronous>, transform_indices = @transform_3, window_bounds = array<i64: 1, 1024>}, {pipeline_mode = #tpu.pipeline_mode<synchronous>, transform_indices = @transform_4, window_bounds = array<i64: 1024, 512>}, {pipeline_mode = #tpu.pipeline_mode<synchronous>, transform_indices = @transform_5, window_bounds = array<i64: 1024, 512>}, {pipeline_mode = #tpu.pipeline_mode<synchronous>, transform_indices = @transform_6, window_bounds = array<i64: 1, 512>}, {transform_indices = @transform_7, window_bounds = array<i64: 1, 1>}, {pipeline_mode = #tpu.pipeline_mode<synchronous>, transform_indices = @transform_8, window_bounds = array<i64: 512, 128>}, {pipeline_mode = #tpu.pipeline_mode<synchronous>, transform_indices = @transform_9, window_bounds = array<i64: 1, 128>}, {transform_indices = @transform_10, window_bounds = array<i64: 8, 128>}]} {
    %c0 = arith.constant 0 : index
    %c0_0 = arith.constant 0 : index
    %0 = vector.load %arg1[%c0, %c0_0] : memref<8x256xbf16, #tpu.memory_space<vmem>>, vector<8x256xbf16>
    %c0_1 = arith.constant 0 : index
    %c0_2 = arith.constant 0 : index
    %1 = vector.load %arg3[%c0_1, %c0_2] : memref<256x1024xbf16, #tpu.memory_space<vmem>>, vector<256x1024xbf16>
    %cst = arith.constant dense<0.000000e+00> : vector<8x1024xf32>
    %2 = tpu.matmul %0, %1, %cst {dimension_numbers = #tpu.dot_dimension_numbers<[1], [0], [0], [1], [0, 0, 1, 1], [], []>} : vector<8x256xbf16>, vector<256x1024xbf16>, vector<8x1024xf32> -> vector<8x1024xf32>
    %c0_3 = arith.constant 0 : index
    %c0_4 = arith.constant 0 : index
    %3 = vector.load %arg4[%c0_3, %c0_4] : memref<1x1024xf32, #tpu.memory_space<vmem>>, vector<1x1024xf32>
    %4 = vector.broadcast %3 : vector<1x1024xf32> to vector<8x1024xf32>
    %5 = arith.addf %2, %4 : vector<8x1024xf32>
    %c0_5 = arith.constant 0 : index
    %c0_6 = arith.constant 0 : index
    %6 = vector.load %arg2[%c0_5, %c0_6] : memref<8x256xbf16, #tpu.memory_space<vmem>>, vector<8x256xbf16>
    %c0_7 = arith.constant 0 : index
    %c0_8 = arith.constant 0 : index
    %7 = vector.load %arg3[%c0_7, %c0_8] : memref<256x1024xbf16, #tpu.memory_space<vmem>>, vector<256x1024xbf16>
    %cst_9 = arith.constant dense<0.000000e+00> : vector<8x1024xf32>
    %8 = tpu.matmul %6, %7, %cst_9 {dimension_numbers = #tpu.dot_dimension_numbers<[1], [0], [0], [1], [0, 0, 1, 1], [], []>} : vector<8x256xbf16>, vector<256x1024xbf16>, vector<8x1024xf32> -> vector<8x1024xf32>
    %c0_10 = arith.constant 0 : index
    %c0_11 = arith.constant 0 : index
    %9 = vector.load %arg4[%c0_10, %c0_11] : memref<1x1024xf32, #tpu.memory_space<vmem>>, vector<1x1024xf32>
    %10 = vector.broadcast %9 : vector<1x1024xf32> to vector<8x1024xf32>
    %11 = arith.addf %8, %10 : vector<8x1024xf32>
    %12 = arith.truncf %5 : vector<8x1024xf32> to vector<8x1024xbf16>
    %c0_12 = arith.constant 0 : index
    %c0_13 = arith.constant 0 : index
    %13 = vector.load %arg5[%c0_12, %c0_13] : memref<1024x512xbf16, #tpu.memory_space<vmem>>, vector<1024x512xbf16>
    %cst_14 = arith.constant dense<0.000000e+00> : vector<8x512xf32>
    %14 = tpu.matmul %12, %13, %cst_14 {dimension_numbers = #tpu.dot_dimension_numbers<[1], [0], [0], [1], [0, 0, 1, 1], [], []>} : vector<8x1024xbf16>, vector<1024x512xbf16>, vector<8x512xf32> -> vector<8x512xf32>
    %15 = arith.truncf %11 : vector<8x1024xf32> to vector<8x1024xbf16>
    %c0_15 = arith.constant 0 : index
    %c0_16 = arith.constant 0 : index
    %16 = vector.load %arg6[%c0_15, %c0_16] : memref<1024x512xbf16, #tpu.memory_space<vmem>>, vector<1024x512xbf16>
    %cst_17 = arith.constant dense<0.000000e+00> : vector<8x512xf32>
    %17 = tpu.matmul %15, %16, %cst_17 {dimension_numbers = #tpu.dot_dimension_numbers<[1], [0], [0], [1], [0, 0, 1, 1], [], []>} : vector<8x1024xbf16>, vector<1024x512xbf16>, vector<8x512xf32> -> vector<8x512xf32>
    %18 = arith.addf %14, %17 : vector<8x512xf32>
    %c0_18 = arith.constant 0 : index
    %c0_19 = arith.constant 0 : index
    %19 = vector.load %arg7[%c0_18, %c0_19] : memref<1x512xf32, #tpu.memory_space<vmem>>, vector<1x512xf32>
    %20 = vector.broadcast %19 : vector<1x512xf32> to vector<8x512xf32>
    %21 = arith.addf %18, %20 : vector<8x512xf32>
    %c0_20 = arith.constant 0 : index
    %c0_21 = arith.constant 0 : index
    %22 = memref.load %arg8[%c0_20, %c0_21] : memref<1x1xf32, #tpu.memory_space<smem>>
    %cst_22 = arith.constant 0.000000e+00 : f32
    %23 = vector.broadcast %cst_22 : f32 to vector<8x512xf32>
    %24 = arith.cmpf ogt, %21, %23 : vector<8x512xf32>
    %25 = vector.broadcast %22 : f32 to vector<8x512xf32>
    %26 = arith.mulf %25, %21 : vector<8x512xf32>
    %27 = arith.select %24, %21, %26 : vector<8x512xi1>, vector<8x512xf32>
    %28 = arith.truncf %27 : vector<8x512xf32> to vector<8x512xbf16>
    %c0_23 = arith.constant 0 : index
    %c0_24 = arith.constant 0 : index
    %29 = vector.load %arg9[%c0_23, %c0_24] : memref<512x128xbf16, #tpu.memory_space<vmem>>, vector<512x128xbf16>
    %cst_25 = arith.constant dense<0.000000e+00> : vector<8x128xf32>
    %30 = tpu.matmul %28, %29, %cst_25 {dimension_numbers = #tpu.dot_dimension_numbers<[1], [0], [0], [1], [0, 0, 1, 1], [], []>} : vector<8x512xbf16>, vector<512x128xbf16>, vector<8x128xf32> -> vector<8x128xf32>
    %c0_26 = arith.constant 0 : index
    %c0_27 = arith.constant 0 : index
    %31 = vector.load %arg10[%c0_26, %c0_27] : memref<1x128xf32, #tpu.memory_space<vmem>>, vector<1x128xf32>
    %32 = vector.broadcast %31 : vector<1x128xf32> to vector<8x128xf32>
    %33 = arith.addf %30, %32 : vector<8x128xf32>
    %c0_28 = arith.constant 0 : index
    %c0_29 = arith.constant 0 : index
    %34 = vector.load %arg11[%c0_28, %c0_29] : memref<8x128xf32, #tpu.memory_space<vmem>>, vector<8x128xf32>
    tpu.vector_store %arg11[%c0_28, %c0_29], %33 {strides = array<i32>} : memref<8x128xf32, #tpu.memory_space<vmem>>, vector<8x128xf32>,
    return
  }
  func.func @transform_0(%arg0: i32) -> (i32, i32) {
    %c0_i32 = arith.constant 0 : i32
    %c0_i32_0 = arith.constant 0 : i32
    return %arg0, %c0_i32 : i32, i32
  }
  func.func @transform_1(%arg0: i32) -> (i32, i32) {
    %c0_i32 = arith.constant 0 : i32
    %c0_i32_0 = arith.constant 0 : i32
    return %arg0, %c0_i32 : i32, i32
  }
  func.func @transform_2(%arg0: i32) -> (i32, i32) {
    %c0_i32 = arith.constant 0 : i32
    %c0_i32_0 = arith.constant 0 : i32
    %c0_i32_1 = arith.constant 0 : i32
    return %c0_i32, %c0_i32_0 : i32, i32
  }
  func.func @transform_3(%arg0: i32) -> (i32, i32) {
    %c0_i32 = arith.constant 0 : i32
    %c0_i32_0 = arith.constant 0 : i32
    %c0_i32_1 = arith.constant 0 : i32
    return %c0_i32, %c0_i32_0 : i32, i32
  }
  func.func @transform_4(%arg0: i32) -> (i32, i32) {
    %c0_i32 = arith.constant 0 : i32
    %c0_i32_0 = arith.constant 0 : i32
    %c0_i32_1 = arith.constant 0 : i32
    return %c0_i32, %c0_i32_0 : i32, i32
  }
  func.func @transform_5(%arg0: i32) -> (i32, i32) {
    %c0_i32 = arith.constant 0 : i32
    %c0_i32_0 = arith.constant 0 : i32
    %c0_i32_1 = arith.constant 0 : i32
    return %c0_i32, %c0_i32_0 : i32, i32
  }
  func.func @transform_6(%arg0: i32) -> (i32, i32) {
    %c0_i32 = arith.constant 0 : i32
    %c0_i32_0 = arith.constant 0 : i32
    %c0_i32_1 = arith.constant 0 : i32
    return %c0_i32, %c0_i32_0 : i32, i32
  }
  func.func @transform_7(%arg0: i32) -> (i32, i32) {
    %c0_i32 = arith.constant 0 : i32
    %c0_i32_0 = arith.constant 0 : i32
    %c0_i32_1 = arith.constant 0 : i32
    return %c0_i32, %c0_i32_0 : i32, i32
  }
  func.func @transform_8(%arg0: i32) -> (i32, i32) {
    %c0_i32 = arith.constant 0 : i32
    %c0_i32_0 = arith.constant 0 : i32
    %c0_i32_1 = arith.constant 0 : i32
    return %c0_i32, %c0_i32_0 : i32, i32
  }
  func.func @transform_9(%arg0: i32) -> (i32, i32) {
    %c0_i32 = arith.constant 0 : i32
    %c0_i32_0 = arith.constant 0 : i32
    %c0_i32_1 = arith.constant 0 : i32
    return %c0_i32, %c0_i32_0 : i32, i32
  }
  func.func @transform_10(%arg0: i32) -> (i32, i32) {
    %c0_i32 = arith.constant 0 : i32
    %c0_i32_0 = arith.constant 0 : i32
    return %arg0, %c0_i32 : i32, i32
  }
}

</mosaic_0001>

<bundles_post_ra>
// kernel: squeeze.3
= control target key start
LH: loop header
LB: loop body
LE: loop exit
PB: predicated region body
PF: predicated region fallthrough
CT: control target
= control target key end

     0   :  { %s884_s10 = smov 120   ;;  %vm3_vm0 = vcmask 64512   ;;  %s1275_s0 = inlined_call_operand.vmem [shape: f32[1,2,3,16,16], index: 0, kind: input, shape index: {}]   ;;  %s1276_s1 = inlined_call_operand.vmem [shape: f32[2,3,2,8,2,8], index: 1, kind: output, shape index: {}]  }
   0x1   :  { %v778_v0 = vld [vmem:[%s1275_s0 + $0x10] sm:$0xff]   ;;  %v83_v1 = vld [vmem:[%s1275_s0] sm:$0xff]   ;;  %v779_v3 = vld [vmem:[%s1275_s0 + $0x18] sm:$0xff]  }
   0x2   :  { %102 = vrot.lane.b32.xlu1 %v778_v0, %s884_s10  ;;  %84 = vrot.lane.b32.xlu0 %v83_v1, %s884_s10  ;;  %v780_v2 = vld [vmem:[%s1275_s0 + $0x20] sm:$0xff]   ;;  %v777_v4 = vld [vmem:[%s1275_s0 + $0x8] sm:$0xff]   ;;  %17 = vst.msk [vmem:[#allocation0 + $0x80] ss:$8 sm:$0xf] %vm3_vm0, %v778_v0  }
   0x3   :  { %120 = vrot.lane.b32.xlu2 %v780_v2, %s884_s10  ;;  %v781_v5 = vld [vmem:[%s1275_s0 + $0x28] sm:$0xff]   ;;  %v783_v6 = vld [vmem:[%s1275_s0 + $0x38] sm:$0xff]   ;;  %v782_v7 = vld [vmem:[%s1275_s0 + $0x30] sm:$0xff]   ;;  %31 = vst.msk [vmem:[#allocation0 + $0x100] ss:$8 sm:$0xf] %vm3_vm0, %v780_v2  }
   0x4   :  { %v784_v8 = vld [vmem:[%s1275_s0 + $0x40] sm:$0xff]   ;;  %v786_v9 = vld [vmem:[%s1275_s0 + $0x50] sm:$0xff]   ;;  %v785_v10 = vld [vmem:[%s1275_s0 + $0x48] sm:$0xff]   ;;  %33 = vst.msk [vmem:[#allocation0 + $0x100] ss:$8 sm:$0xf0] %vm3_vm0, %v780_v2  }
   0x5   :  { %v787_v11 = vld [vmem:[%s1275_s0 + $0x58] sm:$0xff]   ;;  %19 = vst.msk [vmem:[#allocation0 + $0x80] ss:$8 sm:$0xf0] %vm3_vm0, %v778_v0  }
   0x6   :  { %4 = vst.msk [vmem:[#allocation0] ss:$8 sm:$0xf] %vm3_vm0, %v83_v1  }
   0x7   :  { %5 = vst.msk [vmem:[#allocation0] ss:$8 sm:$0xf0] %vm3_vm0, %v83_v1  }
   0x8   :  { %38 = vst.msk [vmem:[#allocation0 + $0x140] ss:$8 sm:$0xf] %vm3_vm0, %v781_v5  }
   0x9   :  { %40 = vst.msk [vmem:[#allocation0 + $0x140] ss:$8 sm:$0xf0] %vm3_vm0, %v781_v5  }
   0xa   :  { %111 = vrot.lane.b32.xlu1 %v779_v3, %s884_s10  ;;  %93 = vrot.lane.b32.xlu0 %v777_v4, %s884_s10  ;;  %24 = vst.msk [vmem:[#allocation0 + $0xc0] ss:$8 sm:$0xf] %vm3_vm0, %v779_v3  }
   0xb   :  { %129 = vrot.lane.b32.xlu2 %v781_v5, %s884_s10  ;;  %26 = vst.msk [vmem:[#allocation0 + $0xc0] ss:$8 sm:$0xf0] %vm3_vm0, %v779_v3  }
   0xc   :  { %10 = vst.msk [vmem:[#allocation0 + $0x40] ss:$8 sm:$0xf] %vm3_vm0, %v777_v4  }
   0xd   :  { %12 = vst.msk [vmem:[#allocation0 + $0x40] ss:$8 sm:$0xf0] %vm3_vm0, %v777_v4  }
   0xe   :  { %59 = vst.msk [vmem:[#allocation0 + $0x200] ss:$8 sm:$0xf] %vm3_vm0, %v784_v8  }
   0xf   :  { %61 = vst.msk [vmem:[#allocation0 + $0x200] ss:$8 sm:$0xf0] %vm3_vm0, %v784_v8  }
  0x10   :  { %52 = vst.msk [vmem:[#allocation0 + $0x1c0] ss:$8 sm:$0xf] %vm3_vm0, %v783_v6  }
  0x11   :  { %54 = vst.msk [vmem:[#allocation0 + $0x1c0] ss:$8 sm:$0xf0] %vm3_vm0, %v783_v6  }
  0x12   :  { %147 = vrot.lane.b32.xlu1 %v783_v6, %s884_s10  ;;  %138 = vrot.lane.b32.xlu0 %v782_v7, %s884_s10  ;;  %45 = vst.msk [vmem:[#allocation0 + $0x180] ss:$8 sm:$0xf] %vm3_vm0, %v782_v7  }
  0x13   :  { %156 = vrot.lane.b32.xlu2 %v784_v8, %s884_s10  ;;  %47 = vst.msk [vmem:[#allocation0 + $0x180] ss:$8 sm:$0xf0] %vm3_vm0, %v782_v7  }
  0x14   :  { %80 = vst.msk [vmem:[#allocation0 + $0x2c0] ss:$8 sm:$0xf] %vm3_vm0, %v787_v11  }
  0x15   :  { %82 = vst.msk [vmem:[#allocation0 + $0x2c0] ss:$8 sm:$0xf0] %vm3_vm0, %v787_v11  }
  0x16   :  { %73 = vst.msk [vmem:[#allocation0 + $0x280] ss:$8 sm:$0xf] %vm3_vm0, %v786_v9  }
  0x17   :  { %75 = vst.msk [vmem:[#allocation0 + $0x280] ss:$8 sm:$0xf0] %vm3_vm0, %v786_v9  }
  0x18   :  { %66 = vst.msk [vmem:[#allocation0 + $0x240] ss:$8 sm:$0xf] %vm3_vm0, %v785_v10  }
  0x19   :  { %68 = vst.msk [vmem:[#allocation0 + $0x240] ss:$8 sm:$0xf0] %vm3_vm0, %v785_v10  }
  0x1a   :  { %174 = vrot.lane.b32.xlu1 %v786_v9, %s884_s10  ;;  %165 = vrot.lane.b32.xlu0 %v785_v10, %s884_s10 }
  0x1b   :  { %183 = vrot.lane.b32.xlu2 %v787_v11, %s884_s10 }
  0x5d   :  { %v121_v12 = vpop.permute.xlu2 %120  }
  0x5e   :  { %124 = vst.msk [vmem:[#allocation0 + $0x101] ss:$8 sm:$0xf] %vm3_vm0, %v121_v12  }
  0x5f   :  { %126 = vst.msk [vmem:[#allocation0 + $0x101] ss:$8 sm:$0xf0] %vm3_vm0, %v121_v12  }
  0x65   :  { %v383_v13 = vld [vmem:[#allocation0 + $0x100] sm:$0x3]  ;;  %v389_v14 = vld [vmem:[#allocation0 + $0x108] sm:$0x3]  ;;  %v395_v15 = vld [vmem:[#allocation0 + $0x110] sm:$0x3]  ;;  %v130_v21 = vpop.permute.xlu2 %129  }
  0x66   :  { %819 = vst [vmem:[%s1276_s1 + $0x40] sm:$0x3] %v383_v13  ;;  %v401_v16 = vld [vmem:[#allocation0 + $0x118] sm:$0x3]  ;;  %v407_v17 = vld [vmem:[#allocation0 + $0x120] sm:$0x3] }
  0x67   :  { %820 = vst [vmem:[%s1276_s1 + $0x42] sm:$0x3] %v389_v14  ;;  %v413_v18 = vld [vmem:[#allocation0 + $0x128] sm:$0x3]  ;;  %v419_v19 = vld [vmem:[#allocation0 + $0x130] sm:$0x3] }
  0x68   :  { %821 = vst [vmem:[%s1276_s1 + $0x44] sm:$0x3] %v395_v15  ;;  %v425_v20 = vld [vmem:[#allocation0 + $0x138] sm:$0x3] }
  0x69   :  { %822 = vst [vmem:[%s1276_s1 + $0x46] sm:$0x3] %v401_v16 }
  0x6a   :  { %823 = vst [vmem:[%s1276_s1 + $0x48] sm:$0x3] %v407_v17 }
  0x6b   :  { %824 = vst [vmem:[%s1276_s1 + $0x4a] sm:$0x3] %v413_v18 }
  0x6c   :  { %825 = vst [vmem:[%s1276_s1 + $0x4c] sm:$0x3] %v419_v19 }
  0x6d   :  { %826 = vst [vmem:[%s1276_s1 + $0x4e] sm:$0x3] %v425_v20  ;;  %v157_v44 = vpop.permute.xlu2 %156  }
  0x6e   :  { %133 = vst.msk [vmem:[#allocation0 + $0x141] ss:$8 sm:$0xf] %vm3_vm0, %v130_v21  }
  0x6f   :  { %135 = vst.msk [vmem:[#allocation0 + $0x141] ss:$8 sm:$0xf0] %vm3_vm0, %v130_v21  }
  0x70   :  { %160 = vst.msk [vmem:[#allocation0 + $0x201] ss:$8 sm:$0xf] %vm3_vm0, %v157_v44  }
  0x71   :  { %162 = vst.msk [vmem:[#allocation0 + $0x201] ss:$8 sm:$0xf0] %vm3_vm0, %v157_v44  }
  0x74   :  { %v103_v22 = vpop.permute.xlu1 %102   ;;  %v85_v23 = vpop.permute.xlu0 %84  }
  0x75   :  { %106 = vst.msk [vmem:[#allocation0 + $0x81] ss:$8 sm:$0xf] %vm3_vm0, %v103_v22   ;;  %v431_v24 = vld [vmem:[#allocation0 + $0x140] sm:$0x3]  ;;  %v184_v4 = vpop.permute.xlu2 %183  }
  0x76   :  { %108 = vst.msk [vmem:[#allocation0 + $0x81] ss:$8 sm:$0xf0] %vm3_vm0, %v103_v22   ;;  %v437_v25 = vld [vmem:[#allocation0 + $0x148] sm:$0x3] }
  0x77   :  { %88 = vst.msk [vmem:[#allocation0 + $0x1] ss:$8 sm:$0xf] %vm3_vm0, %v85_v23   ;;  %v443_v26 = vld [vmem:[#allocation0 + $0x150] sm:$0x3] }
  0x78   :  { %90 = vst.msk [vmem:[#allocation0 + $0x1] ss:$8 sm:$0xf0] %vm3_vm0, %v85_v23   ;;  %v449_v47 = vld [vmem:[#allocation0 + $0x158] sm:$0x3] }
  0x79   :  { %827 = vst [vmem:[%s1276_s1 + $0x50] sm:$0x3] %v431_v24  ;;  %v455_v48 = vld [vmem:[#allocation0 + $0x160] sm:$0x3]  ;;  %v461_v49 = vld [vmem:[#allocation0 + $0x168] sm:$0x3] }
  0x7a   :  { %828 = vst [vmem:[%s1276_s1 + $0x52] sm:$0x3] %v437_v25  ;;  %v467_v50 = vld [vmem:[#allocation0 + $0x170] sm:$0x3]  ;;  %v473_v51 = vld [vmem:[#allocation0 + $0x178] sm:$0x3] }
  0x7b   :  { %829 = vst [vmem:[%s1276_s1 + $0x54] sm:$0x3] %v443_v26  ;;  %v575_v6 = vld [vmem:[#allocation0 + $0x200] sm:$0x3]  ;;  %v581_v7 = vld [vmem:[#allocation0 + $0x208] sm:$0x3] }
  0x7c   :  { %v287_v27 = vld [vmem:[#allocation0 + $0x80] sm:$0x3]  ;;  %v293_v28 = vld [vmem:[#allocation0 + $0x88] sm:$0x3]  ;;  %v299_v29 = vld [vmem:[#allocation0 + $0x90] sm:$0x3]  ;;  %v112_v30 = vpop.permute.xlu1 %111   ;;  %v94_v31 = vpop.permute.xlu0 %93  }
  0x7d   :  { %803 = vst [vmem:[%s1276_s1 + $0x20] sm:$0x3] %v287_v27  ;;  %v305_v32 = vld [vmem:[#allocation0 + $0x98] sm:$0x3]  ;;  %v311_v33 = vld [vmem:[#allocation0 + $0xa0] sm:$0x3] }
  0x7e   :  { %804 = vst [vmem:[%s1276_s1 + $0x22] sm:$0x3] %v293_v28  ;;  %v317_v34 = vld [vmem:[#allocation0 + $0xa8] sm:$0x3]  ;;  %v323_v35 = vld [vmem:[#allocation0 + $0xb0] sm:$0x3] }
  0x7f   :  { %805 = vst [vmem:[%s1276_s1 + $0x24] sm:$0x3] %v299_v29  ;;  %v329_v36 = vld [vmem:[#allocation0 + $0xb8] sm:$0x3]  ;;  %v192_v37 = vld [vmem:[#allocation0] sm:$0x3] }
  0x80   :  { %806 = vst [vmem:[%s1276_s1 + $0x26] sm:$0x3] %v305_v32  ;;  %v197_v38 = vld [vmem:[#allocation0 + $0x8] sm:$0x3]  ;;  %v203_v39 = vld [vmem:[#allocation0 + $0x10] sm:$0x3] }
  0x81   :  { %807 = vst [vmem:[%s1276_s1 + $0x28] sm:$0x3] %v311_v33  ;;  %v209_v40 = vld [vmem:[#allocation0 + $0x18] sm:$0x3]  ;;  %v215_v41 = vld [vmem:[#allocation0 + $0x20] sm:$0x3] }
  0x82   :  { %808 = vst [vmem:[%s1276_s1 + $0x2a] sm:$0x3] %v317_v34  ;;  %v221_v42 = vld [vmem:[#allocation0 + $0x28] sm:$0x3]  ;;  %v227_v43 = vld [vmem:[#allocation0 + $0x30] sm:$0x3] }
  0x83   :  { %809 = vst [vmem:[%s1276_s1 + $0x2c] sm:$0x3] %v323_v35  ;;  %v233_v46 = vld [vmem:[#allocation0 + $0x38] sm:$0x3]  ;;  %v587_v8 = vld [vmem:[#allocation0 + $0x210] sm:$0x3] }
  0x84   :  { %810 = vst [vmem:[%s1276_s1 + $0x2e] sm:$0x3] %v329_v36  ;;  %v1032_v45 = vpop.permute.xlu1 %147   ;;  %v1064_v52 = vpop.permute.xlu0 %138   ;;  %v593_v9 = vld [vmem:[#allocation0 + $0x218] sm:$0x3]  ;;  %v599_v10 = vld [vmem:[#allocation0 + $0x220] sm:$0x3] }
  0x85   :  { %195 = vst [vmem:[%s1276_s1] sm:$0x3] %v192_v37  ;;  %v605_v11 = vld [vmem:[#allocation0 + $0x228] sm:$0x3]  ;;  %v611_v12 = vld [vmem:[#allocation0 + $0x230] sm:$0x3] }
  0x86   :  { %788 = vst [vmem:[%s1276_s1 + $0x2] sm:$0x3] %v197_v38  ;;  %v617_v14 = vld [vmem:[#allocation0 + $0x238] sm:$0x3] }
  0x87   :  { %789 = vst [vmem:[%s1276_s1 + $0x4] sm:$0x3] %v203_v39 }
  0x88   :  { %790 = vst [vmem:[%s1276_s1 + $0x6] sm:$0x3] %v209_v40 }
  0x89   :  { %791 = vst [vmem:[%s1276_s1 + $0x8] sm:$0x3] %v215_v41 }
  0x8a   :  { %792 = vst [vmem:[%s1276_s1 + $0xa] sm:$0x3] %v221_v42 }
  0x8b   :  { %793 = vst [vmem:[%s1276_s1 + $0xc] sm:$0x3] %v227_v43 }
  0x8c   :  { %794 = vst [vmem:[%s1276_s1 + $0xe] sm:$0x3] %v233_v46  ;;  %v175_v13 = vpop.permute.xlu1 %174   ;;  %v166_v19 = vpop.permute.xlu0 %165  }
  0x8d   :  { %830 = vst [vmem:[%s1276_s1 + $0x56] sm:$0x3] %v449_v47 }
  0x8e   :  { %831 = vst [vmem:[%s1276_s1 + $0x58] sm:$0x3] %v455_v48 }
  0x8f   :  { %832 = vst [vmem:[%s1276_s1 + $0x5a] sm:$0x3] %v461_v49 }
  0x90   :  { %833 = vst [vmem:[%s1276_s1 + $0x5c] sm:$0x3] %v467_v50 }
  0x91   :  { %834 = vst [vmem:[%s1276_s1 + $0x5e] sm:$0x3] %v473_v51 }
  0x92   :  { %115 = vst.msk [vmem:[#allocation0 + $0xc1] ss:$8 sm:$0xf] %vm3_vm0, %v112_v30  }
  0x93   :  { %117 = vst.msk [vmem:[#allocation0 + $0xc1] ss:$8 sm:$0xf0] %vm3_vm0, %v112_v30  }
  0x94   :  { %97 = vst.msk [vmem:[#allocation0 + $0x41] ss:$8 sm:$0xf] %vm3_vm0, %v94_v31  }
  0x95   :  { %99 = vst.msk [vmem:[#allocation0 + $0x41] ss:$8 sm:$0xf0] %vm3_vm0, %v94_v31  }
  0x96   :  { %151 = vst.msk [vmem:[#allocation0 + $0x1c1] ss:$8 sm:$0xf] %vm3_vm0, %v1032_v45  }
  0x97   :  { %851 = vst [vmem:[%s1276_s1 + $0x80] sm:$0x3] %v575_v6 }
  0x98   :  { %852 = vst [vmem:[%s1276_s1 + $0x82] sm:$0x3] %v581_v7 }
  0x99   :  { %v335_v53 = vld [vmem:[#allocation0 + $0xc0] sm:$0x3]  ;;  %v341_v54 = vld [vmem:[#allocation0 + $0xc8] sm:$0x3]  ;;  %v347_v55 = vld [vmem:[#allocation0 + $0xd0] sm:$0x3] }
  0x9a   :  { %811 = vst [vmem:[%s1276_s1 + $0x30] sm:$0x3] %v335_v53  ;;  %v353_v56 = vld [vmem:[#allocation0 + $0xd8] sm:$0x3]  ;;  %v359_v57 = vld [vmem:[#allocation0 + $0xe0] sm:$0x3] }
  0x9b   :  { %812 = vst [vmem:[%s1276_s1 + $0x32] sm:$0x3] %v341_v54  ;;  %v365_v58 = vld [vmem:[#allocation0 + $0xe8] sm:$0x3]  ;;  %v371_v59 = vld [vmem:[#allocation0 + $0xf0] sm:$0x3] }
  0x9c   :  { %813 = vst [vmem:[%s1276_s1 + $0x34] sm:$0x3] %v347_v55  ;;  %v377_v60 = vld [vmem:[#allocation0 + $0xf8] sm:$0x3]  ;;  %v239_v61 = vld [vmem:[#allocation0 + $0x40] sm:$0x3] }
  0x9d   :  { %814 = vst [vmem:[%s1276_s1 + $0x36] sm:$0x3] %v353_v56  ;;  %v245_v62 = vld [vmem:[#allocation0 + $0x48] sm:$0x3]  ;;  %v251_v63 = vld [vmem:[#allocation0 + $0x50] sm:$0x3] }
  0x9e   :  { %815 = vst [vmem:[%s1276_s1 + $0x38] sm:$0x3] %v359_v57  ;;  %v257_v0 = vld [vmem:[#allocation0 + $0x58] sm:$0x3]  ;;  %v263_v1 = vld [vmem:[#allocation0 + $0x60] sm:$0x3] }
  0x9f   :  { %816 = vst [vmem:[%s1276_s1 + $0x3a] sm:$0x3] %v365_v58  ;;  %v269_v2 = vld [vmem:[#allocation0 + $0x68] sm:$0x3]  ;;  %v275_v3 = vld [vmem:[#allocation0 + $0x70] sm:$0x3] }
  0xa0   :  { %817 = vst [vmem:[%s1276_s1 + $0x3c] sm:$0x3] %v371_v59  ;;  %v281_v5 = vld [vmem:[#allocation0 + $0x78] sm:$0x3]  ;;  %v527_v15 = vld [vmem:[#allocation0 + $0x1c0] sm:$0x3] }
  0xa1   :  { %818 = vst [vmem:[%s1276_s1 + $0x3e] sm:$0x3] %v377_v60  ;;  %v533_v16 = vld [vmem:[#allocation0 + $0x1c8] sm:$0x3]  ;;  %v539_v17 = vld [vmem:[#allocation0 + $0x1d0] sm:$0x3] }
  0xa2   :  { %795 = vst [vmem:[%s1276_s1 + $0x10] sm:$0x3] %v239_v61  ;;  %v545_v18 = vld [vmem:[#allocation0 + $0x1d8] sm:$0x3] }
  0xa3   :  { %796 = vst [vmem:[%s1276_s1 + $0x12] sm:$0x3] %v245_v62 }
  0xa4   :  { %797 = vst [vmem:[%s1276_s1 + $0x14] sm:$0x3] %v251_v63 }
  0xa5   :  { %798 = vst [vmem:[%s1276_s1 + $0x16] sm:$0x3] %v257_v0 }
  0xa6   :  { %799 = vst [vmem:[%s1276_s1 + $0x18] sm:$0x3] %v263_v1 }
  0xa7   :  { %800 = vst [vmem:[%s1276_s1 + $0x1a] sm:$0x3] %v269_v2 }
  0xa8   :  { %801 = vst [vmem:[%s1276_s1 + $0x1c] sm:$0x3] %v275_v3 }
  0xa9   :  { %802 = vst [vmem:[%s1276_s1 + $0x1e] sm:$0x3] %v281_v5 }
  0xaa   :  { %853 = vst [vmem:[%s1276_s1 + $0x84] sm:$0x3] %v587_v8 }
  0xab   :  { %854 = vst [vmem:[%s1276_s1 + $0x86] sm:$0x3] %v593_v9 }
  0xac   :  { %855 = vst [vmem:[%s1276_s1 + $0x88] sm:$0x3] %v599_v10 }
  0xad   :  { %856 = vst [vmem:[%s1276_s1 + $0x8a] sm:$0x3] %v605_v11 }
  0xae   :  { %857 = vst [vmem:[%s1276_s1 + $0x8c] sm:$0x3] %v611_v12 }
  0xaf   :  { %858 = vst [vmem:[%s1276_s1 + $0x8e] sm:$0x3] %v617_v14 }
  0xb0   :  { %153 = vst.msk [vmem:[#allocation0 + $0x1c1] ss:$8 sm:$0xf0] %vm3_vm0, %v1032_v45  }
  0xb1   :  { %843 = vst [vmem:[%s1276_s1 + $0x70] sm:$0x3] %v527_v15 }
  0xb2   :  { %844 = vst [vmem:[%s1276_s1 + $0x72] sm:$0x3] %v533_v16 }
  0xb3   :  { %845 = vst [vmem:[%s1276_s1 + $0x74] sm:$0x3] %v539_v17 }
  0xb4   :  { %846 = vst [vmem:[%s1276_s1 + $0x76] sm:$0x3] %v545_v18 }
  0xb5   :  { %142 = vst.msk [vmem:[#allocation0 + $0x181] ss:$8 sm:$0xf] %vm3_vm0, %v1064_v52  }
  0xb6   :  { %144 = vst.msk [vmem:[#allocation0 + $0x181] ss:$8 sm:$0xf0] %vm3_vm0, %v1064_v52  }
  0xb7   :  { %v551_v20 = vld [vmem:[#allocation0 + $0x1e0] sm:$0x3]  ;;  %v557_v21 = vld [vmem:[#allocation0 + $0x1e8] sm:$0x3]  ;;  %v563_v22 = vld [vmem:[#allocation0 + $0x1f0] sm:$0x3] }
  0xb8   :  { %847 = vst [vmem:[%s1276_s1 + $0x78] sm:$0x3] %v551_v20  ;;  %v569_v23 = vld [vmem:[#allocation0 + $0x1f8] sm:$0x3] }
  0xb9   :  { %848 = vst [vmem:[%s1276_s1 + $0x7a] sm:$0x3] %v557_v21 }
  0xba   :  { %849 = vst [vmem:[%s1276_s1 + $0x7c] sm:$0x3] %v563_v22 }
  0xbb   :  { %850 = vst [vmem:[%s1276_s1 + $0x7e] sm:$0x3] %v569_v23 }
  0xbc   :  { %v479_v24 = vld [vmem:[#allocation0 + $0x180] sm:$0x3]  ;;  %v485_v25 = vld [vmem:[#allocation0 + $0x188] sm:$0x3]  ;;  %v491_v26 = vld [vmem:[#allocation0 + $0x190] sm:$0x3] }
  0xbd   :  { %835 = vst [vmem:[%s1276_s1 + $0x60] sm:$0x3] %v479_v24  ;;  %v497_v27 = vld [vmem:[#allocation0 + $0x198] sm:$0x3]  ;;  %v503_v28 = vld [vmem:[#allocation0 + $0x1a0] sm:$0x3] }
  0xbe   :  { %836 = vst [vmem:[%s1276_s1 + $0x62] sm:$0x3] %v485_v25  ;;  %v509_v29 = vld [vmem:[#allocation0 + $0x1a8] sm:$0x3]  ;;  %v515_v30 = vld [vmem:[#allocation0 + $0x1b0] sm:$0x3] }
  0xbf   :  { %837 = vst [vmem:[%s1276_s1 + $0x64] sm:$0x3] %v491_v26  ;;  %v521_v31 = vld [vmem:[#allocation0 + $0x1b8] sm:$0x3] }
  0xc0   :  { %838 = vst [vmem:[%s1276_s1 + $0x66] sm:$0x3] %v497_v27 }
  0xc1   :  { %839 = vst [vmem:[%s1276_s1 + $0x68] sm:$0x3] %v503_v28 }
  0xc2   :  { %840 = vst [vmem:[%s1276_s1 + $0x6a] sm:$0x3] %v509_v29 }
  0xc3   :  { %841 = vst [vmem:[%s1276_s1 + $0x6c] sm:$0x3] %v515_v30 }
  0xc4   :  { %842 = vst [vmem:[%s1276_s1 + $0x6e] sm:$0x3] %v521_v31 }
  0xc5   :  { %187 = vst.msk [vmem:[#allocation0 + $0x2c1] ss:$8 sm:$0xf] %vm3_vm0, %v184_v4  }
  0xc6   :  { %189 = vst.msk [vmem:[#allocation0 + $0x2c1] ss:$8 sm:$0xf0] %vm3_vm0, %v184_v4  }
  0xc7   :  { %178 = vst.msk [vmem:[#allocation0 + $0x281] ss:$8 sm:$0xf] %vm3_vm0, %v175_v13  }
  0xc8   :  { %180 = vst.msk [vmem:[#allocation0 + $0x281] ss:$8 sm:$0xf0] %vm3_vm0, %v175_v13  }
  0xc9   :  { %169 = vst.msk [vmem:[#allocation0 + $0x241] ss:$8 sm:$0xf] %vm3_vm0, %v166_v19  }
  0xca   :  { %171 = vst.msk [vmem:[#allocation0 + $0x241] ss:$8 sm:$0xf0] %vm3_vm0, %v166_v19  }
  0xcc   :  { %v719_v32 = vld [vmem:[#allocation0 + $0x2c0] sm:$0x3]  ;;  %v725_v33 = vld [vmem:[#allocation0 + $0x2c8] sm:$0x3]  ;;  %v731_v34 = vld [vmem:[#allocation0 + $0x2d0] sm:$0x3] }
  0xcd   :  { %875 = vst [vmem:[%s1276_s1 + $0xb0] sm:$0x3] %v719_v32  ;;  %v737_v35 = vld [vmem:[#allocation0 + $0x2d8] sm:$0x3]  ;;  %v743_v36 = vld [vmem:[#allocation0 + $0x2e0] sm:$0x3] }
  0xce   :  { %876 = vst [vmem:[%s1276_s1 + $0xb2] sm:$0x3] %v725_v33  ;;  %v749_v37 = vld [vmem:[#allocation0 + $0x2e8] sm:$0x3]  ;;  %v755_v38 = vld [vmem:[#allocation0 + $0x2f0] sm:$0x3] }
  0xcf   :  { %877 = vst [vmem:[%s1276_s1 + $0xb4] sm:$0x3] %v731_v34  ;;  %v761_v39 = vld [vmem:[#allocation0 + $0x2f8] sm:$0x3]  ;;  %v671_v40 = vld [vmem:[#allocation0 + $0x280] sm:$0x3] }
  0xd0   :  { %878 = vst [vmem:[%s1276_s1 + $0xb6] sm:$0x3] %v737_v35  ;;  %v677_v41 = vld [vmem:[#allocation0 + $0x288] sm:$0x3]  ;;  %v683_v42 = vld [vmem:[#allocation0 + $0x290] sm:$0x3] }
  0xd1   :  { %879 = vst [vmem:[%s1276_s1 + $0xb8] sm:$0x3] %v743_v36  ;;  %v689_v43 = vld [vmem:[#allocation0 + $0x298] sm:$0x3]  ;;  %v695_v44 = vld [vmem:[#allocation0 + $0x2a0] sm:$0x3] }
  0xd2   :  { %880 = vst [vmem:[%s1276_s1 + $0xba] sm:$0x3] %v749_v37  ;;  %v701_v45 = vld [vmem:[#allocation0 + $0x2a8] sm:$0x3]  ;;  %v707_v46 = vld [vmem:[#allocation0 + $0x2b0] sm:$0x3] }
  0xd3   :  { %881 = vst [vmem:[%s1276_s1 + $0xbc] sm:$0x3] %v755_v38  ;;  %v713_v47 = vld [vmem:[#allocation0 + $0x2b8] sm:$0x3]  ;;  %v623_v48 = vld [vmem:[#allocation0 + $0x240] sm:$0x3] }
  0xd4   :  { %882 = vst [vmem:[%s1276_s1 + $0xbe] sm:$0x3] %v761_v39  ;;  %v629_v49 = vld [vmem:[#allocation0 + $0x248] sm:$0x3]  ;;  %v635_v50 = vld [vmem:[#allocation0 + $0x250] sm:$0x3] }
  0xd5   :  { %867 = vst [vmem:[%s1276_s1 + $0xa0] sm:$0x3] %v671_v40  ;;  %v641_v51 = vld [vmem:[#allocation0 + $0x258] sm:$0x3]  ;;  %v647_v52 = vld [vmem:[#allocation0 + $0x260] sm:$0x3] }
  0xd6   :  { %868 = vst [vmem:[%s1276_s1 + $0xa2] sm:$0x3] %v677_v41  ;;  %v653_v53 = vld [vmem:[#allocation0 + $0x268] sm:$0x3]  ;;  %v659_v54 = vld [vmem:[#allocation0 + $0x270] sm:$0x3] }
  0xd7   :  { %869 = vst [vmem:[%s1276_s1 + $0xa4] sm:$0x3] %v683_v42  ;;  %v665_v55 = vld [vmem:[#allocation0 + $0x278] sm:$0x3] }
  0xd8   :  { %870 = vst [vmem:[%s1276_s1 + $0xa6] sm:$0x3] %v689_v43 }
  0xd9   :  { %871 = vst [vmem:[%s1276_s1 + $0xa8] sm:$0x3] %v695_v44 }
  0xda   :  { %872 = vst [vmem:[%s1276_s1 + $0xaa] sm:$0x3] %v701_v45 }
  0xdb   :  { %873 = vst [vmem:[%s1276_s1 + $0xac] sm:$0x3] %v707_v46 }
  0xdc   :  { %874 = vst [vmem:[%s1276_s1 + $0xae] sm:$0x3] %v713_v47 }
  0xdd   :  { %859 = vst [vmem:[%s1276_s1 + $0x90] sm:$0x3] %v623_v48 }
  0xde   :  { %860 = vst [vmem:[%s1276_s1 + $0x92] sm:$0x3] %v629_v49 }
  0xdf   :  { %861 = vst [vmem:[%s1276_s1 + $0x94] sm:$0x3] %v635_v50 }
  0xe0   :  { %862 = vst [vmem:[%s1276_s1 + $0x96] sm:$0x3] %v641_v51 }
  0xe1   :  { %863 = vst [vmem:[%s1276_s1 + $0x98] sm:$0x3] %v647_v52 }
  0xe2   :  { %864 = vst [vmem:[%s1276_s1 + $0x9a] sm:$0x3] %v653_v53 }
  0xe3   :  { %865 = vst [vmem:[%s1276_s1 + $0x9c] sm:$0x3] %v659_v54 }
  0xe4   :  { %866 = vst [vmem:[%s1276_s1 + $0x9e] sm:$0x3] %v665_v55 }

// kernel: _siamese_forward.1
= control target key start
LH: loop header
LB: loop body
LE: loop exit
PB: predicated region body
PF: predicated region fallthrough
CT: control target
= control target key end

     0   :  { %s13711_s2 = inlined_call_operand.vmem [shape: bf16[256,1024], index: 2, kind: input, shape index: {}]   ;;  %s13712_s0 = inlined_call_operand.vmem [shape: bf16[8,256], index: 0, kind: input, shape index: {}]   ;;  %s13713_s1 = inlined_call_operand.vmem [shape: bf16[8,256], index: 1, kind: input, shape index: {}]   ;;  %s13714_s3 = inlined_call_operand.vmem [shape: f32[1,1024], index: 3, kind: input, shape index: {}]   ;;  %s13715_s5 = inlined_call_operand.vmem [shape: bf16[1024,512], index: 5, kind: input, shape index: {}]   ;;  %s13716_s4 = inlined_call_operand.vmem [shape: bf16[1024,512], index: 4, kind: input, shape index: {}]   ;;  %s13717_s8 = inlined_call_operand.vmem [shape: bf16[512,128], index: 8, kind: input, shape index: {}]   ;;  %s13718_s6 = inlined_call_operand.vmem [shape: f32[1,512], index: 6, kind: input, shape index: {}]   ;;  %s13719_s7 = inlined_call_operand.<no memory space> [shape: f32[1,1], index: 7, kind: input, shape index: {}]   ;;  %s13720_s9 = inlined_call_operand.vmem [shape: f32[1,128], index: 9, kind: input, shape index: {}]   ;;  %s13721_s10 = inlined_call_operand.vmem [shape: f32[8,128], index: 10, kind: output, shape index: {}]  }
   0x1   :  { %v5749_v0 = vld [vmem:[%s13711_s2 + $0x1c0] sm:$0xf]  ;;  %v8267_v5 = vld [vmem:[%s13711_s2 + $0x1c4] sm:$0xf] }
   0x2   :  { %v8271_v1 = vld [vmem:[%s13711_s2 + $0x1dc] sm:$0xf0]  ;;  %v5751_v6 = vld [vmem:[%s13711_s2 + $0x1e0] sm:$0xf0] }
   0x3   :  { %v6005_v2 = vld [vmem:[%s13711_s2 + $0x3c0] sm:$0xf]  ;;  %v8948_v3 = vor.u32 %v8271_v1, %v5749_v0  ;;  %v8961_v8 = vor.u32 %v8267_v5, %v5751_v6  ;;  %v8331_v9 = vld [vmem:[%s13711_s2 + $0x3c4] sm:$0xf] }
   0x4   :  { %v8335_v4 = vld [vmem:[%s13711_s2 + $0x3dc] sm:$0xf0]  ;;  %v6007_v10 = vld [vmem:[%s13711_s2 + $0x3e0] sm:$0xf0] }
   0x5   :  { %v8959_v7 = vor.u32 %v8335_v4, %v6005_v2  ;;  %v5717_v11 = vld [vmem:[%s13711_s2 + $0x180] sm:$0xf]  ;;  %830 = vmatpush.bf16.msra.mxu0 %v8948_v3  ;;  %v8973_v12 = vor.u32 %v8331_v9, %v6007_v10  ;;  %856 = vmatpush.bf16.msra.mxu2 %v8961_v8  ;;  %v8259_v18 = vld [vmem:[%s13711_s2 + $0x184] sm:$0xf] }
   0x6   :  { %v8263_v13 = vld [vmem:[%s13711_s2 + $0x19c] sm:$0xf0]  ;;  %v5719_v19 = vld [vmem:[%s13711_s2 + $0x1a0] sm:$0xf0] }
   0x7   :  { %v5973_v14 = vld [vmem:[%s13711_s2 + $0x380] sm:$0xf]  ;;  %843 = vmatpush.bf16.msra.mxu1 %v8959_v7  ;;  %v8986_v16 = vor.u32 %v8263_v13, %v5717_v11  ;;  %v8323_v20 = vld [vmem:[%s13711_s2 + $0x384] sm:$0xf]  ;;  %869 = vmatpush.bf16.msra.mxu3 %v8973_v12  ;;  %v9000_v21 = vor.u32 %v8259_v18, %v5719_v19 }
   0x8   :  { %v8327_v15 = vld [vmem:[%s13711_s2 + $0x39c] sm:$0xf0]  ;;  %v5975_v22 = vld [vmem:[%s13711_s2 + $0x3a0] sm:$0xf0] }
   0x9   :  { %v8988_v17 = vor.u32 %v8327_v15, %v5973_v14  ;;  %v5685_v23 = vld [vmem:[%s13711_s2 + $0x140] sm:$0xf]  ;;  %v9011_v25 = vor.u32 %v8323_v20, %v5975_v22  ;;  %v8251_v28 = vld [vmem:[%s13711_s2 + $0x144] sm:$0xf]  ;;  %831 = vmatpush.bf16.msra.mxu0 %v8986_v16  ;;  %857 = vmatpush.bf16.msra.mxu2 %v9000_v21 }
   0xa   :  { %v8255_v24 = vld [vmem:[%s13711_s2 + $0x15c] sm:$0xf0]  ;;  %v5687_v30 = vld [vmem:[%s13711_s2 + $0x160] sm:$0xf0] }
   0xb   :  { %v5941_v26 = vld [vmem:[%s13711_s2 + $0x340] sm:$0xf]  ;;  %v9023_v29 = vor.u32 %v8255_v24, %v5685_v23  ;;  %v8315_v31 = vld [vmem:[%s13711_s2 + $0x344] sm:$0xf]  ;;  %844 = vmatpush.bf16.msra.mxu1 %v8988_v17  ;;  %v9038_v34 = vor.u32 %v8251_v28, %v5687_v30  ;;  %870 = vmatpush.bf16.msra.mxu3 %v9011_v25 }
   0xc   :  { %v8319_v27 = vld [vmem:[%s13711_s2 + $0x35c] sm:$0xf0]  ;;  %v5943_v32 = vld [vmem:[%s13711_s2 + $0x360] sm:$0xf0] }
   0xd   :  { %v9036_v33 = vor.u32 %v8319_v27, %v5941_v26  ;;  %v5653_v35 = vld [vmem:[%s13711_s2 + $0x100] sm:$0xf]  ;;  %v9050_v38 = vor.u32 %v8315_v31, %v5943_v32  ;;  %v8243_v40 = vld [vmem:[%s13711_s2 + $0x104] sm:$0xf]  ;;  %832 = vmatpush.bf16.msra.mxu0 %v9023_v29  ;;  %858 = vmatpush.bf16.msra.mxu2 %v9038_v34 }
   0xe   :  { %v8247_v36 = vld [vmem:[%s13711_s2 + $0x11c] sm:$0xf0]  ;;  %v5655_v41 = vld [vmem:[%s13711_s2 + $0x120] sm:$0xf0] }
   0xf   :  { %v5909_v37 = vld [vmem:[%s13711_s2 + $0x300] sm:$0xf]  ;;  %v8307_v42 = vld [vmem:[%s13711_s2 + $0x304] sm:$0xf]  ;;  %v9068_v44 = vor.u32 %v8247_v36, %v5653_v35  ;;  %845 = vmatpush.bf16.msra.mxu1 %v9036_v33  ;;  %v9074_v46 = vor.u32 %v8243_v40, %v5655_v41  ;;  %871 = vmatpush.bf16.msra.mxu3 %v9050_v38  ;;  %v5757_v40 = vld [vmem:[%s13711_s2 + $0x1c8] sm:$0xf] }
  0x10   :  { %v8311_v39 = vld [vmem:[%s13711_s2 + $0x31c] sm:$0xf0]  ;;  %v5911_v43 = vld [vmem:[%s13711_s2 + $0x320] sm:$0xf0]  ;;  %v8272_v41 = vld [vmem:[%s13711_s2 + $0x1e4] sm:$0xf0] }
  0x11   :  { %v9072_v45 = vor.u32 %v8311_v39, %v5909_v37  ;;  %v5621_v47 = vld [vmem:[%s13711_s2 + $0xc0] sm:$0xf]  ;;  %v9086_v50 = vor.u32 %v8307_v42, %v5911_v43  ;;  %v8235_v52 = vld [vmem:[%s13711_s2 + $0xc4] sm:$0xf]  ;;  %833 = vmatpush.bf16.msra.mxu0 %v9068_v44  ;;  %859 = vmatpush.bf16.msra.mxu2 %v9074_v46  ;;  %v6013_v42 = vld [vmem:[%s13711_s2 + $0x3c8] sm:$0xf] }
  0x12   :  { %v8239_v48 = vld [vmem:[%s13711_s2 + $0xdc] sm:$0xf0]  ;;  %v5623_v53 = vld [vmem:[%s13711_s2 + $0xe0] sm:$0xf0] }
  0x13   :  { %v5877_v49 = vld [vmem:[%s13711_s2 + $0x2c0] sm:$0xf]  ;;  %v8299_v54 = vld [vmem:[%s13711_s2 + $0x2c4] sm:$0xf]  ;;  %v9104_v56 = vor.u32 %v8239_v48, %v5621_v47  ;;  %846 = vmatpush.bf16.msra.mxu1 %v9072_v45  ;;  %v9110_v58 = vor.u32 %v8235_v52, %v5623_v53  ;;  %872 = vmatpush.bf16.msra.mxu3 %v9086_v50  ;;  %v8336_v47 = vld [vmem:[%s13711_s2 + $0x3e4] sm:$0xf0] }
  0x14   :  { %v8303_v51 = vld [vmem:[%s13711_s2 + $0x2dc] sm:$0xf0]  ;;  %v5879_v55 = vld [vmem:[%s13711_s2 + $0x2e0] sm:$0xf0]  ;;  %v8268_v48 = vld [vmem:[%s13711_s2 + $0x1cc] sm:$0xf] }
  0x15   :  { %v9108_v57 = vor.u32 %v8303_v51, %v5877_v49  ;;  %v5589_v59 = vld [vmem:[%s13711_s2 + $0x80] sm:$0xf]  ;;  %v9122_v62 = vor.u32 %v8299_v54, %v5879_v55  ;;  %v8227_v0 = vld [vmem:[%s13711_s2 + $0x84] sm:$0xf]  ;;  %834 = vmatpush.bf16.msra.mxu0 %v9104_v56  ;;  %860 = vmatpush.bf16.msra.mxu2 %v9110_v58  ;;  %v5759_v49 = vld [vmem:[%s13711_s2 + $0x1e8] sm:$0xf0] }
  0x16   :  { %v8231_v60 = vld [vmem:[%s13711_s2 + $0x9c] sm:$0xf0]  ;;  %v5591_v1 = vld [vmem:[%s13711_s2 + $0xa0] sm:$0xf0]  ;;  %v8332_v53 = vld [vmem:[%s13711_s2 + $0x3cc] sm:$0xf] }
  0x17   :  { %v5845_v61 = vld [vmem:[%s13711_s2 + $0x280] sm:$0xf]  ;;  %v8291_v2 = vld [vmem:[%s13711_s2 + $0x284] sm:$0xf]  ;;  %v9140_v5 = vor.u32 %v8231_v60, %v5589_v59  ;;  %847 = vmatpush.bf16.msra.mxu1 %v9108_v57  ;;  %v9146_v9 = vor.u32 %v8227_v0, %v5591_v1  ;;  %873 = vmatpush.bf16.msra.mxu3 %v9122_v62  ;;  %v6015_v54 = vld [vmem:[%s13711_s2 + $0x3e8] sm:$0xf0]  ;;  %v9247_v59 = vor.u32 %v8272_v41, %v5757_v40 }
  0x18   :  { %v8295_v63 = vld [vmem:[%s13711_s2 + $0x29c] sm:$0xf0]  ;;  %v5847_v4 = vld [vmem:[%s13711_s2 + $0x2a0] sm:$0xf0]  ;;  %v9249_v60 = vor.u32 %v8336_v47, %v6013_v42  ;;  %v8264_v0 = vld [vmem:[%s13711_s2 + $0x1a4] sm:$0xf0] }
  0x19   :  { %v9144_v6 = vor.u32 %v8295_v63, %v5845_v61  ;;  %v5557_v10 = vld [vmem:[%s13711_s2 + $0x40] sm:$0xf]  ;;  %v9158_v14 = vor.u32 %v8291_v2, %v5847_v4  ;;  %v8219_v18 = vld [vmem:[%s13711_s2 + $0x44] sm:$0xf]  ;;  %835 = vmatpush.bf16.msra.mxu0 %v9140_v5  ;;  %861 = vmatpush.bf16.msra.mxu2 %v9146_v9  ;;  %v9251_v61 = vor.u32 %v8268_v48, %v5759_v49  ;;  %v5725_v63 = vld [vmem:[%s13711_s2 + $0x188] sm:$0xf] }
  0x1a   :  { %v8223_v11 = vld [vmem:[%s13711_s2 + $0x5c] sm:$0xf0]  ;;  %v5559_v19 = vld [vmem:[%s13711_s2 + $0x60] sm:$0xf0]  ;;  %v5981_v1 = vld [vmem:[%s13711_s2 + $0x388] sm:$0xf]  ;;  %v9263_v2 = vor.u32 %v8332_v53, %v6015_v54 }
  0x1b   :  { %v5813_v13 = vld [vmem:[%s13711_s2 + $0x240] sm:$0xf]  ;;  %v8283_v20 = vld [vmem:[%s13711_s2 + $0x244] sm:$0xf]  ;;  %v9176_v23 = vor.u32 %v8223_v11, %v5557_v10  ;;  %848 = vmatpush.bf16.msra.mxu1 %v9144_v6  ;;  %v9188_v28 = vor.u32 %v8219_v18, %v5559_v19  ;;  %874 = vmatpush.bf16.msra.mxu3 %v9158_v14  ;;  %v8328_v4 = vld [vmem:[%s13711_s2 + $0x3a4] sm:$0xf0]  ;;  %v9284_v18 = vor.u32 %v8264_v0, %v5725_v63 }
  0x1c   :  { %v8287_v15 = vld [vmem:[%s13711_s2 + $0x25c] sm:$0xf0]  ;;  %v5815_v22 = vld [vmem:[%s13711_s2 + $0x260] sm:$0xf0]  ;;  %v8260_v10 = vld [vmem:[%s13711_s2 + $0x18c] sm:$0xf]  ;;  %v9288_v19 = vor.u32 %v8328_v4, %v5981_v1 }
  0x1d   :  { %v5525_v24 = vld [vmem:[%s13711_s2] sm:$0xf]  ;;  %v9186_v27 = vor.u32 %v8287_v15, %v5813_v13  ;;  %v8211_v32 = vld [vmem:[%s13711_s2 + $0x4] sm:$0xf]  ;;  %v9200_v35 = vor.u32 %v8283_v20, %v5815_v22  ;;  %836 = vmatpush.bf16.msra.mxu0 %v9176_v23  ;;  %862 = vmatpush.bf16.msra.mxu2 %v9188_v28  ;;  %v5727_v11 = vld [vmem:[%s13711_s2 + $0x1a8] sm:$0xf0] }
  0x1e   :  { %v8215_v26 = vld [vmem:[%s13711_s2 + $0x1c] sm:$0xf0]  ;;  %v5527_v36 = vld [vmem:[%s13711_s2 + $0x20] sm:$0xf0]  ;;  %v8324_v13 = vld [vmem:[%s13711_s2 + $0x38c] sm:$0xf]  ;;  %v9290_v20 = vor.u32 %v8260_v10, %v5727_v11 }
  0x1f   :  { %v5781_v30 = vld [vmem:[%s13711_s2 + $0x200] sm:$0xf]  ;;  %v8275_v37 = vld [vmem:[%s13711_s2 + $0x204] sm:$0xf]  ;;  %v9221_v43 = vor.u32 %v8215_v26, %v5525_v24  ;;  %849 = vmatpush.bf16.msra.mxu1 %v9186_v27  ;;  %v9236_v52 = vor.u32 %v8211_v32, %v5527_v36  ;;  %875 = vmatpush.bf16.msra.mxu3 %v9200_v35  ;;  %v5983_v15 = vld [vmem:[%s13711_s2 + $0x3a8] sm:$0xf0] }
  0x20   :  { %v8279_v31 = vld [vmem:[%s13711_s2 + $0x21c] sm:$0xf0]  ;;  %v5783_v39 = vld [vmem:[%s13711_s2 + $0x220] sm:$0xf0]  ;;  %v5693_v22 = vld [vmem:[%s13711_s2 + $0x148] sm:$0xf] }
  0x21   :  { %v9234_v51 = vor.u32 %v8279_v31, %v5781_v30  ;;  %v9245_v55 = vor.u32 %v8275_v37, %v5783_v39  ;;  %837 = vmatpush.bf16.msra.mxu0 %v9221_v43  ;;  %863 = vmatpush.bf16.msra.mxu2 %v9236_v52  ;;  %v8256_v24 = vld [vmem:[%s13711_s2 + $0x164] sm:$0xf0]  ;;  %v9302_v30 = vor.u32 %v8324_v13, %v5983_v15  ;;  %v8252_v32 = vld [vmem:[%s13711_s2 + $0x14c] sm:$0xf]  ;;  %v36_v41 = vld [vmem:[%s13712_s0] sm:$0xff] }
  0x22   :  { %v5949_v26 = vld [vmem:[%s13711_s2 + $0x348] sm:$0xf]  ;;  %v5695_v36 = vld [vmem:[%s13711_s2 + $0x168] sm:$0xf0]  ;;  %v9320_v40 = vor.u32 %v8256_v24, %v5693_v22  ;;  %v184_v54 = vunpack.c.l.b16 %v36_v41  ;;  %v185_v63 = vunpack.c.h.b16 %v36_v41 }
  0x23   :  { %850 = vmatpush.bf16.msra.mxu1 %v9234_v51  ;;  %876 = vmatpush.bf16.msra.mxu3 %v9245_v55  ;;  %v8320_v31 = vld [vmem:[%s13711_s2 + $0x364] sm:$0xf0]  ;;  %v8316_v37 = vld [vmem:[%s13711_s2 + $0x34c] sm:$0xf]  ;;  %v9329_v47 = vor.u32 %v8252_v32, %v5695_v36 }
  0x24   :  { %v5951_v39 = vld [vmem:[%s13711_s2 + $0x368] sm:$0xf0]  ;;  %13796 = vst [vmem:[#allocation3_spill] sm:$0xff] %v9320_v40  ;;  %v9327_v42 = vor.u32 %v8320_v31, %v5949_v26  ;;  %v5661_v48 = vld [vmem:[%s13711_s2 + $0x108] sm:$0xf]  ;;  %v9358_v15 = vpack.c.b16 %v184_v54, %v184_v54  ;;  %v9360_v22 = vpack.c.b16 %v185_v63, %v185_v63 }
  0x25   :  { %882 = vmatpush.bf16.msrb.mxu0 %v9247_v59  ;;  %908 = vmatpush.bf16.msrb.mxu2 %v9251_v61  ;;  %13798 = vst [vmem:[#allocation5_spill] sm:$0xff] %v9329_v47  ;;  %v8248_v49 = vld [vmem:[%s13711_s2 + $0x124] sm:$0xf0]  ;;  %v9341_v0 = vor.u32 %v8316_v37, %v5951_v39  ;;  %v8244_v4 = vld [vmem:[%s13711_s2 + $0x10c] sm:$0xf] }
  0x26   :  { %13797 = vst [vmem:[#allocation4_spill] sm:$0xff] %v9327_v42  ;;  %v5917_v53 = vld [vmem:[%s13711_s2 + $0x308] sm:$0xf]  ;;  %v5663_v10 = vld [vmem:[%s13711_s2 + $0x128] sm:$0xf0]  ;;  %v9363_v24 = vor.u32 %v8248_v49, %v5661_v48  ;;  %864 = vmatmul.bf16.vlgmr.msra.gmra.mxu2 %v9358_v15  ;;  %877 = vmatmul.bf16.vlgmr.msra.gmra.mxu3 %v9360_v22 }
  0x27   :  { %895 = vmatpush.bf16.msrb.mxu1 %v9249_v60  ;;  %921 = vmatpush.bf16.msrb.mxu3 %v9263_v2  ;;  %13799 = vst [vmem:[#allocation6_spill] sm:$0xff] %v9341_v0  ;;  %v8312_v1 = vld [vmem:[%s13711_s2 + $0x324] sm:$0xf0]  ;;  %v8308_v11 = vld [vmem:[%s13711_s2 + $0x30c] sm:$0xf]  ;;  %v9369_v31 = vor.u32 %v8244_v4, %v5663_v10 }
  0x28   :  { %v5919_v13 = vld [vmem:[%s13711_s2 + $0x328] sm:$0xf0]  ;;  %13800 = vst [vmem:[#allocation7_spill] sm:$0xff] %v9363_v24  ;;  %v9367_v26 = vor.u32 %v8312_v1, %v5917_v53  ;;  %v5629_v32 = vld [vmem:[%s13711_s2 + $0xc8] sm:$0xf]  ;;  %838 = vmatmul.bf16.vlgmr.msra.gmra.mxu0 %v9358_v15  ;;  %851 = vmatmul.bf16.vlgmr.msra.gmra.mxu1 %v9360_v22 }
  0x29   :  { %883 = vmatpush.bf16.msrb.mxu0 %v9284_v18  ;;  %909 = vmatpush.bf16.msrb.mxu2 %v9290_v20  ;;  %13802 = vst [vmem:[#allocation9_spill] sm:$0xff] %v9369_v31  ;;  %v8240_v36 = vld [vmem:[%s13711_s2 + $0xe4] sm:$0xf0]  ;;  %v9381_v39 = vor.u32 %v8308_v11, %v5919_v13  ;;  %v8236_v48 = vld [vmem:[%s13711_s2 + $0xcc] sm:$0xf] }
  0x2a   :  { %13801 = vst [vmem:[#allocation8_spill] sm:$0xff] %v9367_v26  ;;  %v5885_v37 = vld [vmem:[%s13711_s2 + $0x2c8] sm:$0xf]  ;;  %v5631_v49 = vld [vmem:[%s13711_s2 + $0xe8] sm:$0xf0]  ;;  %v9402_v63 = vor.u32 %v8240_v36, %v5629_v32 }
  0x2b   :  { %896 = vmatpush.bf16.msrb.mxu1 %v9288_v19  ;;  %922 = vmatpush.bf16.msrb.mxu3 %v9302_v30  ;;  %13803 = vst [vmem:[#allocation10_spill] sm:$0xff] %v9381_v39  ;;  %v8304_v41 = vld [vmem:[%s13711_s2 + $0x2e4] sm:$0xf0]  ;;  %v8300_v53 = vld [vmem:[%s13711_s2 + $0x2cc] sm:$0xf]  ;;  %v9409_v4 = vor.u32 %v8236_v48, %v5631_v49 }
  0x2c   :  { %v5887_v54 = vld [vmem:[%s13711_s2 + $0x2e8] sm:$0xf0]  ;;  %13804 = vst [vmem:[#allocation11_spill] sm:$0xff] %v9402_v63  ;;  %v9407_v1 = vor.u32 %v8304_v41, %v5885_v37  ;;  %v5597_v10 = vld [vmem:[%s13711_s2 + $0x88] sm:$0xf] }
  0x2d   :  { %884 = vmatpush.bf16.msrb.mxu0 %v9320_v40  ;;  %910 = vmatpush.bf16.msrb.mxu2 %v9329_v47  ;;  %13806 = vst [vmem:[#allocation13_spill] sm:$0xff] %v9409_v4  ;;  %v8232_v11 = vld [vmem:[%s13711_s2 + $0xa4] sm:$0xf0]  ;;  %v9421_v32 = vor.u32 %v8300_v53, %v5887_v54  ;;  %v8228_v37 = vld [vmem:[%s13711_s2 + $0x8c] sm:$0xf] }
  0x2e   :  { %13805 = vst [vmem:[#allocation12_spill] sm:$0xff] %v9407_v1  ;;  %v5853_v13 = vld [vmem:[%s13711_s2 + $0x288] sm:$0xf]  ;;  %v5599_v41 = vld [vmem:[%s13711_s2 + $0xa8] sm:$0xf0]  ;;  %v9439_v53 = vor.u32 %v8232_v11, %v5597_v10 }
  0x2f   :  { %897 = vmatpush.bf16.msrb.mxu1 %v9327_v42  ;;  %923 = vmatpush.bf16.msrb.mxu3 %v9341_v0  ;;  %13807 = vst [vmem:[#allocation14_spill] sm:$0xff] %v9421_v32  ;;  %v8296_v36 = vld [vmem:[%s13711_s2 + $0x2a4] sm:$0xf0]  ;;  %v8292_v48 = vld [vmem:[%s13711_s2 + $0x28c] sm:$0xf] }
  0x30   :  { %v5855_v49 = vld [vmem:[%s13711_s2 + $0x2a8] sm:$0xf0]  ;;  %13808 = vst [vmem:[#allocation15_spill] sm:$0xff] %v9439_v53  ;;  %v9443_v54 = vor.u32 %v8296_v36, %v5853_v13  ;;  %v5821_v10 = vld [vmem:[%s13711_s2 + $0x248] sm:$0xf] }
  0x31   :  { %885 = vmatpush.bf16.msrb.mxu0 %v9363_v24  ;;  %911 = vmatpush.bf16.msrb.mxu2 %v9369_v31  ;;  %v5565_v31 = vld [vmem:[%s13711_s2 + $0x48] sm:$0xf]  ;;  %v9457_v11 = vor.u32 %v8292_v48, %v5855_v49  ;;  %v8220_v36 = vld [vmem:[%s13711_s2 + $0x4c] sm:$0xf]  ;;  %v8269_v24 = vld [vmem:[%s13711_s2 + $0x1d4] sm:$0xf] }
  0x32   :  { %13809 = vst [vmem:[#allocation16_spill] sm:$0xff] %v9443_v54  ;;  %v8288_v13 = vld [vmem:[%s13711_s2 + $0x264] sm:$0xf0]  ;;  %v5823_v48 = vld [vmem:[%s13711_s2 + $0x268] sm:$0xf0] }
  0x33   :  { %898 = vmatpush.bf16.msrb.mxu1 %v9367_v26  ;;  %924 = vmatpush.bf16.msrb.mxu3 %v9381_v39  ;;  %v9445_v39 = vor.u32 %v8228_v37, %v5599_v41  ;;  %v8224_v26 = vld [vmem:[%s13711_s2 + $0x64] sm:$0xf0]  ;;  %13811 = vst [vmem:[#allocation18_spill] sm:$0xff] %v9457_v11  ;;  %v5567_v37 = vld [vmem:[%s13711_s2 + $0x68] sm:$0xf0] }
  0x34   :  { %v8284_v41 = vld [vmem:[%s13711_s2 + $0x24c] sm:$0xf]  ;;  %v9475_v49 = vor.u32 %v8224_v26, %v5565_v31  ;;  %v5789_v26 = vld [vmem:[%s13711_s2 + $0x208] sm:$0xf]  ;;  %v5767_v0 = vld [vmem:[%s13711_s2 + $0x1f0] sm:$0xf0] }
  0x35   :  { %886 = vmatpush.bf16.msrb.mxu0 %v9402_v63  ;;  %912 = vmatpush.bf16.msrb.mxu2 %v9409_v4  ;;  %13810 = vst [vmem:[#allocation17_spill] sm:$0xff] %v9445_v39  ;;  %v8216_v4 = vld [vmem:[%s13711_s2 + $0x24] sm:$0xf0]  ;;  %v9487_v63 = vor.u32 %v8220_v36, %v5567_v37  ;;  %v5791_v36 = vld [vmem:[%s13711_s2 + $0x228] sm:$0xf0] }
  0x36   :  { %13812 = vst [vmem:[#allocation19_spill] sm:$0xff] %v9475_v49  ;;  %v8280_v31 = vld [vmem:[%s13711_s2 + $0x224] sm:$0xf0]  ;;  %v5765_v37 = vld [vmem:[%s13711_s2 + $0x1d0] sm:$0xf] }
  0x37   :  { %899 = vmatpush.bf16.msrb.mxu1 %v9407_v1  ;;  %925 = vmatpush.bf16.msrb.mxu3 %v9421_v32  ;;  %v5533_v32 = vld [vmem:[%s13711_s2 + $0x8] sm:$0xf]  ;;  %v9485_v1 = vor.u32 %v8288_v13, %v5821_v10  ;;  %13814 = vst [vmem:[#allocation21_spill] sm:$0xff] %v9487_v63  ;;  %v5535_v10 = vld [vmem:[%s13711_s2 + $0x28] sm:$0xf0]  ;;  %v9533_v47 = vor.u32 %v8280_v31, %v5789_v26 }
  0x38   :  { %v8276_v13 = vld [vmem:[%s13711_s2 + $0x20c] sm:$0xf]  ;;  %v9550_v26 = vor.u32 %v8269_v24, %v5767_v0  ;;  %v8265_v31 = vld [vmem:[%s13711_s2 + $0x1ac] sm:$0xf0]  ;;  %v8261_v24 = vld [vmem:[%s13711_s2 + $0x194] sm:$0xf] }
  0x39   :  { %887 = vmatpush.bf16.msrb.mxu0 %v9439_v53  ;;  %913 = vmatpush.bf16.msrb.mxu2 %v9445_v39  ;;  %13813 = vst [vmem:[#allocation20_spill] sm:$0xff] %v9485_v1  ;;  %v8212_v53 = vld [vmem:[%s13711_s2 + $0xc] sm:$0xf]  ;;  %v8337_v39 = vld [vmem:[%s13711_s2 + $0x3ec] sm:$0xf0]  ;;  %v9544_v42 = vor.u32 %v8276_v13, %v5791_v36 }
  0x3a   :  { %13817 = vst [vmem:[#allocation24_spill] sm:$0xff] %v9533_v47  ;;  %v8329_v0 = vld [vmem:[%s13711_s2 + $0x3ac] sm:$0xf0]  ;;  %v5991_v36 = vld [vmem:[%s13711_s2 + $0x3b0] sm:$0xf0] }
  0x3b   :  { %900 = vmatpush.bf16.msrb.mxu1 %v9443_v54  ;;  %926 = vmatpush.bf16.msrb.mxu3 %v9457_v11  ;;  %v9499_v54 = vor.u32 %v8284_v41, %v5823_v48  ;;  %v8273_v41 = vld [vmem:[%s13711_s2 + $0x1ec] sm:$0xf0]  ;;  %v9520_v11 = vor.u32 %v8216_v4, %v5533_v32  ;;  %v9535_v4 = vor.u32 %v8212_v53, %v5535_v10  ;;  %v8333_v32 = vld [vmem:[%s13711_s2 + $0x3d4] sm:$0xf] }
  0x3c   :  { %v6021_v48 = vld [vmem:[%s13711_s2 + $0x3d0] sm:$0xf]  ;;  %13819 = vst [vmem:[#allocation26_spill] sm:$0xff] %v9544_v42  ;;  %v9546_v40 = vor.u32 %v8273_v41, %v5765_v37 }
  0x3d   :  { %13815 = vst [vmem:[#allocation22_spill] sm:$0xff] %v9499_v54  ;;  %888 = vmatpush.bf16.msrb.mxu0 %v9475_v49  ;;  %914 = vmatpush.bf16.msrb.mxu2 %v9487_v63  ;;  %v6023_v49 = vld [vmem:[%s13711_s2 + $0x3f0] sm:$0xf0]  ;;  %v5733_v53 = vld [vmem:[%s13711_s2 + $0x190] sm:$0xf] }
  0x3e   :  { %13816 = vst [vmem:[#allocation23_spill] sm:$0xff] %v9520_v11  ;;  %v5989_v10 = vld [vmem:[%s13711_s2 + $0x390] sm:$0xf]  ;;  %v9562_v13 = vor.u32 %v8333_v32, %v6023_v49  ;;  %v8325_v49 = vld [vmem:[%s13711_s2 + $0x394] sm:$0xf]  ;;  %v9583_v37 = vor.u32 %v8265_v31, %v5733_v53 }
  0x3f   :  { %901 = vmatpush.bf16.msrb.mxu1 %v9485_v1  ;;  %13818 = vst [vmem:[#allocation25_spill] sm:$0xff] %v9535_v4  ;;  %927 = vmatpush.bf16.msrb.mxu3 %v9499_v54  ;;  %v9548_v1 = vor.u32 %v8337_v39, %v6021_v48  ;;  %v5735_v39 = vld [vmem:[%s13711_s2 + $0x1b0] sm:$0xf0]  ;;  %v9587_v41 = vor.u32 %v8329_v0, %v5989_v10  ;;  %v5701_v32 = vld [vmem:[%s13711_s2 + $0x150] sm:$0xf] }
  0x40   :  { %13820 = vst [vmem:[#allocation27_spill] sm:$0xff] %v9546_v40  ;;  %v9589_v48 = vor.u32 %v8261_v24, %v5735_v39  ;;  %v5957_v53 = vld [vmem:[%s13711_s2 + $0x350] sm:$0xf]  ;;  %v9601_v31 = vor.u32 %v8325_v49, %v5991_v36  ;;  %v8253_v0 = vld [vmem:[%s13711_s2 + $0x154] sm:$0xf] }
  0x41   :  { %13821 = vst [vmem:[#allocation28_spill] sm:$0xff] %v9548_v1  ;;  %889 = vmatpush.bf16.msrb.mxu0 %v9520_v11  ;;  %915 = vmatpush.bf16.msrb.mxu2 %v9535_v4  ;;  %v8321_v10 = vld [vmem:[%s13711_s2 + $0x36c] sm:$0xf0]  ;;  %v5703_v24 = vld [vmem:[%s13711_s2 + $0x170] sm:$0xf0] }
  0x42   :  { %13822 = vst [vmem:[#allocation29_spill] sm:$0xff] %v9550_v26  ;;  %v8317_v39 = vld [vmem:[%s13711_s2 + $0x354] sm:$0xf]  ;;  %v8270_v4 = vld [vmem:[%s13711_s2 + $0x1dc] sm:$0xf] }
  0x43   :  { %13823 = vst [vmem:[#allocation30_spill] sm:$0xff] %v9562_v13  ;;  %902 = vmatpush.bf16.msrb.mxu1 %v9533_v47  ;;  %928 = vmatpush.bf16.msrb.mxu3 %v9544_v42  ;;  %v8257_v42 = vld [vmem:[%s13711_s2 + $0x16c] sm:$0xf0]  ;;  %v5959_v49 = vld [vmem:[%s13711_s2 + $0x370] sm:$0xf0] }
  0x44   :  { %13824 = vst [vmem:[#allocation31_spill] sm:$0xff] %v9583_v37  ;;  %916 = vmatmul.bf16.vlgmr.msrb.gmra.mxu2 %v9358_v15  ;;  %890 = vmatmul.bf16.vlgmr.msrb.gmra.mxu0 %v9358_v15  ;;  %v9622_v36 = vor.u32 %v8257_v42, %v5701_v32  ;;  %v5925_v42 = vld [vmem:[%s13711_s2 + $0x310] sm:$0xf]  ;;  %v9641_v32 = vor.u32 %v8317_v39, %v5959_v49  ;;  %v5927_v39 = vld [vmem:[%s13711_s2 + $0x330] sm:$0xf0] }
  0x45   :  { %934 = vmatpush.bf16.msra.mxu0 %v9546_v40  ;;  %960 = vmatpush.bf16.msra.mxu2 %v9550_v26  ;;  %13825 = vst [vmem:[#allocation32_spill] sm:$0xff] %v9587_v41  ;;  %v9629_v26 = vor.u32 %v8253_v0, %v5703_v24  ;;  %v5671_v0 = vld [vmem:[%s13711_s2 + $0x130] sm:$0xf0]  ;;  %v8241_v40 = vld [vmem:[%s13711_s2 + $0xec] sm:$0xf0] }
  0x46   :  { %13826 = vst [vmem:[#allocation33_spill] sm:$0xff] %v9589_v48  ;;  %929 = vmatmul.bf16.vlgmr.msrb.gmra.mxu3 %v9360_v22  ;;  %903 = vmatmul.bf16.vlgmr.msrb.gmra.mxu1 %v9360_v22  ;;  %v8309_v24 = vld [vmem:[%s13711_s2 + $0x314] sm:$0xf]  ;;  %v5775_v47 = vld [vmem:[%s13711_s2 + $0x1f8] sm:$0xf0] }
  0x47   :  { %947 = vmatpush.bf16.msra.mxu1 %v9548_v1  ;;  %973 = vmatpush.bf16.msra.mxu3 %v9562_v13  ;;  %13827 = vst [vmem:[#allocation34_spill] sm:$0xff] %v9601_v31  ;;  %v9627_v13 = vor.u32 %v8321_v10, %v5957_v53  ;;  %v5669_v1 = vld [vmem:[%s13711_s2 + $0x110] sm:$0xf]  ;;  %v8245_v10 = vld [vmem:[%s13711_s2 + $0x114] sm:$0xf] }
  0x48   :  { %13828 = vst [vmem:[#allocation35_spill] sm:$0xff] %v9622_v36  ;;  %v8313_v53 = vld [vmem:[%s13711_s2 + $0x32c] sm:$0xf0] }
  0x49   :  { %935 = vmatpush.bf16.msra.mxu0 %v9583_v37  ;;  %961 = vmatpush.bf16.msra.mxu2 %v9589_v48  ;;  %13829 = vst [vmem:[#allocation36_spill] sm:$0xff] %v9627_v13  ;;  %v8249_v37 = vld [vmem:[%s13711_s2 + $0x12c] sm:$0xf0]  ;;  %v9665_v48 = vor.u32 %v8245_v10, %v5671_v0  ;;  %v5639_v10 = vld [vmem:[%s13711_s2 + $0xf0] sm:$0xf0] }
  0x4a   :  { %13830 = vst [vmem:[#allocation37_spill] sm:$0xff] %v9629_v26  ;;  %v9659_v49 = vor.u32 %v8249_v37, %v5669_v1  ;;  %v5893_v1 = vld [vmem:[%s13711_s2 + $0x2d0] sm:$0xf]  ;;  %v9677_v37 = vor.u32 %v8309_v24, %v5927_v39  ;;  %v8301_v0 = vld [vmem:[%s13711_s2 + $0x2d4] sm:$0xf] }
  0x4b   :  { %948 = vmatpush.bf16.msra.mxu1 %v9587_v41  ;;  %974 = vmatpush.bf16.msra.mxu3 %v9601_v31  ;;  %13831 = vst [vmem:[#allocation38_spill] sm:$0xff] %v9641_v32  ;;  %v9663_v31 = vor.u32 %v8313_v53, %v5925_v42  ;;  %v5637_v41 = vld [vmem:[%s13711_s2 + $0xd0] sm:$0xf]  ;;  %v8237_v53 = vld [vmem:[%s13711_s2 + $0xd4] sm:$0xf] }
  0x4c   :  { %13832 = vst [vmem:[#allocation39_spill] sm:$0xff] %v9659_v49  ;;  %v8305_v42 = vld [vmem:[%s13711_s2 + $0x2ec] sm:$0xf0]  ;;  %v5895_v24 = vld [vmem:[%s13711_s2 + $0x2f0] sm:$0xf0]  ;;  %v9695_v39 = vor.u32 %v8241_v40, %v5637_v41 }
  0x4d   :  { %936 = vmatpush.bf16.msra.mxu0 %v9622_v36  ;;  %962 = vmatpush.bf16.msra.mxu2 %v9629_v26  ;;  %13833 = vst [vmem:[#allocation40_spill] sm:$0xff] %v9663_v31  ;;  %v9701_v26 = vor.u32 %v8237_v53, %v5639_v10  ;;  %v8233_v36 = vld [vmem:[%s13711_s2 + $0xac] sm:$0xf0]  ;;  %v9713_v41 = vor.u32 %v8301_v0, %v5895_v24  ;;  %v5607_v53 = vld [vmem:[%s13711_s2 + $0xb0] sm:$0xf0] }
  0x4e   :  { %13834 = vst [vmem:[#allocation41_spill] sm:$0xff] %v9665_v48  ;;  %v5861_v40 = vld [vmem:[%s13711_s2 + $0x290] sm:$0xf]  ;;  %v8293_v10 = vld [vmem:[%s13711_s2 + $0x294] sm:$0xf] }
  0x4f   :  { %949 = vmatpush.bf16.msra.mxu1 %v9627_v13  ;;  %975 = vmatpush.bf16.msra.mxu3 %v9641_v32  ;;  %13835 = vst [vmem:[#allocation42_spill] sm:$0xff] %v9677_v37  ;;  %v9699_v32 = vor.u32 %v8305_v42, %v5893_v1  ;;  %v5605_v13 = vld [vmem:[%s13711_s2 + $0x90] sm:$0xf]  ;;  %v8229_v42 = vld [vmem:[%s13711_s2 + $0x94] sm:$0xf] }
  0x50   :  { %13836 = vst [vmem:[#allocation43_spill] sm:$0xff] %v9695_v39  ;;  %v8297_v1 = vld [vmem:[%s13711_s2 + $0x2ac] sm:$0xf0]  ;;  %v5863_v0 = vld [vmem:[%s13711_s2 + $0x2b0] sm:$0xf0]  ;;  %v9731_v24 = vor.u32 %v8233_v36, %v5605_v13 }
  0x51   :  { %937 = vmatpush.bf16.msra.mxu0 %v9659_v49  ;;  %963 = vmatpush.bf16.msra.mxu2 %v9665_v48  ;;  %13837 = vst [vmem:[#allocation44_spill] sm:$0xff] %v9699_v32  ;;  %v9737_v48 = vor.u32 %v8229_v42, %v5607_v53  ;;  %v8225_v49 = vld [vmem:[%s13711_s2 + $0x6c] sm:$0xf0]  ;;  %v9749_v36 = vor.u32 %v8293_v10, %v5863_v0  ;;  %v5575_v42 = vld [vmem:[%s13711_s2 + $0x70] sm:$0xf0] }
  0x52   :  { %13838 = vst [vmem:[#allocation45_spill] sm:$0xff] %v9701_v26  ;;  %v5829_v13 = vld [vmem:[%s13711_s2 + $0x250] sm:$0xf]  ;;  %v8285_v53 = vld [vmem:[%s13711_s2 + $0x254] sm:$0xf] }
  0x53   :  { %950 = vmatpush.bf16.msra.mxu1 %v9663_v31  ;;  %976 = vmatpush.bf16.msra.mxu3 %v9677_v37  ;;  %13839 = vst [vmem:[#allocation46_spill] sm:$0xff] %v9713_v41  ;;  %v9735_v37 = vor.u32 %v8297_v1, %v5861_v40  ;;  %v5573_v31 = vld [vmem:[%s13711_s2 + $0x50] sm:$0xf]  ;;  %v8221_v1 = vld [vmem:[%s13711_s2 + $0x54] sm:$0xf] }
  0x54   :  { %13840 = vst [vmem:[#allocation47_spill] sm:$0xff] %v9731_v24  ;;  %v8289_v40 = vld [vmem:[%s13711_s2 + $0x26c] sm:$0xf0]  ;;  %v5831_v10 = vld [vmem:[%s13711_s2 + $0x270] sm:$0xf0]  ;;  %v9767_v0 = vor.u32 %v8225_v49, %v5573_v31 }
  0x55   :  { %938 = vmatpush.bf16.msra.mxu0 %v9695_v39  ;;  %964 = vmatpush.bf16.msra.mxu2 %v9701_v26  ;;  %13841 = vst [vmem:[#allocation48_spill] sm:$0xff] %v9735_v37  ;;  %v8217_v26 = vld [vmem:[%s13711_s2 + $0x2c] sm:$0xf0]  ;;  %v9779_v39 = vor.u32 %v8221_v1, %v5575_v42  ;;  %v5799_v1 = vld [vmem:[%s13711_s2 + $0x230] sm:$0xf0] }
  0x56   :  { %13842 = vst [vmem:[#allocation49_spill] sm:$0xff] %v9737_v48  ;;  %v5797_v31 = vld [vmem:[%s13711_s2 + $0x210] sm:$0xf]  ;;  %v5773_v42 = vld [vmem:[%s13711_s2 + $0x1d8] sm:$0xf] }
  0x57   :  { %951 = vmatpush.bf16.msra.mxu1 %v9699_v32  ;;  %977 = vmatpush.bf16.msra.mxu3 %v9713_v41  ;;  %13843 = vst [vmem:[#allocation50_spill] sm:$0xff] %v9749_v36  ;;  %v5541_v41 = vld [vmem:[%s13711_s2 + $0x10] sm:$0xf]  ;;  %v9777_v32 = vor.u32 %v8289_v40, %v5829_v13  ;;  %v5543_v13 = vld [vmem:[%s13711_s2 + $0x30] sm:$0xf0] }
  0x58   :  { %13844 = vst [vmem:[#allocation51_spill] sm:$0xff] %v9767_v0  ;;  %v8281_v49 = vld [vmem:[%s13711_s2 + $0x22c] sm:$0xf0]  ;;  %v8277_v40 = vld [vmem:[%s13711_s2 + $0x214] sm:$0xf] }
  0x59   :  { %939 = vmatpush.bf16.msra.mxu0 %v9731_v24  ;;  %965 = vmatpush.bf16.msra.mxu2 %v9737_v48  ;;  %13845 = vst [vmem:[#allocation52_spill] sm:$0xff] %v9777_v32  ;;  %v8213_v24 = vld [vmem:[%s13711_s2 + $0x14] sm:$0xf]  ;;  %v8338_v48 = vld [vmem:[%s13711_s2 + $0x3f4] sm:$0xf0]  ;;  %v9825_v11 = vor.u32 %v8281_v49, %v5797_v31  ;;  %v9836_v54 = vor.u32 %v8277_v40, %v5799_v1 }
  0x5a   :  { %v9842_v31 = vor.u32 %v8270_v4, %v5775_v47  ;;  %v8266_v49 = vld [vmem:[%s13711_s2 + $0x1b4] sm:$0xf0]  ;;  %v8262_v4 = vld [vmem:[%s13711_s2 + $0x19c] sm:$0xf] }
  0x5b   :  { %952 = vmatpush.bf16.msra.mxu1 %v9735_v37  ;;  %978 = vmatpush.bf16.msra.mxu3 %v9749_v36  ;;  %v9791_v37 = vor.u32 %v8285_v53, %v5831_v10  ;;  %v8274_v53 = vld [vmem:[%s13711_s2 + $0x1f4] sm:$0xf0]  ;;  %v9812_v36 = vor.u32 %v8217_v26, %v5541_v41  ;;  %v9827_v26 = vor.u32 %v8213_v24, %v5543_v13  ;;  %v8334_v41 = vld [vmem:[%s13711_s2 + $0x3dc] sm:$0xf] }
  0x5c   :  { %v6029_v10 = vld [vmem:[%s13711_s2 + $0x3d8] sm:$0xf]  ;;  %13846 = vst [vmem:[#allocation53_spill] sm:$0xff] %v9836_v54  ;;  %v9838_v63 = vor.u32 %v8274_v53, %v5773_v42  ;;  %v5999_v1 = vld [vmem:[%s13711_s2 + $0x3b8] sm:$0xf0] }
  0x5d   :  { %940 = vmatpush.bf16.msra.mxu0 %v9767_v0  ;;  %966 = vmatpush.bf16.msra.mxu2 %v9779_v39  ;;  %v6031_v0 = vld [vmem:[%s13711_s2 + $0x3f8] sm:$0xf0]  ;;  %13849 = vst [vmem:[#allocation56_spill] sm:$0xff] %v9842_v31  ;;  %v5741_v24 = vld [vmem:[%s13711_s2 + $0x198] sm:$0xf] }
  0x5e   :  { %13847 = vst [vmem:[#allocation54_spill] sm:$0xff] %v9838_v63  ;;  %v5997_v13 = vld [vmem:[%s13711_s2 + $0x398] sm:$0xf]  ;;  %v9854_v40 = vor.u32 %v8334_v41, %v6031_v0  ;;  %v8326_v0 = vld [vmem:[%s13711_s2 + $0x39c] sm:$0xf]  ;;  %v9875_v42 = vor.u32 %v8266_v49, %v5741_v24 }
  0x5f   :  { %953 = vmatpush.bf16.msra.mxu1 %v9777_v32  ;;  %979 = vmatpush.bf16.msra.mxu3 %v9791_v37  ;;  %v9840_v32 = vor.u32 %v8338_v48, %v6029_v10  ;;  %v8330_v47 = vld [vmem:[%s13711_s2 + $0x3b4] sm:$0xf0]  ;;  %v5743_v48 = vld [vmem:[%s13711_s2 + $0x1b8] sm:$0xf0]  ;;  %v9893_v49 = vor.u32 %v8326_v0, %v5999_v1 }
  0x60   :  { %13850 = vst [vmem:[#allocation57_spill] sm:$0xff] %v9854_v40  ;;  %v9879_v53 = vor.u32 %v8330_v47, %v5997_v13  ;;  %v9881_v10 = vor.u32 %v8262_v4, %v5743_v48  ;;  %v5709_v41 = vld [vmem:[%s13711_s2 + $0x158] sm:$0xf]  ;;  %v8254_v47 = vld [vmem:[%s13711_s2 + $0x15c] sm:$0xf] }
  0x61   :  { %13848 = vst [vmem:[#allocation55_spill] sm:$0xff] %v9840_v32  ;;  %941 = vmatpush.bf16.msra.mxu0 %v9812_v36  ;;  %967 = vmatpush.bf16.msra.mxu2 %v9827_v26  ;;  %v5965_v24 = vld [vmem:[%s13711_s2 + $0x358] sm:$0xf]  ;;  %v5711_v4 = vld [vmem:[%s13711_s2 + $0x178] sm:$0xf0] }
  0x62   :  { %13851 = vst [vmem:[#allocation58_spill] sm:$0xff] %v9875_v42  ;;  %v8322_v13 = vld [vmem:[%s13711_s2 + $0x374] sm:$0xf0]  ;;  %v8318_v48 = vld [vmem:[%s13711_s2 + $0x35c] sm:$0xf] }
  0x63   :  { %954 = vmatpush.bf16.msra.mxu1 %v9825_v11  ;;  %980 = vmatpush.bf16.msra.mxu3 %v9836_v54  ;;  %13852 = vst [vmem:[#allocation59_spill] sm:$0xff] %v9879_v53  ;;  %v8258_v54 = vld [vmem:[%s13711_s2 + $0x174] sm:$0xf0]  ;;  %v5967_v0 = vld [vmem:[%s13711_s2 + $0x378] sm:$0xf0] }
  0x64   :  { %13853 = vst [vmem:[#allocation60_spill] sm:$0xff] %v9881_v10  ;;  %968 = vmatmul.bf16.vlgmr.msra.gmra.mxu2 %v9358_v15  ;;  %942 = vmatmul.bf16.vlgmr.msra.gmra.mxu0 %v9358_v15  ;;  %v9914_v1 = vor.u32 %v8258_v54, %v5709_v41  ;;  %v5933_v54 = vld [vmem:[%s13711_s2 + $0x318] sm:$0xf]  ;;  %v9933_v41 = vor.u32 %v8318_v48, %v5967_v0  ;;  %v5935_v48 = vld [vmem:[%s13711_s2 + $0x338] sm:$0xf0] }
  0x65   :  { %986 = vmatpush.bf16.msrb.mxu0 %v9838_v63  ;;  %1012 = vmatpush.bf16.msrb.mxu2 %v9842_v31  ;;  %13854 = vst [vmem:[#allocation61_spill] sm:$0xff] %v9893_v49  ;;  %v9921_v31 = vor.u32 %v8254_v47, %v5711_v4  ;;  %v5679_v47 = vld [vmem:[%s13711_s2 + $0x138] sm:$0xf0]  ;;  %v8242_v63 = vld [vmem:[%s13711_s2 + $0xf4] sm:$0xf0] }
  0x66   :  { %981 = vmatmul.bf16.vlgmr.msra.gmra.mxu3 %v9360_v22  ;;  %13855 = vst [vmem:[#allocation62_spill] sm:$0xff] %v9914_v1  ;;  %955 = vmatmul.bf16.vlgmr.msra.gmra.mxu1 %v9360_v22  ;;  %v8310_v4 = vld [vmem:[%s13711_s2 + $0x31c] sm:$0xf] }
  0x67   :  { %999 = vmatpush.bf16.msrb.mxu1 %v9840_v32  ;;  %1025 = vmatpush.bf16.msrb.mxu3 %v9854_v40  ;;  %v9919_v40 = vor.u32 %v8322_v13, %v5965_v24  ;;  %13857 = vst [vmem:[#allocation64_spill] sm:$0xff] %v9921_v31  ;;  %v5677_v32 = vld [vmem:[%s13711_s2 + $0x118] sm:$0xf]  ;;  %v8246_v13 = vld [vmem:[%s13711_s2 + $0x11c] sm:$0xf] }
  0x68   :  { %13858 = vst [vmem:[#allocation65_spill] sm:$0xff] %v9933_v41  ;;  %v8314_v24 = vld [vmem:[%s13711_s2 + $0x334] sm:$0xf0] }
  0x69   :  { %987 = vmatpush.bf16.msrb.mxu0 %v9875_v42  ;;  %1013 = vmatpush.bf16.msrb.mxu2 %v9881_v10  ;;  %13856 = vst [vmem:[#allocation63_spill] sm:$0xff] %v9919_v40  ;;  %v8250_v42 = vld [vmem:[%s13711_s2 + $0x134] sm:$0xf0]  ;;  %v9957_v10 = vor.u32 %v8246_v13, %v5679_v47  ;;  %v5647_v13 = vld [vmem:[%s13711_s2 + $0xf8] sm:$0xf0] }
  0x6a   :  { %v9951_v0 = vor.u32 %v8250_v42, %v5677_v32  ;;  %v5901_v32 = vld [vmem:[%s13711_s2 + $0x2d8] sm:$0xf]  ;;  %v9969_v42 = vor.u32 %v8310_v4, %v5935_v48  ;;  %v8302_v47 = vld [vmem:[%s13711_s2 + $0x2dc] sm:$0xf] }
  0x6b   :  { %1000 = vmatpush.bf16.msrb.mxu1 %v9879_v53  ;;  %1026 = vmatpush.bf16.msrb.mxu3 %v9893_v49  ;;  %v9955_v49 = vor.u32 %v8314_v24, %v5933_v54  ;;  %13861 = vst [vmem:[#allocation68_spill] sm:$0xff] %v9957_v10  ;;  %v5645_v53 = vld [vmem:[%s13711_s2 + $0xd8] sm:$0xf]  ;;  %v8238_v24 = vld [vmem:[%s13711_s2 + $0xdc] sm:$0xf] }
  0x6c   :  { %13859 = vst [vmem:[#allocation66_spill] sm:$0xff] %v9951_v0  ;;  %v8306_v54 = vld [vmem:[%s13711_s2 + $0x2f4] sm:$0xf0]  ;;  %v5903_v4 = vld [vmem:[%s13711_s2 + $0x2f8] sm:$0xf0]  ;;  %v9987_v48 = vor.u32 %v8242_v63, %v5645_v53 }
  0x6d   :  { %988 = vmatpush.bf16.msrb.mxu0 %v9914_v1  ;;  %1014 = vmatpush.bf16.msrb.mxu2 %v9921_v31  ;;  %13860 = vst [vmem:[#allocation67_spill] sm:$0xff] %v9955_v49  ;;  %v9993_v31 = vor.u32 %v8238_v24, %v5647_v13  ;;  %v8234_v1 = vld [vmem:[%s13711_s2 + $0xb4] sm:$0xf0]  ;;  %v10005_v53 = vor.u32 %v8302_v47, %v5903_v4  ;;  %v5615_v24 = vld [vmem:[%s13711_s2 + $0xb8] sm:$0xf0] }
  0x6e   :  { %13862 = vst [vmem:[#allocation69_spill] sm:$0xff] %v9969_v42  ;;  %v5869_v63 = vld [vmem:[%s13711_s2 + $0x298] sm:$0xf]  ;;  %v8294_v13 = vld [vmem:[%s13711_s2 + $0x29c] sm:$0xf] }
  0x6f   :  { %1001 = vmatpush.bf16.msrb.mxu1 %v9919_v40  ;;  %1027 = vmatpush.bf16.msrb.mxu3 %v9933_v41  ;;  %13863 = vst [vmem:[#allocation70_spill] sm:$0xff] %v9987_v48  ;;  %v9991_v41 = vor.u32 %v8306_v54, %v5901_v32  ;;  %v5613_v40 = vld [vmem:[%s13711_s2 + $0x98] sm:$0xf]  ;;  %v8230_v54 = vld [vmem:[%s13711_s2 + $0x9c] sm:$0xf] }
  0x70   :  { %13865 = vst [vmem:[#allocation72_spill] sm:$0xff] %v9993_v31  ;;  %v8298_v32 = vld [vmem:[%s13711_s2 + $0x2b4] sm:$0xf0]  ;;  %v5871_v47 = vld [vmem:[%s13711_s2 + $0x2b8] sm:$0xf0]  ;;  %v10023_v4 = vor.u32 %v8234_v1, %v5613_v40 }
  0x71   :  { %989 = vmatpush.bf16.msrb.mxu0 %v9951_v0  ;;  %1015 = vmatpush.bf16.msrb.mxu2 %v9957_v10  ;;  %13864 = vst [vmem:[#allocation71_spill] sm:$0xff] %v9991_v41  ;;  %v10029_v10 = vor.u32 %v8230_v54, %v5615_v24  ;;  %v8226_v0 = vld [vmem:[%s13711_s2 + $0x74] sm:$0xf0]  ;;  %v10041_v1 = vor.u32 %v8294_v13, %v5871_v47  ;;  %v5583_v54 = vld [vmem:[%s13711_s2 + $0x78] sm:$0xf0] }
  0x72   :  { %13866 = vst [vmem:[#allocation73_spill] sm:$0xff] %v10005_v53  ;;  %v5837_v40 = vld [vmem:[%s13711_s2 + $0x258] sm:$0xf]  ;;  %v8286_v24 = vld [vmem:[%s13711_s2 + $0x25c] sm:$0xf] }
  0x73   :  { %1002 = vmatpush.bf16.msrb.mxu1 %v9955_v49  ;;  %1028 = vmatpush.bf16.msrb.mxu3 %v9969_v42  ;;  %v10027_v42 = vor.u32 %v8298_v32, %v5869_v63  ;;  %13868 = vst [vmem:[#allocation75_spill] sm:$0xff] %v10029_v10  ;;  %v5581_v49 = vld [vmem:[%s13711_s2 + $0x58] sm:$0xf]  ;;  %v8222_v32 = vld [vmem:[%s13711_s2 + $0x5c] sm:$0xf] }
  0x74   :  { %13869 = vst [vmem:[#allocation76_spill] sm:$0xff] %v10041_v1  ;;  %v8290_v63 = vld [vmem:[%s13711_s2 + $0x274] sm:$0xf0]  ;;  %v5839_v13 = vld [vmem:[%s13711_s2 + $0x278] sm:$0xf0]  ;;  %v10059_v47 = vor.u32 %v8226_v0, %v5581_v49 }
  0x75   :  { %990 = vmatpush.bf16.msrb.mxu0 %v9987_v48  ;;  %1016 = vmatpush.bf16.msrb.mxu2 %v9993_v31  ;;  %13867 = vst [vmem:[#allocation74_spill] sm:$0xff] %v10027_v42  ;;  %v10065_v31 = vor.u32 %v8222_v32, %v5583_v54  ;;  %v8218_v48 = vld [vmem:[%s13711_s2 + $0x34] sm:$0xf0]  ;;  %v10077_v0 = vor.u32 %v8286_v24, %v5839_v13  ;;  %v5551_v32 = vld [vmem:[%s13711_s2 + $0x38] sm:$0xf0] }
  0x76   :  { %v5805_v49 = vld [vmem:[%s13711_s2 + $0x218] sm:$0xf]  ;;  %v8278_v54 = vld [vmem:[%s13711_s2 + $0x21c] sm:$0xf] }
  0x77   :  { %1003 = vmatpush.bf16.msrb.mxu1 %v9991_v41  ;;  %1029 = vmatpush.bf16.msrb.mxu3 %v10005_v53  ;;  %v10063_v53 = vor.u32 %v8290_v63, %v5837_v40  ;;  %v5549_v41 = vld [vmem:[%s13711_s2 + $0x18] sm:$0xf]  ;;  %v8214_v63 = vld [vmem:[%s13711_s2 + $0x1c] sm:$0xf] }
  0x78   :  { %v8282_v40 = vld [vmem:[%s13711_s2 + $0x234] sm:$0xf0]  ;;  %v5807_v24 = vld [vmem:[%s13711_s2 + $0x238] sm:$0xf0]  ;;  %v10095_v13 = vor.u32 %v8218_v48, %v5549_v41  ;;  %v13894_v48 = vld [vmem:[#allocation27_spill] sm:$0xff] }
  0x79   :  { %991 = vmatpush.bf16.msrb.mxu0 %v10023_v4  ;;  %1017 = vmatpush.bf16.msrb.mxu2 %v10029_v10  ;;  %v10101_v10 = vor.u32 %v8214_v63, %v5551_v32  ;;  %v13893_v41 = vld [vmem:[#allocation26_spill] sm:$0xff]  ;;  %v13896_v63 = vld [vmem:[#allocation29_spill] sm:$0xff] }
  0x7a   :  { %v13897_v32 = vld [vmem:[#allocation30_spill] sm:$0xff] }
  0x7b   :  { %1004 = vmatpush.bf16.msrb.mxu1 %v10027_v42  ;;  %1030 = vmatpush.bf16.msrb.mxu3 %v10041_v1  ;;  %v10099_v1 = vor.u32 %v8282_v40, %v5805_v49  ;;  %v10104_v42 = vor.u32 %v8278_v54, %v5807_v24  ;;  %v13895_v40 = vld [vmem:[#allocation28_spill] sm:$0xff]  ;;  %v13898_v54 = vld [vmem:[#allocation31_spill] sm:$0xff] }
  0x7c   :  { %v13899_v24 = vld [vmem:[#allocation32_spill] sm:$0xff] }
  0x7d   :  { %992 = vmatpush.bf16.msrb.mxu0 %v10059_v47  ;;  %1018 = vmatpush.bf16.msrb.mxu2 %v10065_v31 }
  0x7f   :  { %1005 = vmatpush.bf16.msrb.mxu1 %v10063_v53  ;;  %1031 = vmatpush.bf16.msrb.mxu3 %v10077_v0 }
  0x81   :  { %993 = vmatpush.bf16.msrb.mxu0 %v10095_v13  ;;  %1019 = vmatpush.bf16.msrb.mxu2 %v10101_v10 }
  0x83   :  { %1006 = vmatpush.bf16.msrb.mxu1 %v10099_v1  ;;  %1032 = vmatpush.bf16.msrb.mxu3 %v10104_v42 }
  0x84   :  { %1020 = vmatmul.bf16.vlgmr.msrb.gmra.mxu2 %v9358_v15  ;;  %994 = vmatmul.bf16.vlgmr.msrb.gmra.mxu0 %v9358_v15  ;;  %v13892_v15 = vld [vmem:[#allocation25_spill] sm:$0xff] }
  0x85   :  { %1046 = vmatpush.bf16.msra.mxu0 %v8948_v3  ;;  %1072 = vmatpush.bf16.msra.mxu2 %v8961_v8  ;;  %v1038_v3 = vld [vmem:[%s13713_s1] sm:$0xff] }
  0x86   :  { %1033 = vmatmul.bf16.vlgmr.msrb.gmra.mxu3 %v9360_v22  ;;  %1007 = vmatmul.bf16.vlgmr.msrb.gmra.mxu1 %v9360_v22  ;;  %v1041_v8 = vunpack.c.h.b16 %v1038_v3 }
  0x87   :  { %1059 = vmatpush.bf16.msra.mxu1 %v8959_v7  ;;  %1085 = vmatpush.bf16.msra.mxu3 %v8973_v12  ;;  %v1040_v7 = vunpack.c.l.b16 %v1038_v3  ;;  %v13900_v3 = vld [vmem:[#allocation33_spill] sm:$0xff] }
  0x89   :  { %1047 = vmatpush.bf16.msra.mxu0 %v8986_v16  ;;  %1073 = vmatpush.bf16.msra.mxu2 %v9000_v21  ;;  %v10146_v12 = vpack.c.b16 %v1040_v7, %v1040_v7  ;;  %v10150_v16 = vpack.c.b16 %v1041_v8, %v1041_v8  ;;  %v13871_v21 = vld [vmem:[#allocation4_spill] sm:$0xff]  ;;  %v13901_v8 = vld [vmem:[#allocation34_spill] sm:$0xff] }
  0x8b   :  { %1060 = vmatpush.bf16.msra.mxu1 %v8988_v17  ;;  %1086 = vmatpush.bf16.msra.mxu3 %v9011_v25  ;;  %v13870_v17 = vld [vmem:[#allocation3_spill] sm:$0xff]  ;;  %v13872_v25 = vld [vmem:[#allocation5_spill] sm:$0xff] }
  0x8d   :  { %1048 = vmatpush.bf16.msra.mxu0 %v9023_v29  ;;  %1074 = vmatpush.bf16.msra.mxu2 %v9038_v34  ;;  %v13873_v29 = vld [vmem:[#allocation6_spill] sm:$0xff]  ;;  %v13874_v34 = vld [vmem:[#allocation7_spill] sm:$0xff] }
  0x8f   :  { %1061 = vmatpush.bf16.msra.mxu1 %v9036_v33  ;;  %1087 = vmatpush.bf16.msra.mxu3 %v9050_v38  ;;  %v10172_v33 = vld [vmem:[%s13714_s3] sm:$0xff]  ;;  %v13875_v38 = vld [vmem:[#allocation8_spill] sm:$0xff] }
  0x90   :  { %v169_v7 = vperm.slane %v10172_v33, 2 }
  0x91   :  { %1049 = vmatpush.bf16.msra.mxu0 %v9068_v44  ;;  %1075 = vmatpush.bf16.msra.mxu2 %v9074_v46  ;;  %v13876_v44 = vld [vmem:[#allocation9_spill] sm:$0xff]  ;;  %v13877_v46 = vld [vmem:[#allocation10_spill] sm:$0xff] }
  0x93   :  { %1062 = vmatpush.bf16.msra.mxu1 %v9072_v45  ;;  %1088 = vmatpush.bf16.msra.mxu3 %v9086_v50  ;;  %v167_v45 = vperm.slane %v10172_v33, 0  ;;  %v13878_v50 = vld [vmem:[#allocation11_spill] sm:$0xff] }
  0x95   :  { %1050 = vmatpush.bf16.msra.mxu0 %v9104_v56  ;;  %1076 = vmatpush.bf16.msra.mxu2 %v9110_v58  ;;  %v13880_v58 = vld [vmem:[#allocation13_spill] sm:$0xff] }
  0x97   :  { %1063 = vmatpush.bf16.msra.mxu1 %v9108_v57  ;;  %1089 = vmatpush.bf16.msra.mxu3 %v9122_v62  ;;  %v13879_v57 = vld [vmem:[#allocation12_spill] sm:$0xff] }
  0x99   :  { %1051 = vmatpush.bf16.msra.mxu0 %v9140_v5  ;;  %1077 = vmatpush.bf16.msra.mxu2 %v9146_v9  ;;  %v168_v9 = vperm.slane %v10172_v33, 1 }
  0x9b   :  { %1064 = vmatpush.bf16.msra.mxu1 %v9144_v6  ;;  %1090 = vmatpush.bf16.msra.mxu3 %v9158_v14  ;;  %v13881_v6 = vld [vmem:[#allocation14_spill] sm:$0xff] }
  0x9d   :  { %1052 = vmatpush.bf16.msra.mxu0 %v9176_v23  ;;  %1078 = vmatpush.bf16.msra.mxu2 %v9188_v28  ;;  %v13882_v23 = vld [vmem:[#allocation15_spill] sm:$0xff]  ;;  %v13884_v28 = vld [vmem:[#allocation17_spill] sm:$0xff] }
  0x9f   :  { %1065 = vmatpush.bf16.msra.mxu1 %v9186_v27  ;;  %1091 = vmatpush.bf16.msra.mxu3 %v9200_v35  ;;  %v13883_v27 = vld [vmem:[#allocation16_spill] sm:$0xff] }
  0xa1   :  { %1053 = vmatpush.bf16.msra.mxu0 %v9221_v43  ;;  %1079 = vmatpush.bf16.msra.mxu2 %v9236_v52  ;;  %v13885_v43 = vld [vmem:[#allocation18_spill] sm:$0xff] }
  0xa3   :  { %1066 = vmatpush.bf16.msra.mxu1 %v9234_v51  ;;  %1092 = vmatpush.bf16.msra.mxu3 %v9245_v55  ;;  %v13886_v55 = vld [vmem:[#allocation19_spill] sm:$0xff] }
  0xa4   :  { %1054 = vmatmul.bf16.vlgmr.msra.gmra.mxu0 %v10146_v12  ;;  %1080 = vmatmul.bf16.vlgmr.msra.gmra.mxu2 %v10146_v12 }
  0xa5   :  { %1098 = vmatpush.bf16.msrb.mxu0 %v9247_v59  ;;  %1124 = vmatpush.bf16.msrb.mxu2 %v9251_v61  ;;  %v839_v56 = vpop.f32.mrf.mxu0  ;;  %v852_v5 = vpop.f32.mrf.mxu1  ;;  %v13887_v61 = vld [vmem:[#allocation20_spill] sm:$0xff] }
  0xa6   :  { %1067 = vmatmul.bf16.vlgmr.msra.gmra.mxu1 %v10150_v16  ;;  %1093 = vmatmul.bf16.vlgmr.msra.gmra.mxu3 %v10150_v16  ;;  %v840_v62 = vadd.f32 %v839_v56, %v167_v45  ;;  %v13906_v56 = vld [vmem:[#allocation39_spill] sm:$0xff] }
  0xa7   :  { %1111 = vmatpush.bf16.msrb.mxu1 %v9249_v60  ;;  %1137 = vmatpush.bf16.msrb.mxu3 %v9263_v2  ;;  %v13888_v2 = vld [vmem:[#allocation21_spill] sm:$0xff] }
  0xa8   :  { %v10186_v14 = vadd.f32 %v852_v5, %v840_v62  ;;  %v13909_v5 = vld [vmem:[#allocation42_spill] sm:$0xff] }
  0xa9   :  { %1099 = vmatpush.bf16.msrb.mxu0 %v9284_v18  ;;  %1125 = vmatpush.bf16.msrb.mxu2 %v9290_v20  ;;  %v865_v35 = vpop.f32.mrf.mxu2  ;;  %v878_v52 = vpop.f32.mrf.mxu3  ;;  %v13890_v20 = vld [vmem:[#allocation23_spill] sm:$0xff] }
  0xaa   :  { %v866_v51 = vadd.f32 %v865_v35, %v168_v9 }
  0xab   :  { %1112 = vmatpush.bf16.msrb.mxu1 %v9288_v19  ;;  %1138 = vmatpush.bf16.msrb.mxu3 %v9302_v30  ;;  %v13889_v19 = vld [vmem:[#allocation22_spill] sm:$0xff]  ;;  %v13891_v30 = vld [vmem:[#allocation24_spill] sm:$0xff] }
  0xac   :  { %v10195_v59 = vadd.f32 %v878_v52, %v866_v51  ;;  %v13912_v51 = vld [vmem:[#allocation45_spill] sm:$0xff] }
  0xad   :  { %1100 = vmatpush.bf16.msrb.mxu0 %v13870_v17  ;;  %1126 = vmatpush.bf16.msrb.mxu2 %v13872_v25  ;;  %v841_v60 = vpop.f32.mrf.mxu0  ;;  %v854_v18 = vpop.f32.mrf.mxu1  ;;  %v13902_v17 = vld [vmem:[#allocation35_spill] sm:$0xff]  ;;  %v13903_v25 = vld [vmem:[#allocation36_spill] sm:$0xff] }
  0xae   :  { %v13914_v60 = vld [vmem:[#allocation47_spill] sm:$0xff] }
  0xaf   :  { %1113 = vmatpush.bf16.msrb.mxu1 %v13871_v21  ;;  %1139 = vmatpush.bf16.msrb.mxu3 %v13873_v29  ;;  %v13904_v29 = vld [vmem:[#allocation37_spill] sm:$0xff] }
  0xb1   :  { %1101 = vmatpush.bf16.msrb.mxu0 %v13874_v34  ;;  %1127 = vmatpush.bf16.msrb.mxu2 %v13876_v44  ;;  %v867_v22 = vpop.f32.mrf.mxu2  ;;  %v880_v49 = vpop.f32.mrf.mxu3  ;;  %v13905_v44 = vld [vmem:[#allocation38_spill] sm:$0xff] }
  0xb2   :  { %v13920_v22 = vld [vmem:[#allocation53_spill] sm:$0xff]  ;;  %v13923_v49 = vld [vmem:[#allocation56_spill] sm:$0xff] }
  0xb3   :  { %1114 = vmatpush.bf16.msrb.mxu1 %v13875_v38  ;;  %1140 = vmatpush.bf16.msrb.mxu3 %v13877_v46  ;;  %v170_v46 = vperm.slane %v10172_v33, 3 }
  0xb5   :  { %1102 = vmatpush.bf16.msrb.mxu0 %v13878_v50  ;;  %1128 = vmatpush.bf16.msrb.mxu2 %v13880_v58  ;;  %v13908_v58 = vld [vmem:[#allocation41_spill] sm:$0xff] }
  0xb7   :  { %1115 = vmatpush.bf16.msrb.mxu1 %v13879_v57  ;;  %1141 = vmatpush.bf16.msrb.mxu3 %v13881_v6  ;;  %v13907_v57 = vld [vmem:[#allocation40_spill] sm:$0xff] }
  0xb9   :  { %1103 = vmatpush.bf16.msrb.mxu0 %v13882_v23  ;;  %1129 = vmatpush.bf16.msrb.mxu2 %v13884_v28 }
  0xbb   :  { %1116 = vmatpush.bf16.msrb.mxu1 %v13883_v27  ;;  %1142 = vmatpush.bf16.msrb.mxu3 %v13885_v43  ;;  %v13910_v27 = vld [vmem:[#allocation43_spill] sm:$0xff]  ;;  %v13911_v43 = vld [vmem:[#allocation44_spill] sm:$0xff] }
  0xbd   :  { %1104 = vmatpush.bf16.msrb.mxu0 %v13886_v55  ;;  %1130 = vmatpush.bf16.msrb.mxu2 %v13888_v2  ;;  %v13913_v55 = vld [vmem:[#allocation46_spill] sm:$0xff]  ;;  %v13916_v2 = vld [vmem:[#allocation49_spill] sm:$0xff] }
  0xbf   :  { %1117 = vmatpush.bf16.msrb.mxu1 %v13887_v61  ;;  %1143 = vmatpush.bf16.msrb.mxu3 %v13889_v19  ;;  %v13915_v61 = vld [vmem:[#allocation48_spill] sm:$0xff]  ;;  %v13917_v19 = vld [vmem:[#allocation50_spill] sm:$0xff] }
  0xc1   :  { %1105 = vmatpush.bf16.msrb.mxu0 %v13890_v20  ;;  %1131 = vmatpush.bf16.msrb.mxu2 %v13892_v15  ;;  %v891_v21 = vpop.f32.mrf.mxu0  ;;  %v13919_v15 = vld [vmem:[#allocation52_spill] sm:$0xff] }
  0xc2   :  { %v892_v34 = vadd.f32 %v891_v21, %v169_v7  ;;  %v172_v21 = vperm.slane %v10172_v33, 5 }
  0xc3   :  { %1118 = vmatpush.bf16.msrb.mxu1 %v13891_v30  ;;  %1144 = vmatpush.bf16.msrb.mxu3 %v13893_v41  ;;  %v904_v38 = vpop.f32.mrf.mxu1  ;;  %v13918_v30 = vld [vmem:[#allocation51_spill] sm:$0xff]  ;;  %v13921_v41 = vld [vmem:[#allocation54_spill] sm:$0xff] }
  0xc4   :  { %1106 = vmatmul.bf16.vlgmr.msrb.gmra.mxu0 %v10146_v12  ;;  %1132 = vmatmul.bf16.vlgmr.msrb.gmra.mxu2 %v10146_v12  ;;  %v10224_v50 = vadd.f32 %v904_v38, %v892_v34  ;;  %v13934_v34 = vld [vmem:[#allocation67_spill] sm:$0xff]  ;;  %v13935_v38 = vld [vmem:[#allocation68_spill] sm:$0xff] }
  0xc5   :  { %1150 = vmatpush.bf16.msra.mxu0 %v13894_v48  ;;  %1176 = vmatpush.bf16.msra.mxu2 %v13896_v63  ;;  %v13922_v48 = vld [vmem:[#allocation55_spill] sm:$0xff]  ;;  %v13929_v63 = vld [vmem:[#allocation62_spill] sm:$0xff] }
  0xc6   :  { %1119 = vmatmul.bf16.vlgmr.msrb.gmra.mxu1 %v10150_v16  ;;  %1145 = vmatmul.bf16.vlgmr.msrb.gmra.mxu3 %v10150_v16 }
  0xc7   :  { %1163 = vmatpush.bf16.msra.mxu1 %v13895_v40  ;;  %1189 = vmatpush.bf16.msra.mxu3 %v13897_v32  ;;  %v917_v62 = vpop.f32.mrf.mxu2  ;;  %v13924_v40 = vld [vmem:[#allocation57_spill] sm:$0xff] }
  0xc8   :  { %v918_v6 = vadd.f32 %v917_v62, %v170_v46  ;;  %v13937_v62 = vld [vmem:[#allocation70_spill] sm:$0xff] }
  0xc9   :  { %1151 = vmatpush.bf16.msra.mxu0 %v13898_v54  ;;  %1177 = vmatpush.bf16.msra.mxu2 %v13900_v3  ;;  %v930_v23 = vpop.f32.mrf.mxu3  ;;  %v893_v35 = vpop.f32.mrf.mxu0  ;;  %v13930_v54 = vld [vmem:[#allocation63_spill] sm:$0xff] }
  0xca   :  { %v10233_v28 = vadd.f32 %v930_v23, %v918_v6  ;;  %v13938_v23 = vld [vmem:[#allocation71_spill] sm:$0xff] }
  0xcb   :  { %1164 = vmatpush.bf16.msra.mxu1 %v13899_v24  ;;  %1190 = vmatpush.bf16.msra.mxu3 %v13901_v8  ;;  %v906_v52 = vpop.f32.mrf.mxu1  ;;  %v13931_v24 = vld [vmem:[#allocation64_spill] sm:$0xff] }
  0xcc   :  { %v13942_v52 = vld [vmem:[#allocation75_spill] sm:$0xff] }
  0xcd   :  { %1152 = vmatpush.bf16.msra.mxu0 %v13902_v17  ;;  %1178 = vmatpush.bf16.msra.mxu2 %v13904_v29  ;;  %v13932_v17 = vld [vmem:[#allocation65_spill] sm:$0xff]  ;;  %v13933_v29 = vld [vmem:[#allocation66_spill] sm:$0xff] }
  0xcf   :  { %1165 = vmatpush.bf16.msra.mxu1 %v13903_v25  ;;  %1191 = vmatpush.bf16.msra.mxu3 %v13905_v44  ;;  %v919_v18 = vpop.f32.mrf.mxu2 }
  0xd0   :  { %v8625_v18 = vld [vmem:[%s13715_s5 + $0xec] sm:$0xf0] }
  0xd1   :  { %1153 = vmatpush.bf16.msra.mxu0 %v13906_v56  ;;  %1179 = vmatpush.bf16.msra.mxu2 %v13908_v58  ;;  %v932_v20 = vpop.f32.mrf.mxu3  ;;  %v13936_v56 = vld [vmem:[#allocation69_spill] sm:$0xff] }
  0xd3   :  { %1166 = vmatpush.bf16.msra.mxu1 %v13907_v57  ;;  %1192 = vmatpush.bf16.msra.mxu3 %v13909_v5 }
  0xd5   :  { %1154 = vmatpush.bf16.msra.mxu0 %v13910_v27  ;;  %1180 = vmatpush.bf16.msra.mxu2 %v13912_v51  ;;  %v13939_v27 = vld [vmem:[#allocation72_spill] sm:$0xff]  ;;  %v13941_v51 = vld [vmem:[#allocation74_spill] sm:$0xff] }
  0xd7   :  { %1167 = vmatpush.bf16.msra.mxu1 %v13911_v43  ;;  %1193 = vmatpush.bf16.msra.mxu3 %v13913_v55  ;;  %v13940_v43 = vld [vmem:[#allocation73_spill] sm:$0xff] }
  0xd9   :  { %1155 = vmatpush.bf16.msra.mxu0 %v13914_v60  ;;  %1181 = vmatpush.bf16.msra.mxu2 %v13916_v2  ;;  %v13943_v60 = vld [vmem:[#allocation76_spill] sm:$0xff]  ;;  %v6149_v2 = vld [vmem:[%s13715_s5 + $0xe0] sm:$0xf] }
  0xda   :  { %v6150_v20 = vor.u32 %v8625_v18, %v6149_v2  ;;  %v6069_v18 = vld [vmem:[%s13715_s5 + $0x40] sm:$0xf] }
  0xdb   :  { %1168 = vmatpush.bf16.msra.mxu1 %v13915_v61  ;;  %1194 = vmatpush.bf16.msra.mxu3 %v13917_v19  ;;  %v8657_v19 = vld [vmem:[%s13715_s5 + $0x1ec] sm:$0xf0] }
  0xdd   :  { %1156 = vmatpush.bf16.msra.mxu0 %v13918_v30  ;;  %1182 = vmatpush.bf16.msra.mxu2 %v9779_v39  ;;  %v13927_v39 = vld [vmem:[#allocation60_spill] sm:$0xff]  ;;  %v6405_v30 = vld [vmem:[%s13715_s5 + $0x2e0] sm:$0xf] }
  0xdf   :  { %1169 = vmatpush.bf16.msra.mxu1 %v13919_v15  ;;  %1195 = vmatpush.bf16.msra.mxu3 %v9791_v37  ;;  %v13926_v37 = vld [vmem:[#allocation59_spill] sm:$0xff] }
  0xe0   :  { %v6133_v15 = vld [vmem:[%s13715_s5 + $0xc0] sm:$0xf] }
  0xe1   :  { %1157 = vmatpush.bf16.msra.mxu0 %v9812_v36  ;;  %1183 = vmatpush.bf16.msra.mxu2 %v9827_v26  ;;  %v171_v36 = vperm.slane %v10172_v33, 4  ;;  %v13928_v26 = vld [vmem:[#allocation61_spill] sm:$0xff]  ;;  %v943_v32 = vpop.f32.mrf.mxu0 }
  0xe3   :  { %1170 = vmatpush.bf16.msra.mxu1 %v9825_v11  ;;  %1196 = vmatpush.bf16.msra.mxu3 %v13920_v22  ;;  %v13925_v11 = vld [vmem:[#allocation58_spill] sm:$0xff]  ;;  %v944_v3 = vadd.f32 %v943_v32, %v171_v36  ;;  %v956_v8 = vpop.f32.mrf.mxu1  ;;  %v8653_v22 = vld [vmem:[%s13715_s5 + $0x1cc] sm:$0xf0] }
  0xe4   :  { %1158 = vmatmul.bf16.vlgmr.msra.gmra.mxu0 %v10146_v12  ;;  %1184 = vmatmul.bf16.vlgmr.msra.gmra.mxu2 %v10146_v12 }
  0xe5   :  { %1202 = vmatpush.bf16.msrb.mxu0 %v13921_v41  ;;  %1228 = vmatpush.bf16.msrb.mxu2 %v13923_v49  ;;  %v10270_v25 = vadd.f32 %v956_v8, %v944_v3  ;;  %v6533_v41 = vld [vmem:[%s13715_s5 + $0x3e0] sm:$0xf]  ;;  %v173_v3 = vperm.slane %v10172_v33, 6  ;;  %v8645_v8 = vld [vmem:[%s13715_s5 + $0x18c] sm:$0xf0] }
  0xe6   :  { %1171 = vmatmul.bf16.vlgmr.msra.gmra.mxu1 %v10150_v16  ;;  %1197 = vmatmul.bf16.vlgmr.msra.gmra.mxu3 %v10150_v16 }
  0xe7   :  { %1215 = vmatpush.bf16.msrb.mxu1 %v13922_v48  ;;  %1241 = vmatpush.bf16.msrb.mxu3 %v13924_v40  ;;  %v969_v44 = vpop.f32.mrf.mxu2  ;;  %v8721_v48 = vld [vmem:[%s13715_s5 + $0x3ec] sm:$0xf0]  ;;  %v6389_v40 = vld [vmem:[%s13715_s5 + $0x2c0] sm:$0xf] }
  0xe8   :  { %v970_v57 = vadd.f32 %v969_v44, %v172_v21 }
  0xe9   :  { %1203 = vmatpush.bf16.msrb.mxu0 %v13925_v11  ;;  %1229 = vmatpush.bf16.msrb.mxu2 %v13927_v39  ;;  %v982_v58 = vpop.f32.mrf.mxu3  ;;  %v945_v6 = vpop.f32.mrf.mxu0  ;;  %v8685_v11 = vld [vmem:[%s13715_s5 + $0x2cc] sm:$0xf0]  ;;  %v6245_v39 = vld [vmem:[%s13715_s5 + $0x1a0] sm:$0xf] }
  0xea   :  { %v10279_v5 = vadd.f32 %v982_v58, %v970_v57  ;;  %v8609_v58 = vld [vmem:[%s13715_s5 + $0x6c] sm:$0xf0]  ;;  %v174_v6 = vperm.slane %v10172_v33, 7 }
  0xeb   :  { %1216 = vmatpush.bf16.msrb.mxu1 %v13926_v37  ;;  %1242 = vmatpush.bf16.msrb.mxu3 %v13928_v26  ;;  %v958_v35 = vpop.f32.mrf.mxu1  ;;  %v6534_v37 = vor.u32 %v8721_v48, %v6533_v41  ;;  %v8649_v26 = vld [vmem:[%s13715_s5 + $0x1ac] sm:$0xf0] }
  0xec   :  { %v8641_v35 = vld [vmem:[%s13715_s5 + $0x16c] sm:$0xf0] }
  0xed   :  { %1204 = vmatpush.bf16.msrb.mxu0 %v13929_v63  ;;  %1230 = vmatpush.bf16.msrb.mxu2 %v13931_v24  ;;  %v6390_v63 = vor.u32 %v8685_v11, %v6389_v40  ;;  %v6246_v24 = vor.u32 %v8649_v26, %v6245_v39  ;;  %v6053_v40 = vld [vmem:[%s13715_s5 + $0x20] sm:$0xf]  ;;  %v8601_v11 = vld [vmem:[%s13715_s5 + $0x2c] sm:$0xf0] }
  0xee   :  { %v8673_v39 = vld [vmem:[%s13715_s5 + $0x26c] sm:$0xf0] }
  0xef   :  { %1217 = vmatpush.bf16.msrb.mxu1 %v13930_v54  ;;  %1243 = vmatpush.bf16.msrb.mxu3 %v13932_v17  ;;  %v971_v55 = vpop.f32.mrf.mxu2  ;;  %v6101_v54 = vld [vmem:[%s13715_s5 + $0x80] sm:$0xf]  ;;  %v8633_v26 = vld [vmem:[%s13715_s5 + $0x12c] sm:$0xf0] }
  0xf0   :  { %v6373_v17 = vld [vmem:[%s13715_s5 + $0x2a0] sm:$0xf] }
  0xf1   :  { %1205 = vmatpush.bf16.msrb.mxu0 %v13933_v29  ;;  %1231 = vmatpush.bf16.msrb.mxu2 %v13935_v38  ;;  %v984_v61 = vpop.f32.mrf.mxu3  ;;  %v8681_v29 = vld [vmem:[%s13715_s5 + $0x2ac] sm:$0xf0] }
  0xf2   :  { %v8677_v61 = vld [vmem:[%s13715_s5 + $0x28c] sm:$0xf0] }
  0xf3   :  { %1218 = vmatpush.bf16.msrb.mxu1 %v13934_v34  ;;  %1244 = vmatpush.bf16.msrb.mxu3 %v13936_v56  ;;  %v6374_v34 = vor.u32 %v8681_v29, %v6373_v17  ;;  %v6085_v56 = vld [vmem:[%s13715_s5 + $0x60] sm:$0xf]  ;;  %v8597_v17 = vld [vmem:[%s13715_s5 + $0xc] sm:$0xf0] }
  0xf4   :  { %v6086_v2 = vor.u32 %v8609_v58, %v6085_v56  ;;  %v8669_v29 = vld [vmem:[%s13715_s5 + $0x24c] sm:$0xf0] }
  0xf5   :  { %1206 = vmatpush.bf16.msrb.mxu0 %v13937_v62  ;;  %1232 = vmatpush.bf16.msrb.mxu2 %v13939_v27  ;;  %v6213_v27 = vld [vmem:[%s13715_s5 + $0x160] sm:$0xf]  ;;  %v8705_v58 = vld [vmem:[%s13715_s5 + $0x36c] sm:$0xf0] }
  0xf7   :  { %1219 = vmatpush.bf16.msrb.mxu1 %v13938_v23  ;;  %1245 = vmatpush.bf16.msrb.mxu3 %v13940_v43  ;;  %v6517_v43 = vld [vmem:[%s13715_s5 + $0x3c0] sm:$0xf] }
  0xf9   :  { %1207 = vmatpush.bf16.msrb.mxu0 %v10023_v4  ;;  %1233 = vmatpush.bf16.msrb.mxu2 %v13942_v52  ;;  %v6277_v4 = vld [vmem:[%s13715_s5 + $0x1e0] sm:$0xf] }
  0xfb   :  { %1220 = vmatpush.bf16.msrb.mxu1 %v13941_v51  ;;  %1246 = vmatpush.bf16.msrb.mxu3 %v13943_v60  ;;  %v8717_v51 = vld [vmem:[%s13715_s5 + $0x3cc] sm:$0xf0]  ;;  %v6357_v60 = vld [vmem:[%s13715_s5 + $0x280] sm:$0xf] }
  0xfc   :  { %v6518_v55 = vor.u32 %v8717_v51, %v6517_v43  ;;  %v6789_v51 = vld [vmem:[%s13715_s5 + $0x5e0] sm:$0xf] }
  0xfd   :  { %1208 = vmatpush.bf16.msrb.mxu0 %v10059_v47  ;;  %1234 = vmatpush.bf16.msrb.mxu2 %v10065_v31  ;;  %v8689_v47 = vld [vmem:[%s13715_s5 + $0x2ec] sm:$0xf0]  ;;  %v6278_v31 = vor.u32 %v8657_v19, %v6277_v4  ;;  %v6358_v4 = vor.u32 %v8677_v61, %v6357_v60 }
  0xfe   :  { %v6406_v49 = vor.u32 %v8689_v47, %v6405_v30  ;;  %v6214_v30 = vor.u32 %v8641_v35, %v6213_v27  ;;  %v6501_v47 = vld [vmem:[%s13715_s5 + $0x3a0] sm:$0xf]  ;;  %v8629_v35 = vld [vmem:[%s13715_s5 + $0x10c] sm:$0xf0] }
  0xff   :  { %1221 = vmatpush.bf16.msrb.mxu1 %v10063_v53  ;;  %1247 = vmatpush.bf16.msrb.mxu3 %v10077_v0  ;;  %v8621_v53 = vld [vmem:[%s13715_s5 + $0xcc] sm:$0xf0]  ;;  %v6261_v0 = vld [vmem:[%s13715_s5 + $0x1c0] sm:$0xf] }
 0x100   :  { %v6165_v27 = vld [vmem:[%s13715_s5 + $0x100] sm:$0xf] }
 0x101   :  { %1209 = vmatpush.bf16.msrb.mxu0 %v10095_v13  ;;  %1235 = vmatpush.bf16.msrb.mxu2 %v10101_v10  ;;  %v6134_v13 = vor.u32 %v8621_v53, %v6133_v15  ;;  %v6117_v10 = vld [vmem:[%s13715_s5 + $0xa0] sm:$0xf]  ;;  %v995_v44 = vpop.f32.mrf.mxu0  ;;  %v8713_v15 = vld [vmem:[%s13715_s5 + $0x3ac] sm:$0xf0] }
 0x102   :  { %v996_v57 = vadd.f32 %v995_v44, %v173_v3  ;;  %v6502_v41 = vor.u32 %v8713_v15, %v6501_v47  ;;  %v6629_v15 = vld [vmem:[%s13715_s5 + $0x4a0] sm:$0xf] }
 0x103   :  { %1222 = vmatpush.bf16.msrb.mxu1 %v10099_v1  ;;  %1248 = vmatpush.bf16.msrb.mxu3 %v10104_v42  ;;  %v8617_v42 = vld [vmem:[%s13715_s5 + $0xac] sm:$0xf0]  ;;  %v6262_v1 = vor.u32 %v8653_v22, %v6261_v0  ;;  %v1008_v62 = vpop.f32.mrf.mxu1  ;;  %v6197_v0 = vld [vmem:[%s13715_s5 + $0x140] sm:$0xf] }
 0x104   :  { %1210 = vmatmul.bf16.vlgmr.msrb.gmra.mxu0 %v10146_v12  ;;  %1236 = vmatmul.bf16.vlgmr.msrb.gmra.mxu2 %v10146_v12  ;;  %v6118_v32 = vor.u32 %v8617_v42, %v6117_v10  ;;  %v8613_v12 = vld [vmem:[%s13715_s5 + $0x8c] sm:$0xf0]  ;;  %v10394_v52 = vadd.f32 %v1008_v62, %v996_v57  ;;  %v6181_v42 = vld [vmem:[%s13715_s5 + $0x120] sm:$0xf] }
 0x105   :  { %3062 = vmatpush.bf16.msra.mxu0 %v6150_v20  ;;  %3088 = vmatpush.bf16.msra.mxu2 %v6406_v49  ;;  %v6102_v38 = vor.u32 %v8613_v12, %v6101_v54  ;;  %v8605_v20 = vld [vmem:[%s13715_s5 + $0x4c] sm:$0xf0]  ;;  %v6182_v44 = vor.u32 %v8633_v26, %v6181_v42  ;;  %v6469_v57 = vld [vmem:[%s13715_s5 + $0x360] sm:$0xf] }
 0x106   :  { %1223 = vmatmul.bf16.vlgmr.msrb.gmra.mxu1 %v10150_v16  ;;  %1249 = vmatmul.bf16.vlgmr.msrb.gmra.mxu3 %v10150_v16  ;;  %v6229_v16 = vld [vmem:[%s13715_s5 + $0x180] sm:$0xf]  ;;  %v8637_v22 = vld [vmem:[%s13715_s5 + $0x14c] sm:$0xf0]  ;;  %v6070_v49 = vor.u32 %v8605_v20, %v6069_v18  ;;  %v6470_v43 = vor.u32 %v8705_v58, %v6469_v57 }
 0x107   :  { %3075 = vmatpush.bf16.msra.mxu1 %v6278_v31  ;;  %3101 = vmatpush.bf16.msra.mxu3 %v6534_v37  ;;  %v6230_v23 = vor.u32 %v8645_v8, %v6229_v16  ;;  %v1021_v19 = vpop.f32.mrf.mxu2  ;;  %v6198_v10 = vor.u32 %v8637_v22, %v6197_v0  ;;  %v8709_v54 = vld [vmem:[%s13715_s5 + $0x38c] sm:$0xf0]  ;;  %v6054_v16 = vor.u32 %v8601_v11, %v6053_v40  ;;  %v6037_v8 = vld [vmem:[%s13715_s5] sm:$0xf] }
 0x108   :  { %v1022_v53 = vadd.f32 %v1021_v19, %v174_v6  ;;  %v6038_v60 = vor.u32 %v8597_v17, %v6037_v8  ;;  %v6645_v18 = vld [vmem:[%s13715_s5 + $0x4c0] sm:$0xf]  ;;  %v8777_v22 = vld [vmem:[%s13715_s5 + $0x5ac] sm:$0xf0] }
 0x109   :  { %3063 = vmatpush.bf16.msra.mxu0 %v6134_v13  ;;  %3089 = vmatpush.bf16.msra.mxu2 %v6390_v63  ;;  %v1034_v31 = vpop.f32.mrf.mxu3  ;;  %v997_v13 = vpop.f32.mrf.mxu0  ;;  %v6773_v20 = vld [vmem:[%s13715_s5 + $0x5c0] sm:$0xf]  ;;  %v8665_v42 = vld [vmem:[%s13715_s5 + $0x22c] sm:$0xf0] }
 0x10a   :  { %v10422_v48 = vadd.f32 %v1034_v31, %v1022_v53  ;;  %v8745_v53 = vld [vmem:[%s13715_s5 + $0x4ac] sm:$0xf0]  ;;  %v6757_v0 = vld [vmem:[%s13715_s5 + $0x5a0] sm:$0xf] }
 0x10b   :  { %3076 = vmatpush.bf16.msra.mxu1 %v6262_v1  ;;  %3102 = vmatpush.bf16.msra.mxu3 %v6518_v55  ;;  %v1010_v37 = vpop.f32.mrf.mxu1  ;;  %v6341_v1 = vld [vmem:[%s13715_s5 + $0x260] sm:$0xf]  ;;  %v8785_v55 = vld [vmem:[%s13715_s5 + $0x5ec] sm:$0xf0]  ;;  %v6758_v40 = vor.u32 %v8777_v22, %v6757_v0 }
 0x10c   :  { %v6342_v63 = vor.u32 %v8673_v39, %v6341_v1  ;;  %v6790_v19 = vor.u32 %v8785_v55, %v6789_v51  ;;  %v8741_v13 = vld [vmem:[%s13715_s5 + $0x48c] sm:$0xf0]  ;;  %v6741_v11 = vld [vmem:[%s13715_s5 + $0x580] sm:$0xf] }
 0x10d   :  { %3064 = vmatpush.bf16.msra.mxu0 %v6118_v32  ;;  %3090 = vmatpush.bf16.msra.mxu2 %v6374_v34  ;;  %v6485_v32 = vld [vmem:[%s13715_s5 + $0x380] sm:$0xf]  ;;  %v8773_v37 = vld [vmem:[%s13715_s5 + $0x58c] sm:$0xf0] }
 0x10e   :  { %v6486_v12 = vor.u32 %v8709_v54, %v6485_v32  ;;  %v8701_v32 = vld [vmem:[%s13715_s5 + $0x34c] sm:$0xf0]  ;;  %v6742_v8 = vor.u32 %v8773_v37, %v6741_v11  ;;  %v6725_v17 = vld [vmem:[%s13715_s5 + $0x560] sm:$0xf] }
 0x10f   :  { %3077 = vmatpush.bf16.msra.mxu1 %v6246_v24  ;;  %3103 = vmatpush.bf16.msra.mxu3 %v6502_v41  ;;  %v6325_v24 = vld [vmem:[%s13715_s5 + $0x240] sm:$0xf]  ;;  %v1023_v34 = vpop.f32.mrf.mxu2  ;;  %v6630_v41 = vor.u32 %v8745_v53, %v6629_v15  ;;  %v8761_v37 = vld [vmem:[%s13715_s5 + $0x52c] sm:$0xf0] }
 0x110   :  { %v6326_v56 = vor.u32 %v8669_v29, %v6325_v24  ;;  %v6597_v24 = vld [vmem:[%s13715_s5 + $0x460] sm:$0xf] }
 0x111   :  { %3065 = vmatpush.bf16.msra.mxu0 %v6102_v38  ;;  %3091 = vmatpush.bf16.msra.mxu2 %v6358_v4  ;;  %v6661_v38 = vld [vmem:[%s13715_s5 + $0x4e0] sm:$0xf]  ;;  %v1036_v62 = vpop.f32.mrf.mxu3  ;;  %v8749_v4 = vld [vmem:[%s13715_s5 + $0x4cc] sm:$0xf0] }
 0x112   :  { %v6646_v47 = vor.u32 %v8749_v4, %v6645_v18  ;;  %v6293_v34 = vld [vmem:[%s13715_s5 + $0x200] sm:$0xf] }
 0x113   :  { %3078 = vmatpush.bf16.msra.mxu1 %v6230_v23  ;;  %3104 = vmatpush.bf16.msra.mxu3 %v6486_v12  ;;  %v8753_v23 = vld [vmem:[%s13715_s5 + $0x4ec] sm:$0xf0]  ;;  %v6581_v58 = vld [vmem:[%s13715_s5 + $0x440] sm:$0xf] }
 0x114   :  { %v6662_v61 = vor.u32 %v8753_v23, %v6661_v38  ;;  %v8661_v38 = vld [vmem:[%s13715_s5 + $0x20c] sm:$0xf0]  ;;  %v6437_v62 = vld [vmem:[%s13715_s5 + $0x320] sm:$0xf] }
 0x115   :  { %3066 = vmatpush.bf16.msra.mxu0 %v6086_v2  ;;  %3092 = vmatpush.bf16.msra.mxu2 %v6342_v63  ;;  %v6166_v2 = vor.u32 %v8629_v35, %v6165_v27  ;;  %v6453_v63 = vld [vmem:[%s13715_s5 + $0x340] sm:$0xf]  ;;  %v8697_v23 = vld [vmem:[%s13715_s5 + $0x32c] sm:$0xf0] }
 0x116   :  { %v6454_v29 = vor.u32 %v8701_v32, %v6453_v63  ;;  %v8733_v35 = vld [vmem:[%s13715_s5 + $0x44c] sm:$0xf0]  ;;  %v6438_v51 = vor.u32 %v8697_v23, %v6437_v62  ;;  %v6917_v55 = vld [vmem:[%s13715_s5 + $0x6e0] sm:$0xf] }
 0x117   :  { %3079 = vmatpush.bf16.msra.mxu1 %v6214_v30  ;;  %3105 = vmatpush.bf16.msra.mxu3 %v6470_v43  ;;  %v8781_v30 = vld [vmem:[%s13715_s5 + $0x5cc] sm:$0xf0]  ;;  %v6565_v15 = vld [vmem:[%s13715_s5 + $0x420] sm:$0xf] }
 0x118   :  { %v6774_v31 = vor.u32 %v8781_v30, %v6773_v20  ;;  %v6421_v53 = vld [vmem:[%s13715_s5 + $0x300] sm:$0xf] }
 0x119   :  { %3067 = vmatpush.bf16.msra.mxu0 %v6070_v49  ;;  %3093 = vmatpush.bf16.msra.mxu2 %v6326_v56  ;;  %v6613_v49 = vld [vmem:[%s13715_s5 + $0x480] sm:$0xf]  ;;  %v6294_v56 = vor.u32 %v8661_v38, %v6293_v34  ;;  %v8757_v38 = vld [vmem:[%s13715_s5 + $0x50c] sm:$0xf0] }
 0x11a   :  { %v6614_v26 = vor.u32 %v8741_v13, %v6613_v49  ;;  %v6901_v49 = vld [vmem:[%s13715_s5 + $0x6c0] sm:$0xf]  ;;  %v8813_v13 = vld [vmem:[%s13715_s5 + $0x6cc] sm:$0xf0] }
 0x11b   :  { %3080 = vmatpush.bf16.msra.mxu1 %v6198_v10  ;;  %v6309_v10 = vld [vmem:[%s13715_s5 + $0x220] sm:$0xf]  ;;  %3106 = vmatpush.bf16.msra.mxu3 %v6454_v29 }
 0x11c   :  { %v6310_v1 = vor.u32 %v8665_v42, %v6309_v10  ;;  %v6693_v11 = vld [vmem:[%s13715_s5 + $0x520] sm:$0xf]  ;;  %v6902_v10 = vor.u32 %v8813_v13, %v6901_v49  ;;  %v8797_v13 = vld [vmem:[%s13715_s5 + $0x64c] sm:$0xf0] }
 0x11d   :  { %3068 = vmatpush.bf16.msra.mxu0 %v6054_v16  ;;  %v8737_v16 = vld [vmem:[%s13715_s5 + $0x46c] sm:$0xf0]  ;;  %v6549_v42 = vld [vmem:[%s13715_s5 + $0x400] sm:$0xf] }
 0x11e   :  { %3094 = vmatpush.bf16.msra.mxu2 %v6310_v1  ;;  %v6598_v57 = vor.u32 %v8737_v16, %v6597_v24  ;;  %v8725_v1 = vld [vmem:[%s13715_s5 + $0x40c] sm:$0xf0]  ;;  %v6885_v24 = vld [vmem:[%s13715_s5 + $0x6a0] sm:$0xf] }
 0x11f   :  { %3081 = vmatpush.bf16.msra.mxu1 %v6182_v44  ;;  %3107 = vmatpush.bf16.msra.mxu3 %v6438_v51  ;;  %v8809_v16 = vld [vmem:[%s13715_s5 + $0x6ac] sm:$0xf0]  ;;  %v6677_v29 = vld [vmem:[%s13715_s5 + $0x500] sm:$0xf]  ;;  %v6550_v51 = vor.u32 %v8725_v1, %v6549_v42  ;;  %v8647_v42 = vld [vmem:[%s13715_s5 + $0x1a4] sm:$0xf] }
 0x120   :  { %v7029_v34 = vld [vmem:[%s13715_s5 + $0x7c0] sm:$0xf]  ;;  %v6247_v1 = vld [vmem:[%s13715_s5 + $0x1b0] sm:$0xf0] }
 0x121   :  { %3069 = vmatpush.bf16.msra.mxu0 %v6038_v60  ;;  %v1055_v39 = vpop.f32.mrf.mxu0  ;;  %v8817_v60 = vld [vmem:[%s13715_s5 + $0x6ec] sm:$0xf0]  ;;  %v6869_v23 = vld [vmem:[%s13715_s5 + $0x680] sm:$0xf] }
 0x122   :  { %v1056_v54 = vadd.f32 %v1055_v39, %v167_v45  ;;  %v8769_v45 = vld [vmem:[%s13715_s5 + $0x56c] sm:$0xf0]  ;;  %3095 = vmatpush.bf16.msra.mxu2 %v6294_v56  ;;  %v6918_v18 = vor.u32 %v8817_v60, %v6917_v55  ;;  %v7045_v39 = vld [vmem:[%s13715_s5 + $0x7e0] sm:$0xf] }
 0x123   :  { %3082 = vmatpush.bf16.msra.mxu1 %v6166_v2  ;;  %v1068_v12 = vpop.f32.mrf.mxu1  ;;  %v6726_v43 = vor.u32 %v8769_v45, %v6725_v17  ;;  %v8765_v2 = vld [vmem:[%s13715_s5 + $0x54c] sm:$0xf0]  ;;  %v6694_v17 = vor.u32 %v8761_v37, %v6693_v11  ;;  %v6886_v45 = vor.u32 %v8809_v16, %v6885_v24  ;;  %v7013_v60 = vld [vmem:[%s13715_s5 + $0x7a0] sm:$0xf]  ;;  %v6119_v11 = vld [vmem:[%s13715_s5 + $0xb0] sm:$0xf0] }
 0x124   :  { %v1069_v44 = vadd.f32 %v1068_v12, %v1056_v54  ;;  %v8623_v54 = vld [vmem:[%s13715_s5 + $0xe4] sm:$0xf]  ;;  %v8845_v56 = vld [vmem:[%s13715_s5 + $0x7cc] sm:$0xf0]  ;;  %v6837_v49 = vld [vmem:[%s13715_s5 + $0x640] sm:$0xf] }
 0x125   :  { %3114 = vmatpush.bf16.msrb.mxu0 %v6662_v61  ;;  %v6709_v61 = vld [vmem:[%s13715_s5 + $0x540] sm:$0xf]  ;;  %v7030_v62 = vor.u32 %v8845_v56, %v7029_v34  ;;  %v8643_v24 = vld [vmem:[%s13715_s5 + $0x184] sm:$0xf]  ;;  %v6231_v16 = vld [vmem:[%s13715_s5 + $0x190] sm:$0xf0] }
 0x126   :  { %v10561_v27 = vpack.c.bf16 %v1069_v44, %v1069_v44  ;;  %3140 = vmatpush.bf16.msrb.mxu2 %v6918_v18  ;;  %v6710_v22 = vor.u32 %v8765_v2, %v6709_v61  ;;  %v8655_v44 = vld [vmem:[%s13715_s5 + $0x1e4] sm:$0xf]  ;;  %v8841_v61 = vld [vmem:[%s13715_s5 + $0x7ac] sm:$0xf0]  ;;  %v6821_v34 = vld [vmem:[%s13715_s5 + $0x620] sm:$0xf] }
 0x127   :  { %3127 = vmatpush.bf16.msrb.mxu1 %v6790_v19  ;;  %v1081_v4 = vpop.f32.mrf.mxu2  ;;  %v8619_v18 = vld [vmem:[%s13715_s5 + $0xc4] sm:$0xf] }
 0x128   :  { %3070 = vmatmul.bf16.vlgmr.msra.gmra.mxu0 %v10561_v27  ;;  %v1082_v19 = vadd.f32 %v1081_v4, %v168_v9  ;;  %v8729_v9 = vld [vmem:[%s13715_s5 + $0x42c] sm:$0xf0]  ;;  %v6678_v4 = vor.u32 %v8757_v38, %v6677_v29  ;;  %v8607_v56 = vld [vmem:[%s13715_s5 + $0x64] sm:$0xf] }
 0x129   :  { %3115 = vmatpush.bf16.msrb.mxu0 %v6646_v47  ;;  %v1057_v20 = vpop.f32.mrf.mxu0  ;;  %v1094_v30 = vpop.f32.mrf.mxu3  ;;  %v6582_v47 = vor.u32 %v8733_v35, %v6581_v58  ;;  %v6566_v32 = vor.u32 %v8729_v9, %v6565_v15  ;;  %v6279_v58 = vld [vmem:[%s13715_s5 + $0x1f0] sm:$0xf0]  ;;  %v8805_v35 = vld [vmem:[%s13715_s5 + $0x68c] sm:$0xf0]  ;;  %v7014_v15 = vor.u32 %v8841_v61, %v7013_v60 }
 0x12a   :  { %3141 = vmatpush.bf16.msrb.mxu2 %v6902_v10  ;;  %v6870_v55 = vor.u32 %v8805_v35, %v6869_v23  ;;  %v6135_v20 = vld [vmem:[%s13715_s5 + $0xd0] sm:$0xf0]  ;;  %v8837_v9 = vld [vmem:[%s13715_s5 + $0x78c] sm:$0xf0] }
 0x12b   :  { %3128 = vmatpush.bf16.msrb.mxu1 %v6774_v31  ;;  %v8693_v31 = vld [vmem:[%s13715_s5 + $0x30c] sm:$0xf0]  ;;  %v1070_v0 = vpop.f32.mrf.mxu1 }
 0x12c   :  { %v6997_v0 = vld [vmem:[%s13715_s5 + $0x780] sm:$0xf]  ;;  %v8793_v38 = vld [vmem:[%s13715_s5 + $0x62c] sm:$0xf0] }
 0x12d   :  { %3116 = vmatpush.bf16.msrb.mxu0 %v6630_v41  ;;  %v6422_v41 = vor.u32 %v8693_v31, %v6421_v53  ;;  %v8801_v53 = vld [vmem:[%s13715_s5 + $0x66c] sm:$0xf0]  ;;  %v6263_v31 = vld [vmem:[%s13715_s5 + $0x1d0] sm:$0xf0]  ;;  %v6998_v10 = vor.u32 %v8837_v9, %v6997_v0  ;;  %v6822_v23 = vor.u32 %v8793_v38, %v6821_v34  ;;  %v8635_v0 = vld [vmem:[%s13715_s5 + $0x144] sm:$0xf] }
 0x12e   :  { %3142 = vmatpush.bf16.msrb.mxu2 %v6886_v45  ;;  %v8829_v60 = vld [vmem:[%s13715_s5 + $0x74c] sm:$0xf0]  ;;  %v6199_v9 = vld [vmem:[%s13715_s5 + $0x150] sm:$0xf0]  ;;  %v8719_v34 = vld [vmem:[%s13715_s5 + $0x3e4] sm:$0xf] }
 0x12f   :  { %3129 = vmatpush.bf16.msrb.mxu1 %v6758_v40  ;;  %v1095_v40 = vadd.f32 %v1094_v30, %v1082_v19  ;;  %3108 = vmatpush.bf16.msra.mxu3 %v6422_v41  ;;  %v6853_v19 = vld [vmem:[%s13715_s5 + $0x660] sm:$0xf]  ;;  %v6282_v30 = vor.u32 %v8655_v44, %v6279_v58  ;;  %v6138_v41 = vor.u32 %v8619_v18, %v6135_v20  ;;  %v6071_v20 = vld [vmem:[%s13715_s5 + $0x50] sm:$0xf0] }
 0x130   :  { %v6234_v58 = vor.u32 %v8643_v24, %v6231_v16 }
 0x131   :  { %3117 = vmatpush.bf16.msrb.mxu0 %v6614_v26  ;;  %v8849_v26 = vld [vmem:[%s13715_s5 + $0x7ec] sm:$0xf0]  ;;  %v10617_v63 = vpack.c.bf16 %v1095_v40, %v1095_v40  ;;  %v8615_v40 = vld [vmem:[%s13715_s5 + $0xa4] sm:$0xf] }
 0x132   :  { %v7046_v12 = vor.u32 %v8849_v26, %v7045_v39  ;;  %3143 = vmatpush.bf16.msrb.mxu2 %v6870_v55  ;;  %v6838_v39 = vor.u32 %v8797_v13, %v6837_v49  ;;  %v6122_v26 = vor.u32 %v8615_v40, %v6119_v11  ;;  %v6965_v55 = vld [vmem:[%s13715_s5 + $0x740] sm:$0xf]  ;;  %v8825_v49 = vld [vmem:[%s13715_s5 + $0x72c] sm:$0xf0]  ;;  %v8599_v11 = vld [vmem:[%s13715_s5 + $0x24] sm:$0xf] }
 0x133   :  { %3130 = vmatpush.bf16.msrb.mxu1 %v6742_v8  ;;  %v6151_v8 = vld [vmem:[%s13715_s5 + $0xf0] sm:$0xf0]  ;;  %v6966_v61 = vor.u32 %v8829_v60, %v6965_v55 }
 0x134   :  { %3083 = vmatmul.bf16.vlgmr.msra.gmra.mxu1 %v10617_v63  ;;  %3153 = vmatpush.bf16.msrb.mxu3 %v7046_v12  ;;  %v6154_v2 = vor.u32 %v8623_v54, %v6151_v8  ;;  %v6103_v54 = vld [vmem:[%s13715_s5 + $0x90] sm:$0xf0]  ;;  %v6250_v12 = vor.u32 %v8647_v42, %v6247_v1  ;;  %v6981_v8 = vld [vmem:[%s13715_s5 + $0x760] sm:$0xf] }
 0x135   :  { %3118 = vmatpush.bf16.msrb.mxu0 %v6598_v57  ;;  %v1083_v57 = vpop.f32.mrf.mxu2  ;;  %v6167_v55 = vld [vmem:[%s13715_s5 + $0x110] sm:$0xf0] }
 0x136   :  { %v6087_v57 = vld [vmem:[%s13715_s5 + $0x70] sm:$0xf0] }
 0x137   :  { %3131 = vmatpush.bf16.msrb.mxu1 %v6726_v43  ;;  %v1096_v43 = vpop.f32.mrf.mxu3  ;;  %v6090_v18 = vor.u32 %v8607_v56, %v6087_v57  ;;  %v6535_v56 = vld [vmem:[%s13715_s5 + $0x3f0] sm:$0xf0] }
 0x138   :  { %3154 = vmatpush.bf16.msrb.mxu3 %v7030_v62  ;;  %v8639_v62 = vld [vmem:[%s13715_s5 + $0x164] sm:$0xf] }
 0x139   :  { %3119 = vmatpush.bf16.msrb.mxu0 %v6582_v47  ;;  %v8651_v47 = vld [vmem:[%s13715_s5 + $0x1c4] sm:$0xf] }
 0x13a   :  { %v6266_v37 = vor.u32 %v8651_v47, %v6263_v31 }
 0x13b   :  { %3132 = vmatpush.bf16.msrb.mxu1 %v6710_v22  ;;  %v6854_v22 = vor.u32 %v8801_v53, %v6853_v19  ;;  %v8789_v19 = vld [vmem:[%s13715_s5 + $0x60c] sm:$0xf0]  ;;  %v6407_v53 = vld [vmem:[%s13715_s5 + $0x2f0] sm:$0xf0] }
 0x13c   :  { %3155 = vmatpush.bf16.msrb.mxu3 %v7014_v15  ;;  %v8687_v15 = vld [vmem:[%s13715_s5 + $0x2e4] sm:$0xf] }
 0x13d   :  { %3120 = vmatpush.bf16.msrb.mxu0 %v6566_v32  ;;  %3144 = vmatpush.bf16.msrb.mxu2 %v6854_v22  ;;  %v8611_v32 = vld [vmem:[%s13715_s5 + $0x84] sm:$0xf]  ;;  %v6410_v22 = vor.u32 %v8687_v15, %v6407_v53 }
 0x13e   :  { %v6106_v45 = vor.u32 %v8611_v32, %v6103_v54  ;;  %v8631_v32 = vld [vmem:[%s13715_s5 + $0x124] sm:$0xf] }
 0x13f   :  { %3133 = vmatpush.bf16.msrb.mxu1 %v6694_v17  ;;  %v8833_v17 = vld [vmem:[%s13715_s5 + $0x76c] sm:$0xf0]  ;;  %v8683_v54 = vld [vmem:[%s13715_s5 + $0x2c4] sm:$0xf] }
 0x140   :  { %3156 = vmatpush.bf16.msrb.mxu3 %v6998_v10  ;;  %v6982_v29 = vor.u32 %v8833_v17, %v6981_v8  ;;  %v6933_v8 = vld [vmem:[%s13715_s5 + $0x700] sm:$0xf]  ;;  %v8821_v17 = vld [vmem:[%s13715_s5 + $0x70c] sm:$0xf0]  ;;  %v8711_v53 = vld [vmem:[%s13715_s5 + $0x3a4] sm:$0xf] }
 0x141   :  { %3121 = vmatpush.bf16.msrb.mxu0 %v6550_v51  ;;  %3145 = vmatpush.bf16.msrb.mxu2 %v6838_v39  ;;  %v1107_v44 = vpop.f32.mrf.mxu0  ;;  %v6215_v51 = vld [vmem:[%s13715_s5 + $0x170] sm:$0xf0] }
 0x142   :  { %v1108_v35 = vadd.f32 %v1107_v44, %v169_v7  ;;  %v8603_v7 = vld [vmem:[%s13715_s5 + $0x44] sm:$0xf] }
 0x143   :  { %3134 = vmatpush.bf16.msrb.mxu1 %v6678_v4  ;;  %v1120_v43 = vpop.f32.mrf.mxu1  ;;  %v6805_v4 = vld [vmem:[%s13715_s5 + $0x600] sm:$0xf]  ;;  %v6074_v40 = vor.u32 %v8603_v7, %v6071_v20  ;;  %v8595_v44 = vld [vmem:[%s13715_s5 + $0x4] sm:$0xf] }
 0x144   :  { %3157 = vmatpush.bf16.msrb.mxu3 %v6982_v29  ;;  %v6806_v47 = vor.u32 %v8789_v19, %v6805_v4 }
 0x145   :  { %3166 = vmatpush.bf16.msra.mxu0 %v6154_v2  ;;  %3146 = vmatpush.bf16.msrb.mxu2 %v6822_v23  ;;  %v1121_v2 = vadd.f32 %v1120_v43, %v1108_v35  ;;  %v6538_v23 = vor.u32 %v8719_v34, %v6535_v56  ;;  %v8679_v35 = vld [vmem:[%s13715_s5 + $0x2a4] sm:$0xf]  ;;  %v6375_v43 = vld [vmem:[%s13715_s5 + $0x2b0] sm:$0xf0] }
 0x146   :  { %v6378_v60 = vor.u32 %v8679_v35, %v6375_v43  ;;  %v8747_v35 = vld [vmem:[%s13715_s5 + $0x4c4] sm:$0xf]  ;;  %v6647_v43 = vld [vmem:[%s13715_s5 + $0x4d0] sm:$0xf0] }
 0x147   :  { %3179 = vmatpush.bf16.msra.mxu1 %v6282_v30  ;;  %v6218_v30 = vor.u32 %v8639_v62, %v6215_v51  ;;  %v10766_v31 = vpack.c.bf16 %v1121_v2, %v1121_v2  ;;  %v1133_v13 = vpop.f32.mrf.mxu2  ;;  %v8627_v51 = vld [vmem:[%s13715_s5 + $0x104] sm:$0xf]  ;;  %v6519_v2 = vld [vmem:[%s13715_s5 + $0x3d0] sm:$0xf0] }
 0x148   :  { %3158 = vmatpush.bf16.msrb.mxu3 %v6966_v61  ;;  %v1134_v42 = vadd.f32 %v1133_v13, %v170_v46  ;;  %v6183_v46 = vld [vmem:[%s13715_s5 + $0x130] sm:$0xf0]  ;;  %v8715_v61 = vld [vmem:[%s13715_s5 + $0x3c4] sm:$0xf]  ;;  %v6170_v20 = vor.u32 %v8627_v51, %v6167_v55 }
 0x149   :  { %3167 = vmatpush.bf16.msra.mxu0 %v6138_v41  ;;  %v6949_v41 = vld [vmem:[%s13715_s5 + $0x720] sm:$0xf]  ;;  %3147 = vmatpush.bf16.msrb.mxu2 %v6806_v47  ;;  %v1146_v1 = vpop.f32.mrf.mxu3  ;;  %v1109_v39 = vpop.f32.mrf.mxu0  ;;  %v6186_v62 = vor.u32 %v8631_v32, %v6183_v46  ;;  %v6522_v4 = vor.u32 %v8715_v61, %v6519_v2  ;;  %v6359_v47 = vld [vmem:[%s13715_s5 + $0x290] sm:$0xf0]  ;;  %v8707_v13 = vld [vmem:[%s13715_s5 + $0x384] sm:$0xf] }
 0x14a   :  { %3096 = vmatmul.bf16.vlgmr.msra.gmra.mxu2 %v10766_v31  ;;  %v6950_v10 = vor.u32 %v8825_v49, %v6949_v41  ;;  %v1147_v29 = vadd.f32 %v1146_v1, %v1134_v42  ;;  %v6343_v41 = vld [vmem:[%s13715_s5 + $0x270] sm:$0xf0]  ;;  %v8703_v1 = vld [vmem:[%s13715_s5 + $0x364] sm:$0xf] }
 0x14b   :  { %3180 = vmatpush.bf16.msra.mxu1 %v6266_v37  ;;  %v6055_v37 = vld [vmem:[%s13715_s5 + $0x30] sm:$0xf0]  ;;  %v1122_v24 = vpop.f32.mrf.mxu1  ;;  %v8663_v32 = vld [vmem:[%s13715_s5 + $0x224] sm:$0xf] }
 0x14c   :  { %3159 = vmatpush.bf16.msrb.mxu3 %v6950_v10  ;;  %v6058_v38 = vor.u32 %v8599_v11, %v6055_v37  ;;  %v10816_v57 = vpack.c.bf16 %v1147_v29, %v1147_v29  ;;  %v8667_v37 = vld [vmem:[%s13715_s5 + $0x244] sm:$0xf]  ;;  %v6327_v10 = vld [vmem:[%s13715_s5 + $0x250] sm:$0xf0] }
 0x14d   :  { %3168 = vmatpush.bf16.msra.mxu0 %v6122_v26  ;;  %v6202_v26 = vor.u32 %v8635_v0, %v6199_v9  ;;  %3192 = vmatpush.bf16.msra.mxu2 %v6410_v22  ;;  %v6503_v0 = vld [vmem:[%s13715_s5 + $0x3b0] sm:$0xf0]  ;;  %v8671_v22 = vld [vmem:[%s13715_s5 + $0x264] sm:$0xf]  ;;  %v6330_v42 = vor.u32 %v8667_v37, %v6327_v10 }
 0x14e   :  { %3109 = vmatmul.bf16.vlgmr.msra.gmra.mxu3 %v10816_v57  ;;  %v6506_v9 = vor.u32 %v8711_v53, %v6503_v0  ;;  %v6346_v49 = vor.u32 %v8671_v22, %v6343_v41  ;;  %v6471_v39 = vld [vmem:[%s13715_s5 + $0x370] sm:$0xf0]  ;;  %v8699_v46 = vld [vmem:[%s13715_s5 + $0x344] sm:$0xf] }
 0x14f   :  { %3181 = vmatpush.bf16.msra.mxu1 %v6250_v12  ;;  %v6391_v12 = vld [vmem:[%s13715_s5 + $0x2d0] sm:$0xf0]  ;;  %v8751_v29 = vld [vmem:[%s13715_s5 + $0x4e4] sm:$0xf] }
 0x150   :  { %v6394_v16 = vor.u32 %v8683_v54, %v6391_v12  ;;  %v6311_v54 = vld [vmem:[%s13715_s5 + $0x230] sm:$0xf0]  ;;  %v8783_v61 = vld [vmem:[%s13715_s5 + $0x5e4] sm:$0xf] }
 0x151   :  { %3169 = vmatpush.bf16.msra.mxu0 %v6106_v45  ;;  %v6934_v45 = vor.u32 %v8821_v17, %v6933_v8  ;;  %v1148_v19 = vpop.f32.mrf.mxu3  ;;  %v6314_v12 = vor.u32 %v8663_v32, %v6311_v54  ;;  %v6439_v51 = vld [vmem:[%s13715_s5 + $0x330] sm:$0xf0]  ;;  %v8735_v32 = vld [vmem:[%s13715_s5 + $0x464] sm:$0xf] }
 0x152   :  { %3193 = vmatpush.bf16.msra.mxu2 %v6394_v16  ;;  %v6455_v16 = vld [vmem:[%s13715_s5 + $0x350] sm:$0xf0] }
 0x153   :  { %3182 = vmatpush.bf16.msra.mxu1 %v6234_v58  ;;  %v6039_v58 = vld [vmem:[%s13715_s5 + $0x10] sm:$0xf0]  ;;  %3160 = vmatpush.bf16.msrb.mxu3 %v6934_v45  ;;  %v6458_v34 = vor.u32 %v8699_v46, %v6455_v16  ;;  %v8771_v46 = vld [vmem:[%s13715_s5 + $0x584] sm:$0xf] }
 0x154   :  { %v6042_v7 = vor.u32 %v8595_v44, %v6039_v58  ;;  %v6663_v45 = vld [vmem:[%s13715_s5 + $0x4f0] sm:$0xf0] }
 0x155   :  { %3170 = vmatpush.bf16.msra.mxu0 %v6090_v18  ;;  %v1135_v18 = vpop.f32.mrf.mxu2  ;;  %v6666_v58 = vor.u32 %v8751_v29, %v6663_v45  ;;  %v6599_v54 = vld [vmem:[%s13715_s5 + $0x470] sm:$0xf0] }
 0x156   :  { %3194 = vmatpush.bf16.msra.mxu2 %v6378_v60  ;;  %v6743_v16 = vld [vmem:[%s13715_s5 + $0x590] sm:$0xf0] }
 0x157   :  { %3183 = vmatpush.bf16.msra.mxu1 %v6218_v30  ;;  %3205 = vmatpush.bf16.msra.mxu3 %v6538_v23  ;;  %v8675_v30 = vld [vmem:[%s13715_s5 + $0x284] sm:$0xf]  ;;  %v6746_v29 = vor.u32 %v8771_v46, %v6743_v16  ;;  %v6125_v16 = vld [vmem:[%s13715_s5 + $0xa8] sm:$0xf] }
 0x158   :  { %v6362_v15 = vor.u32 %v8675_v30, %v6359_v47  ;;  %v6423_v30 = vld [vmem:[%s13715_s5 + $0x310] sm:$0xf0]  ;;  %v8807_v46 = vld [vmem:[%s13715_s5 + $0x6a4] sm:$0xf] }
 0x159   :  { %3171 = vmatpush.bf16.msra.mxu0 %v6074_v40  ;;  %v6487_v40 = vld [vmem:[%s13715_s5 + $0x390] sm:$0xf0] }
 0x15a   :  { %3195 = vmatpush.bf16.msra.mxu2 %v6362_v15  ;;  %v6490_v11 = vor.u32 %v8707_v13, %v6487_v40  ;;  %v6631_v47 = vld [vmem:[%s13715_s5 + $0x4b0] sm:$0xf0]  ;;  %v8739_v40 = vld [vmem:[%s13715_s5 + $0x484] sm:$0xf] }
 0x15b   :  { %3184 = vmatpush.bf16.msra.mxu1 %v6202_v26  ;;  %3206 = vmatpush.bf16.msra.mxu3 %v6522_v4  ;;  %v6474_v26 = vor.u32 %v8703_v1, %v6471_v39  ;;  %v6791_v4 = vld [vmem:[%s13715_s5 + $0x5f0] sm:$0xf0]  ;;  %v8775_v39 = vld [vmem:[%s13715_s5 + $0x5a4] sm:$0xf] }
 0x15c   :  { %v6775_v13 = vld [vmem:[%s13715_s5 + $0x5d0] sm:$0xf0] }
 0x15d   :  { %3172 = vmatpush.bf16.msra.mxu0 %v6058_v38  ;;  %v8659_v38 = vld [vmem:[%s13715_s5 + $0x204] sm:$0xf] }
 0x15e   :  { %3196 = vmatpush.bf16.msra.mxu2 %v6346_v49  ;;  %v8779_v49 = vld [vmem:[%s13715_s5 + $0x5c4] sm:$0xf] }
 0x15f   :  { %3185 = vmatpush.bf16.msra.mxu1 %v6186_v62  ;;  %3207 = vmatpush.bf16.msra.mxu3 %v6506_v9  ;;  %v8695_v62 = vld [vmem:[%s13715_s5 + $0x324] sm:$0xf]  ;;  %v6794_v9 = vor.u32 %v8783_v61, %v6791_v4  ;;  %v6778_v37 = vor.u32 %v8779_v49, %v6775_v13  ;;  %v8626_v4 = vld [vmem:[%s13715_s5 + $0xf4] sm:$0xf0] }
 0x160   :  { %v6442_v55 = vor.u32 %v8695_v62, %v6439_v51  ;;  %v8763_v62 = vld [vmem:[%s13715_s5 + $0x544] sm:$0xf]  ;;  %v8622_v49 = vld [vmem:[%s13715_s5 + $0xd4] sm:$0xf0] }
 0x161   :  { %3173 = vmatpush.bf16.msra.mxu0 %v6042_v7  ;;  %v1159_v24 = vpop.f32.mrf.mxu0  ;;  %v6650_v7 = vor.u32 %v8747_v35, %v6647_v43  ;;  %v6711_v35 = vld [vmem:[%s13715_s5 + $0x550] sm:$0xf0]  ;;  %v8723_v51 = vld [vmem:[%s13715_s5 + $0x404] sm:$0xf] }
 0x162   :  { %3197 = vmatpush.bf16.msra.mxu2 %v6330_v42  ;;  %v1160_v8 = vadd.f32 %v1159_v24, %v171_v36  ;;  %v6295_v36 = vld [vmem:[%s13715_s5 + $0x210] sm:$0xf0]  ;;  %v6602_v24 = vor.u32 %v8735_v32, %v6599_v54 }
 0x163   :  { %3186 = vmatpush.bf16.msra.mxu1 %v6170_v20  ;;  %3208 = vmatpush.bf16.msra.mxu3 %v6490_v11  ;;  %v1172_v17 = vpop.f32.mrf.mxu1  ;;  %v6298_v56 = vor.u32 %v8659_v38, %v6295_v36  ;;  %v8691_v20 = vld [vmem:[%s13715_s5 + $0x304] sm:$0xf]  ;;  %v6615_v11 = vld [vmem:[%s13715_s5 + $0x490] sm:$0xf0] }
 0x164   :  { %v1173_v44 = vadd.f32 %v1172_v17, %v1160_v8  ;;  %v6426_v53 = vor.u32 %v8691_v20, %v6423_v30  ;;  %v6618_v42 = vor.u32 %v8739_v40, %v6615_v11  ;;  %v8731_v8 = vld [vmem:[%s13715_s5 + $0x444] sm:$0xf]  ;;  %v6583_v17 = vld [vmem:[%s13715_s5 + $0x450] sm:$0xf0] }
 0x165   :  { %v6586_v45 = vor.u32 %v8731_v8, %v6583_v17  ;;  %v6727_v38 = vld [vmem:[%s13715_s5 + $0x570] sm:$0xf0]  ;;  %v8727_v36 = vld [vmem:[%s13715_s5 + $0x424] sm:$0xf]  ;;  %v8618_v8 = vld [vmem:[%s13715_s5 + $0xb4] sm:$0xf0] }
 0x166   :  { %3198 = vmatpush.bf16.msra.mxu2 %v6314_v12  ;;  %v10905_v23 = vpack.c.bf16 %v1173_v44, %v1173_v44  ;;  %v6567_v44 = vld [vmem:[%s13715_s5 + $0x430] sm:$0xf0]  ;;  %v8759_v30 = vld [vmem:[%s13715_s5 + $0x524] sm:$0xf] }
 0x167   :  { %3209 = vmatpush.bf16.msra.mxu3 %v6474_v26  ;;  %v1185_v60 = vpop.f32.mrf.mxu2  ;;  %v6759_v26 = vld [vmem:[%s13715_s5 + $0x5b0] sm:$0xf0]  ;;  %v8755_v40 = vld [vmem:[%s13715_s5 + $0x504] sm:$0xf] }
 0x168   :  { %3122 = vmatmul.bf16.vlgmr.msrb.gmra.mxu0 %v10905_v23  ;;  %v1186_v2 = vadd.f32 %v1185_v60, %v172_v21  ;;  %v8743_v21 = vld [vmem:[%s13715_s5 + $0x4a4] sm:$0xf]  ;;  %v6762_v12 = vor.u32 %v8775_v39, %v6759_v26 }
 0x169   :  { %3218 = vmatpush.bf16.msrb.mxu0 %v6666_v58  ;;  %v1198_v18 = vpop.f32.mrf.mxu3  ;;  %v1161_v19 = vpop.f32.mrf.mxu0  ;;  %v6634_v41 = vor.u32 %v8743_v21, %v6631_v47  ;;  %v6570_v58 = vor.u32 %v8727_v36, %v6567_v44  ;;  %v8815_v60 = vld [vmem:[%s13715_s5 + $0x6e4] sm:$0xf]  ;;  %v6695_v21 = vld [vmem:[%s13715_s5 + $0x530] sm:$0xf0] }
 0x16a   :  { %3199 = vmatpush.bf16.msra.mxu2 %v6298_v56  ;;  %v1199_v0 = vadd.f32 %v1198_v18, %v1186_v2  ;;  %v6919_v18 = vld [vmem:[%s13715_s5 + $0x6f0] sm:$0xf0]  ;;  %v6714_v19 = vor.u32 %v8763_v62, %v6711_v35  ;;  %v6698_v13 = vor.u32 %v8759_v30, %v6695_v21  ;;  %v6269_v62 = vld [vmem:[%s13715_s5 + $0x1c8] sm:$0xf]  ;;  %v8654_v35 = vld [vmem:[%s13715_s5 + $0x1d4] sm:$0xf0] }
 0x16b   :  { %3210 = vmatpush.bf16.msra.mxu3 %v6458_v34  ;;  %v1174_v15 = vpop.f32.mrf.mxu1  ;;  %v8767_v34 = vld [vmem:[%s13715_s5 + $0x564] sm:$0xf]  ;;  %v6922_v47 = vor.u32 %v8815_v60, %v6919_v18  ;;  %v7031_v36 = vld [vmem:[%s13715_s5 + $0x7d0] sm:$0xf0]  ;;  %v8614_v60 = vld [vmem:[%s13715_s5 + $0x94] sm:$0xf0]  ;;  %v6270_v18 = vor.u32 %v8654_v35, %v6269_v62 }
 0x16c   :  { %v10937_v22 = vpack.c.bf16 %v1199_v0, %v1199_v0  ;;  %v6730_v56 = vor.u32 %v8767_v34, %v6727_v38  ;;  %v8843_v38 = vld [vmem:[%s13715_s5 + $0x7c4] sm:$0xf]  ;;  %v6253_v30 = vld [vmem:[%s13715_s5 + $0x1a8] sm:$0xf]  ;;  %v8650_v21 = vld [vmem:[%s13715_s5 + $0x1b4] sm:$0xf0] }
 0x16d   :  { %3219 = vmatpush.bf16.msrb.mxu0 %v6650_v7  ;;  %v6157_v7 = vld [vmem:[%s13715_s5 + $0xe8] sm:$0xf]  ;;  %v6967_v62 = vld [vmem:[%s13715_s5 + $0x750] sm:$0xf0] }
 0x16e   :  { %3135 = vmatmul.bf16.vlgmr.msrb.gmra.mxu1 %v10937_v22  ;;  %v6158_v15 = vor.u32 %v8626_v4, %v6157_v7  ;;  %v8839_v7 = vld [vmem:[%s13715_s5 + $0x7a4] sm:$0xf]  ;;  %v6205_v35 = vld [vmem:[%s13715_s5 + $0x148] sm:$0xf] }
 0x16f   :  { %3211 = vmatpush.bf16.msra.mxu3 %v6442_v55  ;;  %3231 = vmatpush.bf16.msrb.mxu1 %v6794_v9  ;;  %v1187_v10 = vpop.f32.mrf.mxu2  ;;  %v6551_v55 = vld [vmem:[%s13715_s5 + $0x410] sm:$0xf0] }
 0x170   :  { %v6903_v9 = vld [vmem:[%s13715_s5 + $0x6d0] sm:$0xf0]  ;;  %v8847_v10 = vld [vmem:[%s13715_s5 + $0x7e4] sm:$0xf] }
 0x171   :  { %3220 = vmatpush.bf16.msrb.mxu0 %v6634_v41  ;;  %v1200_v1 = vpop.f32.mrf.mxu3  ;;  %v6141_v41 = vld [vmem:[%s13715_s5 + $0xc8] sm:$0xf] }
 0x172   :  { %v6142_v54 = vor.u32 %v8622_v49, %v6141_v41  ;;  %v6254_v49 = vor.u32 %v8650_v21, %v6253_v30  ;;  %v8823_v30 = vld [vmem:[%s13715_s5 + $0x724] sm:$0xf] }
 0x173   :  { %3212 = vmatpush.bf16.msra.mxu3 %v6426_v53  ;;  %3232 = vmatpush.bf16.msrb.mxu1 %v6778_v37  ;;  %v8811_v53 = vld [vmem:[%s13715_s5 + $0x6c4] sm:$0xf]  ;;  %v6679_v37 = vld [vmem:[%s13715_s5 + $0x510] sm:$0xf0] }
 0x174   :  { %v6906_v32 = vor.u32 %v8811_v53, %v6903_v9  ;;  %v8799_v53 = vld [vmem:[%s13715_s5 + $0x664] sm:$0xf]  ;;  %v6855_v9 = vld [vmem:[%s13715_s5 + $0x670] sm:$0xf0] }
 0x175   :  { %3221 = vmatpush.bf16.msrb.mxu0 %v6618_v42  ;;  %v7047_v42 = vld [vmem:[%s13715_s5 + $0x7f0] sm:$0xf0] }
 0x177   :  { %3233 = vmatpush.bf16.msrb.mxu1 %v6762_v12  ;;  %v6285_v12 = vld [vmem:[%s13715_s5 + $0x1e8] sm:$0xf] }
 0x178   :  { %3174 = vmatmul.bf16.vlgmr.msra.gmra.mxu0 %v10561_v27 }
 0x179   :  { %3222 = vmatpush.bf16.msrb.mxu0 %v6602_v24  ;;  %v8658_v24 = vld [vmem:[%s13715_s5 + $0x1f4] sm:$0xf0] }
 0x17a   :  { %v6286_v34 = vor.u32 %v8658_v24, %v6285_v12  ;;  %v8831_v24 = vld [vmem:[%s13715_s5 + $0x764] sm:$0xf] }
 0x17b   :  { %3234 = vmatpush.bf16.msrb.mxu1 %v6746_v29  ;;  %v6682_v29 = vor.u32 %v8755_v40, %v6679_v37  ;;  %v6237_v37 = vld [vmem:[%s13715_s5 + $0x188] sm:$0xf] }
 0x17d   :  { %3223 = vmatpush.bf16.msrb.mxu0 %v6586_v45  ;;  %v7050_v45 = vor.u32 %v8847_v10, %v7047_v42  ;;  %v8646_v10 = vld [vmem:[%s13715_s5 + $0x194] sm:$0xf0]  ;;  %v6858_v42 = vor.u32 %v8799_v53, %v6855_v9 }
 0x17e   :  { %3187 = vmatmul.bf16.vlgmr.msra.gmra.mxu1 %v10617_v63  ;;  %v6238_v12 = vor.u32 %v8646_v10, %v6237_v37  ;;  %v8634_v53 = vld [vmem:[%s13715_s5 + $0x134] sm:$0xf0] }
 0x17f   :  { %3235 = vmatpush.bf16.msrb.mxu1 %v6730_v56 }
 0x181   :  { %v1211_v43 = vpop.f32.mrf.mxu0  ;;  %3224 = vmatpush.bf16.msrb.mxu0 %v6570_v58  ;;  %v6126_v58 = vor.u32 %v8618_v8, %v6125_v16  ;;  %v8642_v16 = vld [vmem:[%s13715_s5 + $0x174] sm:$0xf0] }
 0x182   :  { %v1212_v61 = vadd.f32 %v1211_v43, %v173_v3  ;;  %v6554_v3 = vor.u32 %v8723_v51, %v6551_v55  ;;  %v8803_v43 = vld [vmem:[%s13715_s5 + $0x684] sm:$0xf]  ;;  %v6871_v51 = vld [vmem:[%s13715_s5 + $0x690] sm:$0xf0]  ;;  %v6109_v55 = vld [vmem:[%s13715_s5 + $0x88] sm:$0xf] }
 0x183   :  { %v1224_v2 = vpop.f32.mrf.mxu1  ;;  %3236 = vmatpush.bf16.msrb.mxu1 %v6714_v19  ;;  %v6874_v19 = vor.u32 %v8803_v43, %v6871_v51  ;;  %v8638_v43 = vld [vmem:[%s13715_s5 + $0x154] sm:$0xf0] }
 0x184   :  { %v1225_v20 = vadd.f32 %v1224_v2, %v1212_v61  ;;  %v7034_v2 = vor.u32 %v8843_v38, %v7031_v36 }
 0x185   :  { %3225 = vmatpush.bf16.msrb.mxu0 %v6554_v3  ;;  %v7015_v3 = vld [vmem:[%s13715_s5 + $0x7b0] sm:$0xf0] }
 0x186   :  { %v11025_v0 = vpack.c.bf16 %v1225_v20, %v1225_v20  ;;  %v6110_v20 = vor.u32 %v8614_v60, %v6109_v55  ;;  %v7018_v41 = vor.u32 %v8839_v7, %v7015_v3  ;;  %v8787_v55 = vld [vmem:[%s13715_s5 + $0x604] sm:$0xf]  ;;  %v6045_v60 = vld [vmem:[%s13715_s5 + $0x8] sm:$0xf]  ;;  %v8754_v7 = vld [vmem:[%s13715_s5 + $0x4f4] sm:$0xf0] }
 0x187   :  { %v1237_v11 = vpop.f32.mrf.mxu2  ;;  %3237 = vmatpush.bf16.msrb.mxu1 %v6698_v13  ;;  %v8835_v13 = vld [vmem:[%s13715_s5 + $0x784] sm:$0xf]  ;;  %v8690_v3 = vld [vmem:[%s13715_s5 + $0x2f4] sm:$0xf0] }
 0x188   :  { %3148 = vmatmul.bf16.vlgmr.msrb.gmra.mxu2 %v11025_v0  ;;  %v1238_v1 = vadd.f32 %v1237_v11, %v174_v6  ;;  %v6887_v6 = vld [vmem:[%s13715_s5 + $0x6b0] sm:$0xf0]  ;;  %3226 = vmatmul.bf16.vlgmr.msrb.gmra.mxu0 %v10905_v23 }
 0x189   :  { %v1250_v39 = vpop.f32.mrf.mxu3  ;;  %3244 = vmatpush.bf16.msrb.mxu2 %v6922_v47  ;;  %3270 = vmatpush.bf16.msra.mxu0 %v6158_v15  ;;  %v1213_v26 = vpop.f32.mrf.mxu0  ;;  %v6890_v56 = vor.u32 %v8807_v46, %v6887_v6  ;;  %v6093_v47 = vld [vmem:[%s13715_s5 + $0x68] sm:$0xf]  ;;  %v8610_v15 = vld [vmem:[%s13715_s5 + $0x74] sm:$0xf0]  ;;  %v6999_v11 = vld [vmem:[%s13715_s5 + $0x790] sm:$0xf0] }
 0x18a   :  { %v1251_v17 = vadd.f32 %v1250_v39, %v1238_v1  ;;  %v6094_v40 = vor.u32 %v8610_v15, %v6093_v47  ;;  %v6077_v1 = vld [vmem:[%s13715_s5 + $0x48] sm:$0xf]  ;;  %v8606_v39 = vld [vmem:[%s13715_s5 + $0x54] sm:$0xf0]  ;;  %v8795_v26 = vld [vmem:[%s13715_s5 + $0x644] sm:$0xf] }
 0x18b   :  { %v1226_v33 = vpop.f32.mrf.mxu1  ;;  %3238 = vmatpush.bf16.msrb.mxu1 %v6682_v29  ;;  %v6078_v46 = vor.u32 %v8606_v39, %v6077_v1  ;;  %v6221_v6 = vld [vmem:[%s13715_s5 + $0x168] sm:$0xf]  ;;  %v8602_v29 = vld [vmem:[%s13715_s5 + $0x34] sm:$0xf0]  ;;  %v6951_v47 = vld [vmem:[%s13715_s5 + $0x730] sm:$0xf0] }
 0x18c   :  { %v11076_v44 = vpack.c.bf16 %v1251_v17, %v1251_v17  ;;  %v6983_v33 = vld [vmem:[%s13715_s5 + $0x770] sm:$0xf0]  ;;  %v6061_v17 = vld [vmem:[%s13715_s5 + $0x28] sm:$0xf]  ;;  %v6222_v36 = vor.u32 %v8642_v16, %v6221_v6  ;;  %v6954_v37 = vor.u32 %v8823_v30, %v6951_v47  ;;  %v8819_v1 = vld [vmem:[%s13715_s5 + $0x704] sm:$0xf] }
 0x18d   :  { %3245 = vmatpush.bf16.msrb.mxu2 %v6906_v32  ;;  %3271 = vmatpush.bf16.msra.mxu0 %v6142_v54  ;;  %v6839_v32 = vld [vmem:[%s13715_s5 + $0x650] sm:$0xf0]  ;;  %v7002_v54 = vor.u32 %v8835_v13, %v6999_v11  ;;  %v6986_v38 = vor.u32 %v8831_v24, %v6983_v33  ;;  %v6189_v15 = vld [vmem:[%s13715_s5 + $0x128] sm:$0xf]  ;;  %v8750_v11 = vld [vmem:[%s13715_s5 + $0x4d4] sm:$0xf0] }
 0x18e   :  { %3161 = vmatmul.bf16.vlgmr.msrb.gmra.mxu3 %v11076_v44  ;;  %3239 = vmatmul.bf16.vlgmr.msrb.gmra.mxu1 %v10937_v22  ;;  %v6842_v8 = vor.u32 %v8795_v26, %v6839_v32  ;;  %v6397_v13 = vld [vmem:[%s13715_s5 + $0x2c8] sm:$0xf]  ;;  %v6190_v10 = vor.u32 %v8634_v53, %v6189_v15  ;;  %v6935_v39 = vld [vmem:[%s13715_s5 + $0x710] sm:$0xf0]  ;;  %v8630_v32 = vld [vmem:[%s13715_s5 + $0x114] sm:$0xf0] }
 0x18f   :  { %3257 = vmatpush.bf16.msrb.mxu3 %v7050_v45  ;;  %3283 = vmatpush.bf16.msra.mxu1 %v6286_v34  ;;  %v1239_v61 = vpop.f32.mrf.mxu2  ;;  %v8791_v45 = vld [vmem:[%s13715_s5 + $0x624] sm:$0xf]  ;;  %v6823_v34 = vld [vmem:[%s13715_s5 + $0x630] sm:$0xf0]  ;;  %v6173_v26 = vld [vmem:[%s13715_s5 + $0x108] sm:$0xf] }
 0x190   :  { %v6826_v51 = vor.u32 %v8791_v45, %v6823_v34  ;;  %v8598_v61 = vld [vmem:[%s13715_s5 + $0x14] sm:$0xf0]  ;;  %v6637_v16 = vld [vmem:[%s13715_s5 + $0x4a8] sm:$0xf] }
 0x191   :  { %v1252_v4 = vpop.f32.mrf.mxu3  ;;  %3246 = vmatpush.bf16.msrb.mxu2 %v6890_v56  ;;  %3272 = vmatpush.bf16.msra.mxu0 %v6126_v58  ;;  %v8827_v56 = vld [vmem:[%s13715_s5 + $0x744] sm:$0xf]  ;;  %v6062_v58 = vor.u32 %v8602_v29, %v6061_v17  ;;  %v6046_v21 = vor.u32 %v8598_v61, %v6045_v60  ;;  %v8722_v24 = vld [vmem:[%s13715_s5 + $0x3f4] sm:$0xf0]  ;;  %v6938_v17 = vor.u32 %v8819_v1, %v6935_v39  ;;  %v6381_v45 = vld [vmem:[%s13715_s5 + $0x2a8] sm:$0xf] }
 0x192   :  { %v6970_v4 = vor.u32 %v8827_v56, %v6967_v62  ;;  %v8786_v33 = vld [vmem:[%s13715_s5 + $0x5f4] sm:$0xf0]  ;;  %v6174_v29 = vor.u32 %v8630_v32, %v6173_v26  ;;  %v6525_v56 = vld [vmem:[%s13715_s5 + $0x3c8] sm:$0xf] }
 0x193   :  { %3258 = vmatpush.bf16.msrb.mxu3 %v7034_v2  ;;  %3284 = vmatpush.bf16.msra.mxu1 %v6270_v18  ;;  %v6807_v2 = vld [vmem:[%s13715_s5 + $0x610] sm:$0xf0]  ;;  %v6669_v18 = vld [vmem:[%s13715_s5 + $0x4e8] sm:$0xf]  ;;  %v8682_v34 = vld [vmem:[%s13715_s5 + $0x2b4] sm:$0xf0] }
 0x194   :  { %v6810_v9 = vor.u32 %v8787_v55, %v6807_v2  ;;  %v8718_v62 = vld [vmem:[%s13715_s5 + $0x3d4] sm:$0xf0]  ;;  %v6621_v55 = vld [vmem:[%s13715_s5 + $0x488] sm:$0xf] }
 0x195   :  { %3247 = vmatpush.bf16.msrb.mxu2 %v6874_v19  ;;  %3273 = vmatpush.bf16.msra.mxu0 %v6110_v20  ;;  %v6206_v19 = vor.u32 %v8638_v43, %v6205_v35  ;;  %v6413_v20 = vld [vmem:[%s13715_s5 + $0x2e8] sm:$0xf]  ;;  %v8782_v43 = vld [vmem:[%s13715_s5 + $0x5d4] sm:$0xf0] }
 0x196   :  { %v6781_v35 = vld [vmem:[%s13715_s5 + $0x5c8] sm:$0xf]  ;;  %v8742_v60 = vld [vmem:[%s13715_s5 + $0x494] sm:$0xf0] }
 0x197   :  { %3259 = vmatpush.bf16.msrb.mxu3 %v7018_v41  ;;  %3285 = vmatpush.bf16.msra.mxu1 %v6254_v49  ;;  %v6670_v41 = vor.u32 %v8754_v7, %v6669_v18  ;;  %v6414_v49 = vor.u32 %v8690_v3, %v6413_v20  ;;  %v6365_v61 = vld [vmem:[%s13715_s5 + $0x288] sm:$0xf]  ;;  %v8678_v2 = vld [vmem:[%s13715_s5 + $0x294] sm:$0xf0]  ;;  %v6526_v7 = vor.u32 %v8718_v62, %v6525_v56 }
 0x198   :  { %3200 = vmatmul.bf16.vlgmr.msra.gmra.mxu2 %v10766_v31  ;;  %v6622_v20 = vor.u32 %v8742_v60, %v6621_v55  ;;  %v8714_v3 = vld [vmem:[%s13715_s5 + $0x3b4] sm:$0xf0]  ;;  %v6765_v30 = vld [vmem:[%s13715_s5 + $0x5a8] sm:$0xf]  ;;  %v6366_v47 = vor.u32 %v8678_v2, %v6365_v61 }
 0x199   :  { %3274 = vmatpush.bf16.msra.mxu0 %v6094_v40  ;;  %3248 = vmatpush.bf16.msrb.mxu2 %v6858_v42  ;;  %v6653_v40 = vld [vmem:[%s13715_s5 + $0x4c8] sm:$0xf]  ;;  %v8686_v42 = vld [vmem:[%s13715_s5 + $0x2d4] sm:$0xf0] }
 0x19a   :  { %v6398_v6 = vor.u32 %v8686_v42, %v6397_v13  ;;  %v6605_v15 = vld [vmem:[%s13715_s5 + $0x468] sm:$0xf]  ;;  %v8738_v53 = vld [vmem:[%s13715_s5 + $0x474] sm:$0xf0] }
 0x19b   :  { %3260 = vmatpush.bf16.msrb.mxu3 %v7002_v54  ;;  %3286 = vmatpush.bf16.msra.mxu1 %v6238_v12  ;;  %v6541_v54 = vld [vmem:[%s13715_s5 + $0x3e8] sm:$0xf]  ;;  %v6654_v12 = vor.u32 %v8750_v11, %v6653_v40  ;;  %v6606_v11 = vor.u32 %v8738_v53, %v6605_v15  ;;  %v8774_v42 = vld [vmem:[%s13715_s5 + $0x594] sm:$0xf0] }
 0x19c   :  { %v6493_v40 = vld [vmem:[%s13715_s5 + $0x388] sm:$0xf]  ;;  %v8734_v26 = vld [vmem:[%s13715_s5 + $0x454] sm:$0xf0] }
 0x19d   :  { %3275 = vmatpush.bf16.msra.mxu0 %v6078_v46  ;;  %3249 = vmatpush.bf16.msrb.mxu2 %v6842_v8  ;;  %v6797_v46 = vld [vmem:[%s13715_s5 + $0x5e8] sm:$0xf]  ;;  %v8746_v8 = vld [vmem:[%s13715_s5 + $0x4b4] sm:$0xf0] }
 0x19e   :  { %3213 = vmatmul.bf16.vlgmr.msra.gmra.mxu3 %v10816_v57  ;;  %v6589_v39 = vld [vmem:[%s13715_s5 + $0x448] sm:$0xf]  ;;  %v8702_v55 = vld [vmem:[%s13715_s5 + $0x354] sm:$0xf0] }
 0x19f   :  { %3261 = vmatpush.bf16.msrb.mxu3 %v6986_v38  ;;  %3287 = vmatpush.bf16.msra.mxu1 %v6222_v36  ;;  %v6542_v38 = vor.u32 %v8722_v24, %v6541_v54  ;;  %v6798_v36 = vor.u32 %v8786_v33, %v6797_v46  ;;  %v6333_v54 = vld [vmem:[%s13715_s5 + $0x248] sm:$0xf]  ;;  %v8766_v61 = vld [vmem:[%s13715_s5 + $0x554] sm:$0xf0] }
 0x1a0   :  { %v6317_v56 = vld [vmem:[%s13715_s5 + $0x228] sm:$0xf]  ;;  %v8818_v53 = vld [vmem:[%s13715_s5 + $0x6f4] sm:$0xf0] }
 0x1a1   :  { %3276 = vmatpush.bf16.msra.mxu0 %v6062_v58  ;;  %3250 = vmatpush.bf16.msrb.mxu2 %v6826_v51  ;;  %v6638_v58 = vor.u32 %v8746_v8, %v6637_v16  ;;  %v6382_v51 = vor.u32 %v8682_v34, %v6381_v45  ;;  %v6477_v16 = vld [vmem:[%s13715_s5 + $0x368] sm:$0xf]  ;;  %v6590_v8 = vor.u32 %v8734_v26, %v6589_v39  ;;  %v8770_v45 = vld [vmem:[%s13715_s5 + $0x574] sm:$0xf0]  ;;  %v6143_v39 = vld [vmem:[%s13715_s5 + $0xd8] sm:$0xf0] }
 0x1a2   :  { %v6717_v60 = vld [vmem:[%s13715_s5 + $0x548] sm:$0xf] }
 0x1a3   :  { %3262 = vmatpush.bf16.msrb.mxu3 %v6970_v4  ;;  %3288 = vmatpush.bf16.msra.mxu1 %v6206_v19  ;;  %v6782_v4 = vor.u32 %v8782_v43, %v6781_v35  ;;  %v6509_v19 = vld [vmem:[%s13715_s5 + $0x3a8] sm:$0xf] }
 0x1a4   :  { %v6461_v43 = vld [vmem:[%s13715_s5 + $0x348] sm:$0xf] }
 0x1a5   :  { %3277 = vmatpush.bf16.msra.mxu0 %v6046_v21  ;;  %3251 = vmatpush.bf16.msrb.mxu2 %v6810_v9  ;;  %v3071_v18 = vpop.f32.mrf.mxu0  ;;  %v8778_v21 = vld [vmem:[%s13715_s5 + $0x5b4] sm:$0xf0]  ;;  %v6349_v9 = vld [vmem:[%s13715_s5 + $0x268] sm:$0xf] }
 0x1a6   :  { %v6766_v13 = vor.u32 %v8778_v21, %v6765_v30  ;;  %v6159_v30 = vld [vmem:[%s13715_s5 + $0xf8] sm:$0xf0]  ;;  %v6462_v21 = vor.u32 %v8702_v55, %v6461_v43  ;;  %v6925_v15 = vld [vmem:[%s13715_s5 + $0x6e8] sm:$0xf] }
 0x1a7   :  { %3263 = vmatpush.bf16.msrb.mxu3 %v6954_v37  ;;  %3289 = vmatpush.bf16.msra.mxu1 %v6190_v10  ;;  %v8710_v37 = vld [vmem:[%s13715_s5 + $0x394] sm:$0xf0]  ;;  %v6749_v10 = vld [vmem:[%s13715_s5 + $0x588] sm:$0xf] }
 0x1a8   :  { %3278 = vmatmul.bf16.vlgmr.msra.gmra.mxu0 %v10561_v27  ;;  %3252 = vmatmul.bf16.vlgmr.msrb.gmra.mxu2 %v11025_v0  ;;  %v6494_v33 = vor.u32 %v8710_v37, %v6493_v40  ;;  %v8762_v40 = vld [vmem:[%s13715_s5 + $0x534] sm:$0xf0]  ;;  %v6893_v43 = vld [vmem:[%s13715_s5 + $0x6a8] sm:$0xf] }
 0x1a9   :  { %3322 = vmatpush.bf16.msrb.mxu0 %v6670_v41  ;;  %3296 = vmatpush.bf16.msra.mxu2 %v6414_v49  ;;  %v8674_v41 = vld [vmem:[%s13715_s5 + $0x274] sm:$0xf0]  ;;  %v6510_v49 = vor.u32 %v8714_v3, %v6509_v19  ;;  %v8624_v3 = vld [vmem:[%s13715_s5 + $0xec] sm:$0xf]  ;;  %v7037_v55 = vld [vmem:[%s13715_s5 + $0x7c8] sm:$0xf] }
 0x1aa   :  { %v6350_v1 = vor.u32 %v8674_v41, %v6349_v9  ;;  %v6445_v9 = vld [vmem:[%s13715_s5 + $0x328] sm:$0xf]  ;;  %v6162_v37 = vor.u32 %v8624_v3, %v6159_v30 }
 0x1ab   :  { %3264 = vmatpush.bf16.msrb.mxu3 %v6938_v17  ;;  %3290 = vmatpush.bf16.msra.mxu1 %v6174_v29  ;;  %v8706_v17 = vld [vmem:[%s13715_s5 + $0x374] sm:$0xf0]  ;;  %v6733_v29 = vld [vmem:[%s13715_s5 + $0x568] sm:$0xf] }
 0x1ac   :  { %v6478_v62 = vor.u32 %v8706_v17, %v6477_v16  ;;  %v6734_v35 = vor.u32 %v8770_v45, %v6733_v29  ;;  %v7053_v16 = vld [vmem:[%s13715_s5 + $0x7e8] sm:$0xf]  ;;  %v8850_v17 = vld [vmem:[%s13715_s5 + $0x7f4] sm:$0xf0]  ;;  %v8656_v29 = vld [vmem:[%s13715_s5 + $0x1ec] sm:$0xf] }
 0x1ad   :  { %3323 = vmatpush.bf16.msrb.mxu0 %v6654_v12  ;;  %3297 = vmatpush.bf16.msra.mxu2 %v6398_v6  ;;  %v8670_v12 = vld [vmem:[%s13715_s5 + $0x254] sm:$0xf0]  ;;  %v3073_v46 = vpop.f32.mrf.mxu0  ;;  %v6750_v6 = vor.u32 %v8774_v42, %v6749_v10  ;;  %v6926_v10 = vor.u32 %v8818_v53, %v6925_v15  ;;  %v6909_v42 = vld [vmem:[%s13715_s5 + $0x6c8] sm:$0xf]  ;;  %v6287_v45 = vld [vmem:[%s13715_s5 + $0x1f8] sm:$0xf0] }
 0x1ae   :  { %3291 = vmatmul.bf16.vlgmr.msra.gmra.mxu1 %v10617_v63  ;;  %3265 = vmatmul.bf16.vlgmr.msrb.gmra.mxu3 %v11076_v44  ;;  %v6334_v34 = vor.u32 %v8670_v12, %v6333_v54  ;;  %v8814_v54 = vld [vmem:[%s13715_s5 + $0x6d4] sm:$0xf0]  ;;  %v6429_v12 = vld [vmem:[%s13715_s5 + $0x308] sm:$0xf] }
 0x1af   :  { %3309 = vmatpush.bf16.msra.mxu3 %v6542_v38  ;;  %3335 = vmatpush.bf16.msrb.mxu1 %v6798_v36  ;;  %v6573_v38 = vld [vmem:[%s13715_s5 + $0x428] sm:$0xf]  ;;  %v8730_v36 = vld [vmem:[%s13715_s5 + $0x434] sm:$0xf0] }
 0x1b0   :  { %v8694_v46 = vld [vmem:[%s13715_s5 + $0x314] sm:$0xf0]  ;;  %v6877_v30 = vld [vmem:[%s13715_s5 + $0x688] sm:$0xf] }
 0x1b1   :  { %3324 = vmatpush.bf16.msrb.mxu0 %v6638_v58  ;;  %3298 = vmatpush.bf16.msra.mxu2 %v6382_v51  ;;  %v3084_v32 = vpop.f32.mrf.mxu1  ;;  %v8666_v58 = vld [vmem:[%s13715_s5 + $0x234] sm:$0xf0]  ;;  %v6574_v51 = vor.u32 %v8730_v36, %v6573_v38  ;;  %v8616_v38 = vld [vmem:[%s13715_s5 + $0xac] sm:$0xf]  ;;  %v6127_v36 = vld [vmem:[%s13715_s5 + $0xb8] sm:$0xf0] }
 0x1b2   :  { %v11344_v24 = vadd.f32 %v3084_v32, %v3071_v18  ;;  %v6318_v2 = vor.u32 %v8666_v58, %v6317_v56  ;;  %v6301_v18 = vld [vmem:[%s13715_s5 + $0x208] sm:$0xf]  ;;  %v6430_v56 = vor.u32 %v8694_v46, %v6429_v12  ;;  %v8842_v53 = vld [vmem:[%s13715_s5 + $0x7b4] sm:$0xf0]  ;;  %v8604_v46 = vld [vmem:[%s13715_s5 + $0x4c] sm:$0xf] }
 0x1b3   :  { %3310 = vmatpush.bf16.msra.mxu3 %v6526_v7  ;;  %3336 = vmatpush.bf16.msrb.mxu1 %v6782_v4  ;;  %v6557_v7 = vld [vmem:[%s13715_s5 + $0x408] sm:$0xf]  ;;  %v8726_v4 = vld [vmem:[%s13715_s5 + $0x414] sm:$0xf0] }
 0x1b4   :  { %v6558_v41 = vor.u32 %v8726_v4, %v6557_v7  ;;  %v8612_v7 = vld [vmem:[%s13715_s5 + $0x8c] sm:$0xf]  ;;  %v6111_v4 = vld [vmem:[%s13715_s5 + $0x98] sm:$0xf0] }
 0x1b5   :  { %3325 = vmatpush.bf16.msrb.mxu0 %v6622_v20  ;;  %3299 = vmatpush.bf16.msra.mxu2 %v6366_v47  ;;  %v8662_v20 = vld [vmem:[%s13715_s5 + $0x214] sm:$0xf0]  ;;  %v6718_v47 = vor.u32 %v8766_v61, %v6717_v60  ;;  %v6130_v60 = vor.u32 %v8616_v38, %v6127_v36  ;;  %v6114_v15 = vor.u32 %v8612_v7, %v6111_v4  ;;  %v8640_v36 = vld [vmem:[%s13715_s5 + $0x16c] sm:$0xf] }
 0x1b6   :  { %v8846_v61 = vld [vmem:[%s13715_s5 + $0x7d4] sm:$0xf0]  ;;  %v8636_v4 = vld [vmem:[%s13715_s5 + $0x14c] sm:$0xf] }
 0x1b7   :  { %3311 = vmatpush.bf16.msra.mxu3 %v6510_v49  ;;  %3337 = vmatpush.bf16.msrb.mxu1 %v6766_v13  ;;  %v8698_v49 = vld [vmem:[%s13715_s5 + $0x334] sm:$0xf0]  ;;  %v6701_v13 = vld [vmem:[%s13715_s5 + $0x528] sm:$0xf] }
 0x1b8   :  { %v6446_v26 = vor.u32 %v8698_v49, %v6445_v9  ;;  %v6702_v32 = vor.u32 %v8762_v40, %v6701_v13  ;;  %v8648_v9 = vld [vmem:[%s13715_s5 + $0x1ac] sm:$0xf]  ;;  %v6095_v13 = vld [vmem:[%s13715_s5 + $0x78] sm:$0xf0]  ;;  %v8830_v7 = vld [vmem:[%s13715_s5 + $0x754] sm:$0xf0] }
 0x1b9   :  { %3326 = vmatpush.bf16.msrb.mxu0 %v6606_v11  ;;  %3300 = vmatpush.bf16.msra.mxu2 %v6350_v1  ;;  %v3086_v19 = vpop.f32.mrf.mxu1  ;;  %v6302_v11 = vor.u32 %v8662_v20, %v6301_v18  ;;  %v8620_v1 = vld [vmem:[%s13715_s5 + $0xcc] sm:$0xf]  ;;  %v6271_v18 = vld [vmem:[%s13715_s5 + $0x1d8] sm:$0xf0]  ;;  %v7038_v20 = vor.u32 %v8846_v61, %v7037_v55  ;;  %v6829_v55 = vld [vmem:[%s13715_s5 + $0x628] sm:$0xf] }
 0x1ba   :  { %v8608_v49 = vld [vmem:[%s13715_s5 + $0x6c] sm:$0xf]  ;;  %v6973_v61 = vld [vmem:[%s13715_s5 + $0x748] sm:$0xf] }
 0x1bb   :  { %3312 = vmatpush.bf16.msra.mxu3 %v6494_v33  ;;  %3338 = vmatpush.bf16.msrb.mxu1 %v6750_v6  ;;  %v6685_v33 = vld [vmem:[%s13715_s5 + $0x508] sm:$0xf]  ;;  %v8758_v6 = vld [vmem:[%s13715_s5 + $0x514] sm:$0xf0] }
 0x1bc   :  { %v6686_v58 = vor.u32 %v8758_v6, %v6685_v33  ;;  %v6079_v33 = vld [vmem:[%s13715_s5 + $0x58] sm:$0xf0] }
 0x1bd   :  { %3327 = vmatpush.bf16.msrb.mxu0 %v6590_v8  ;;  %3301 = vmatpush.bf16.msra.mxu2 %v6334_v34  ;;  %v6146_v8 = vor.u32 %v8620_v1, %v6143_v39  ;;  %v6910_v34 = vor.u32 %v8814_v54, %v6909_v42  ;;  %v8802_v42 = vld [vmem:[%s13715_s5 + $0x674] sm:$0xf0]  ;;  %v7005_v1 = vld [vmem:[%s13715_s5 + $0x788] sm:$0xf]  ;;  %v6098_v39 = vor.u32 %v8608_v49, %v6095_v13  ;;  %v6239_v54 = vld [vmem:[%s13715_s5 + $0x198] sm:$0xf0] }
 0x1be   :  { %v6082_v38 = vor.u32 %v8604_v46, %v6079_v33  ;;  %v6813_v49 = vld [vmem:[%s13715_s5 + $0x608] sm:$0xf]  ;;  %v8790_v13 = vld [vmem:[%s13715_s5 + $0x614] sm:$0xf0] }
 0x1bf   :  { %3313 = vmatpush.bf16.msra.mxu3 %v6478_v62  ;;  %3339 = vmatpush.bf16.msrb.mxu1 %v6734_v35  ;;  %v7054_v62 = vor.u32 %v8850_v17, %v7053_v16  ;;  %v6290_v35 = vor.u32 %v8656_v29, %v6287_v45  ;;  %v6845_v29 = vld [vmem:[%s13715_s5 + $0x648] sm:$0xf]  ;;  %v8798_v45 = vld [vmem:[%s13715_s5 + $0x654] sm:$0xf0] }
 0x1c1   :  { %3328 = vmatpush.bf16.msrb.mxu0 %v6574_v51  ;;  %3302 = vmatpush.bf16.msra.mxu2 %v6318_v2  ;;  %v8810_v51 = vld [vmem:[%s13715_s5 + $0x6b4] sm:$0xf0]  ;;  %v8652_v2 = vld [vmem:[%s13715_s5 + $0x1cc] sm:$0xf] }
 0x1c2   :  { %v6894_v19 = vor.u32 %v8810_v51, %v6893_v43  ;;  %v6274_v3 = vor.u32 %v8652_v2, %v6271_v18 }
 0x1c3   :  { %3314 = vmatpush.bf16.msra.mxu3 %v6462_v21  ;;  %3340 = vmatpush.bf16.msrb.mxu1 %v6718_v47  ;;  %v8806_v21 = vld [vmem:[%s13715_s5 + $0x694] sm:$0xf0]  ;;  %v7021_v47 = vld [vmem:[%s13715_s5 + $0x7a8] sm:$0xf] }
 0x1c4   :  { %v6878_v40 = vor.u32 %v8806_v21, %v6877_v30  ;;  %v6047_v30 = vld [vmem:[%s13715_s5 + $0x18] sm:$0xf0] }
 0x1c5   :  { %3329 = vmatpush.bf16.msrb.mxu0 %v6558_v41  ;;  %3303 = vmatpush.bf16.msra.mxu2 %v6302_v11  ;;  %v6255_v41 = vld [vmem:[%s13715_s5 + $0x1b8] sm:$0xf0]  ;;  %v7022_v11 = vor.u32 %v8842_v53, %v7021_v47 }
 0x1c6   :  { %v6671_v53 = vld [vmem:[%s13715_s5 + $0x4f8] sm:$0xf0] }
 0x1c7   :  { %3315 = vmatpush.bf16.msra.mxu3 %v6446_v26  ;;  %3341 = vmatpush.bf16.msrb.mxu1 %v6702_v32  ;;  %v8838_v26 = vld [vmem:[%s13715_s5 + $0x794] sm:$0xf0]  ;;  %v8644_v32 = vld [vmem:[%s13715_s5 + $0x18c] sm:$0xf] }
 0x1c8   :  { %3304 = vmatmul.bf16.vlgmr.msra.gmra.mxu2 %v10766_v31  ;;  %3330 = vmatmul.bf16.vlgmr.msrb.gmra.mxu0 %v10905_v23  ;;  %v6242_v17 = vor.u32 %v8644_v32, %v6239_v54  ;;  %v6814_v32 = vor.u32 %v8790_v13, %v6813_v49  ;;  %v8748_v54 = vld [vmem:[%s13715_s5 + $0x4cc] sm:$0xf] }
 0x1c9   :  { %3374 = vmatpush.bf16.msra.mxu0 %v6162_v37  ;;  %3348 = vmatpush.bf16.msrb.mxu2 %v6926_v10  ;;  %v6258_v37 = vor.u32 %v8648_v9, %v6255_v41  ;;  %v6861_v10 = vld [vmem:[%s13715_s5 + $0x668] sm:$0xf]  ;;  %v6974_v9 = vor.u32 %v8830_v7, %v6973_v61 }
 0x1ca   :  { %v6862_v16 = vor.u32 %v8802_v42, %v6861_v10  ;;  %v6957_v10 = vld [vmem:[%s13715_s5 + $0x728] sm:$0xf]  ;;  %v8826_v42 = vld [vmem:[%s13715_s5 + $0x734] sm:$0xf0] }
 0x1cb   :  { %3316 = vmatpush.bf16.msra.mxu3 %v6430_v56  ;;  %3342 = vmatpush.bf16.msrb.mxu1 %v6686_v58  ;;  %v6223_v56 = vld [vmem:[%s13715_s5 + $0x178] sm:$0xf0]  ;;  %v8600_v58 = vld [vmem:[%s13715_s5 + $0x2c] sm:$0xf]  ;;  %v6958_v33 = vor.u32 %v8826_v42, %v6957_v10 }
 0x1cc   :  { %v6226_v51 = vor.u32 %v8640_v36, %v6223_v56  ;;  %v8720_v36 = vld [vmem:[%s13715_s5 + $0x3ec] sm:$0xf]  ;;  %v6543_v56 = vld [vmem:[%s13715_s5 + $0x3f8] sm:$0xf0] }
 0x1cd   :  { %3375 = vmatpush.bf16.msra.mxu0 %v6146_v8  ;;  %3349 = vmatpush.bf16.msrb.mxu2 %v6910_v34  ;;  %v3097_v12 = vpop.f32.mrf.mxu2  ;;  %v7006_v8 = vor.u32 %v8838_v26, %v7005_v1  ;;  %v6989_v34 = vld [vmem:[%s13715_s5 + $0x768] sm:$0xf]  ;;  %v6191_v26 = vld [vmem:[%s13715_s5 + $0x138] sm:$0xf0]  ;;  %v6546_v61 = vor.u32 %v8720_v36, %v6543_v56  ;;  %v8776_v10 = vld [vmem:[%s13715_s5 + $0x5ac] sm:$0xf] }
 0x1ce   :  { %3317 = vmatmul.bf16.vlgmr.msra.gmra.mxu3 %v10816_v57  ;;  %3343 = vmatmul.bf16.vlgmr.msrb.gmra.mxu1 %v10937_v22  ;;  %v3098_v6 = vadd.f32 %v3097_v12, %v11344_v24  ;;  %v8834_v24 = vld [vmem:[%s13715_s5 + $0x774] sm:$0xf0]  ;;  %v6655_v12 = vld [vmem:[%s13715_s5 + $0x4d8] sm:$0xf0] }
 0x1cf   :  { %3361 = vmatpush.bf16.msrb.mxu3 %v7054_v62  ;;  %3387 = vmatpush.bf16.msra.mxu1 %v6290_v35  ;;  %v6063_v62 = vld [vmem:[%s13715_s5 + $0x38] sm:$0xf0]  ;;  %v6846_v35 = vor.u32 %v8798_v45, %v6845_v29  ;;  %v6990_v43 = vor.u32 %v8834_v24, %v6989_v34  ;;  %v8822_v29 = vld [vmem:[%s13715_s5 + $0x714] sm:$0xf0]  ;;  %v8628_v45 = vld [vmem:[%s13715_s5 + $0x10c] sm:$0xf]  ;;  %v6658_v24 = vor.u32 %v8748_v54, %v6655_v12 }
 0x1d0   :  { %v6066_v18 = vor.u32 %v8600_v58, %v6063_v62  ;;  %v6175_v34 = vld [vmem:[%s13715_s5 + $0x118] sm:$0xf0]  ;;  %v8784_v58 = vld [vmem:[%s13715_s5 + $0x5ec] sm:$0xf] }
 0x1d1   :  { %3376 = vmatpush.bf16.msra.mxu0 %v6130_v60  ;;  %3350 = vmatpush.bf16.msrb.mxu2 %v6894_v19  ;;  %v8794_v60 = vld [vmem:[%s13715_s5 + $0x634] sm:$0xf0]  ;;  %v3110_v2 = vpop.f32.mrf.mxu3  ;;  %v6207_v19 = vld [vmem:[%s13715_s5 + $0x158] sm:$0xf0] }
 0x1d2   :  { %v6830_v47 = vor.u32 %v8794_v60, %v6829_v55  ;;  %v6210_v41 = vor.u32 %v8636_v4, %v6207_v19  ;;  %v6799_v62 = vld [vmem:[%s13715_s5 + $0x5f8] sm:$0xf0]  ;;  %v6178_v60 = vor.u32 %v8628_v45, %v6175_v34  ;;  %v8716_v19 = vld [vmem:[%s13715_s5 + $0x3cc] sm:$0xf] }
 0x1d3   :  { %3362 = vmatpush.bf16.msrb.mxu3 %v7038_v20  ;;  %3388 = vmatpush.bf16.msra.mxu1 %v6274_v3  ;;  %v11579_v20 = vadd.f32 %v3110_v2, %v3098_v6  ;;  %v8596_v3 = vld [vmem:[%s13715_s5 + $0xc] sm:$0xf]  ;;  %v6802_v7 = vor.u32 %v8784_v58, %v6799_v62  ;;  %v6351_v12 = vld [vmem:[%s13715_s5 + $0x278] sm:$0xf0] }
 0x1d4   :  { %v8684_v6 = vld [vmem:[%s13715_s5 + $0x2cc] sm:$0xf]  ;;  %v6335_v36 = vld [vmem:[%s13715_s5 + $0x258] sm:$0xf0] }
 0x1d5   :  { %3377 = vmatpush.bf16.msra.mxu0 %v6114_v15  ;;  %3351 = vmatpush.bf16.msrb.mxu2 %v6878_v40  ;;  %v3099_v21 = vpop.f32.mrf.mxu2  ;;  %v8752_v15 = vld [vmem:[%s13715_s5 + $0x4ec] sm:$0xf] }
 0x1d6   :  { %v8688_v40 = vld [vmem:[%s13715_s5 + $0x2ec] sm:$0xf]  ;;  %v6674_v1 = vor.u32 %v8752_v15, %v6671_v53 }
 0x1d7   :  { %3363 = vmatpush.bf16.msrb.mxu3 %v7022_v11  ;;  %3389 = vmatpush.bf16.msra.mxu1 %v6258_v37  ;;  %v6050_v11 = vor.u32 %v8596_v3, %v6047_v30  ;;  %v6415_v37 = vld [vmem:[%s13715_s5 + $0x2f8] sm:$0xf0]  ;;  %v8680_v2 = vld [vmem:[%s13715_s5 + $0x2ac] sm:$0xf] }
 0x1d8   :  { %v6418_v46 = vor.u32 %v8688_v40, %v6415_v37  ;;  %v8780_v3 = vld [vmem:[%s13715_s5 + $0x5cc] sm:$0xf]  ;;  %v6783_v30 = vld [vmem:[%s13715_s5 + $0x5d8] sm:$0xf0] }
 0x1d9   :  { %3378 = vmatpush.bf16.msra.mxu0 %v6098_v39  ;;  %3352 = vmatpush.bf16.msrb.mxu2 %v6862_v16  ;;  %v8632_v39 = vld [vmem:[%s13715_s5 + $0x12c] sm:$0xf]  ;;  %v6399_v16 = vld [vmem:[%s13715_s5 + $0x2d8] sm:$0xf0]  ;;  %v6786_v13 = vor.u32 %v8780_v3, %v6783_v30 }
 0x1da   :  { %v8740_v21 = vld [vmem:[%s13715_s5 + $0x48c] sm:$0xf]  ;;  %v6511_v37 = vld [vmem:[%s13715_s5 + $0x3b8] sm:$0xf0] }
 0x1db   :  { %3364 = vmatpush.bf16.msrb.mxu3 %v7006_v8  ;;  %3390 = vmatpush.bf16.msra.mxu1 %v6242_v17  ;;  %v6941_v8 = vld [vmem:[%s13715_s5 + $0x708] sm:$0xf]  ;;  %v6194_v17 = vor.u32 %v8632_v39, %v6191_v26  ;;  %v8736_v39 = vld [vmem:[%s13715_s5 + $0x46c] sm:$0xf]  ;;  %v6607_v26 = vld [vmem:[%s13715_s5 + $0x478] sm:$0xf0] }
 0x1dc   :  { %v6942_v55 = vor.u32 %v8822_v29, %v6941_v8  ;;  %v6751_v8 = vld [vmem:[%s13715_s5 + $0x598] sm:$0xf0]  ;;  %v8700_v30 = vld [vmem:[%s13715_s5 + $0x34c] sm:$0xf] }
 0x1dd   :  { %3379 = vmatpush.bf16.msra.mxu0 %v6082_v38  ;;  %3353 = vmatpush.bf16.msrb.mxu2 %v6846_v35  ;;  %v3112_v38 = vpop.f32.mrf.mxu3  ;;  %v8744_v35 = vld [vmem:[%s13715_s5 + $0x4ac] sm:$0xf]  ;;  %v6591_v29 = vld [vmem:[%s13715_s5 + $0x458] sm:$0xf0] }
 0x1df   :  { %3365 = vmatpush.bf16.msrb.mxu3 %v6990_v43  ;;  %3391 = vmatpush.bf16.msra.mxu1 %v6226_v51  ;;  %v6639_v43 = vld [vmem:[%s13715_s5 + $0x4b8] sm:$0xf0]  ;;  %v6402_v51 = vor.u32 %v8684_v6, %v6399_v16  ;;  %v8772_v16 = vld [vmem:[%s13715_s5 + $0x58c] sm:$0xf] }
 0x1e0   :  { %v6642_v4 = vor.u32 %v8744_v35, %v6639_v43  ;;  %v6495_v6 = vld [vmem:[%s13715_s5 + $0x398] sm:$0xf0]  ;;  %v6754_v62 = vor.u32 %v8772_v16, %v6751_v8  ;;  %v8704_v43 = vld [vmem:[%s13715_s5 + $0x36c] sm:$0xf]  ;;  %v8365_v16 = vld [vmem:[%s13716_s4 + $0xcc] sm:$0xf0] }
 0x1e1   :  { %3380 = vmatpush.bf16.msra.mxu0 %v6066_v18  ;;  %3354 = vmatpush.bf16.msrb.mxu2 %v6830_v47  ;;  %v6383_v18 = vld [vmem:[%s13715_s5 + $0x2b8] sm:$0xf0] }
 0x1e2   :  { %v6623_v47 = vld [vmem:[%s13715_s5 + $0x498] sm:$0xf0]  ;;  %v6386_v15 = vor.u32 %v8680_v2, %v6383_v18 }
 0x1e3   :  { %3366 = vmatpush.bf16.msrb.mxu3 %v6974_v9  ;;  %3392 = vmatpush.bf16.msra.mxu1 %v6210_v41  ;;  %v8676_v9 = vld [vmem:[%s13715_s5 + $0x28c] sm:$0xf]  ;;  %v6367_v41 = vld [vmem:[%s13715_s5 + $0x298] sm:$0xf0]  ;;  %v6626_v40 = vor.u32 %v8740_v21, %v6623_v47 }
 0x1e4   :  { %v6575_v2 = vld [vmem:[%s13715_s5 + $0x438] sm:$0xf0]  ;;  %v8764_v47 = vld [vmem:[%s13715_s5 + $0x54c] sm:$0xf] }
 0x1e5   :  { %3381 = vmatpush.bf16.msra.mxu0 %v6050_v11  ;;  %3355 = vmatpush.bf16.msrb.mxu2 %v6814_v32  ;;  %v3123_v49 = vpop.f32.mrf.mxu0  ;;  %v8712_v11 = vld [vmem:[%s13715_s5 + $0x3ac] sm:$0xf]  ;;  %v6370_v32 = vor.u32 %v8676_v9, %v6367_v41  ;;  %v6463_v21 = vld [vmem:[%s13715_s5 + $0x358] sm:$0xf0] }
 0x1e6   :  { %v3124_v42 = vadd.f32 %v3123_v49, %v11579_v20  ;;  %v6514_v54 = vor.u32 %v8712_v11, %v6511_v37  ;;  %v8672_v20 = vld [vmem:[%s13715_s5 + $0x26c] sm:$0xf]  ;;  %v6559_v9 = vld [vmem:[%s13715_s5 + $0x418] sm:$0xf0]  ;;  %v7173_v49 = vld [vmem:[%s13716_s4 + $0xe0] sm:$0xf]  ;;  %v6466_v11 = vor.u32 %v8700_v30, %v6463_v21 }
 0x1e7   :  { %3367 = vmatpush.bf16.msrb.mxu3 %v6958_v33  ;;  %3393 = vmatpush.bf16.msra.mxu1 %v6194_v17  ;;  %v6610_v33 = vor.u32 %v8736_v39, %v6607_v26  ;;  %v8732_v17 = vld [vmem:[%s13715_s5 + $0x44c] sm:$0xf]  ;;  %v6354_v45 = vor.u32 %v8672_v20, %v6351_v12  ;;  %v6447_v20 = vld [vmem:[%s13715_s5 + $0x338] sm:$0xf0] }
 0x1e8   :  { %3382 = vmatmul.bf16.vlgmr.msra.gmra.mxu0 %v10561_v27  ;;  %3356 = vmatmul.bf16.vlgmr.msrb.gmra.mxu2 %v11025_v0  ;;  %v6527_v27 = vld [vmem:[%s13715_s5 + $0x3d8] sm:$0xf0]  ;;  %v6594_v35 = vor.u32 %v8732_v17, %v6591_v29  ;;  %v8660_v37 = vld [vmem:[%s13715_s5 + $0x20c] sm:$0xf] }
 0x1e9   :  { %3426 = vmatpush.bf16.msrb.mxu0 %v6674_v1  ;;  %3400 = vmatpush.bf16.msra.mxu2 %v6418_v46  ;;  %v6530_v53 = vor.u32 %v8716_v19, %v6527_v27  ;;  %v6767_v1 = vld [vmem:[%s13715_s5 + $0x5b8] sm:$0xf0]  ;;  %v8812_v29 = vld [vmem:[%s13715_s5 + $0x6cc] sm:$0xf] }
 0x1ea   :  { %v6770_v46 = vor.u32 %v8776_v10, %v6767_v1  ;;  %v6319_v19 = vld [vmem:[%s13715_s5 + $0x238] sm:$0xf0]  ;;  %v8808_v30 = vld [vmem:[%s13715_s5 + $0x6ac] sm:$0xf] }
 0x1eb   :  { %3368 = vmatpush.bf16.msrb.mxu3 %v6942_v55  ;;  %3394 = vmatpush.bf16.msra.mxu1 %v6178_v60  ;;  %v3136_v34 = vpop.f32.mrf.mxu1  ;;  %v8768_v55 = vld [vmem:[%s13715_s5 + $0x56c] sm:$0xf]  ;;  %v6735_v60 = vld [vmem:[%s13715_s5 + $0x578] sm:$0xf0] }
 0x1ec   :  { %v11742_v56 = vadd.f32 %v3136_v34, %v3124_v42  ;;  %v6738_v27 = vor.u32 %v8768_v55, %v6735_v60  ;;  %v6303_v10 = vld [vmem:[%s13715_s5 + $0x218] sm:$0xf0]  ;;  %v8816_v42 = vld [vmem:[%s13715_s5 + $0x6ec] sm:$0xf]  ;;  %v8401_v55 = vld [vmem:[%s13716_s4 + $0x1ec] sm:$0xf0] }
 0x1ed   :  { %3427 = vmatpush.bf16.msrb.mxu0 %v6658_v24  ;;  %3401 = vmatpush.bf16.msra.mxu2 %v6402_v51  ;;  %v8668_v24 = vld [vmem:[%s13715_s5 + $0x24c] sm:$0xf]  ;;  %v3125_v58 = vpop.f32.mrf.mxu0  ;;  %v6479_v51 = vld [vmem:[%s13715_s5 + $0x378] sm:$0xf0]  ;;  %v7141_v60 = vld [vmem:[%s13716_s4 + $0xa0] sm:$0xf] }
 0x1ee   :  { %3369 = vmatmul.bf16.vlgmr.msrb.gmra.mxu3 %v11076_v44  ;;  %3395 = vmatmul.bf16.vlgmr.msra.gmra.mxu1 %v10617_v63  ;;  %v8708_v63 = vld [vmem:[%s13715_s5 + $0x38c] sm:$0xf]  ;;  %v6338_v18 = vor.u32 %v8668_v24, %v6335_v36  ;;  %v6431_v24 = vld [vmem:[%s13715_s5 + $0x318] sm:$0xf0] }
 0x1ef   :  { %3413 = vmatpush.bf16.msra.mxu3 %v6546_v61  ;;  %3439 = vmatpush.bf16.msrb.mxu1 %v6802_v7  ;;  %v6498_v38 = vor.u32 %v8708_v63, %v6495_v6  ;;  %v8728_v61 = vld [vmem:[%s13715_s5 + $0x42c] sm:$0xf]  ;;  %v6482_v7 = vor.u32 %v8704_v43, %v6479_v51  ;;  %v6306_v63 = vor.u32 %v8660_v37, %v6303_v10  ;;  %v7157_v6 = vld [vmem:[%s13716_s4 + $0xc0] sm:$0xf]  ;;  %v6687_v58 = vld [vmem:[%s13715_s5 + $0x518] sm:$0xf0] }
 0x1f0   :  { %v6578_v3 = vor.u32 %v8728_v61, %v6575_v2  ;;  %v8692_v34 = vld [vmem:[%s13715_s5 + $0x30c] sm:$0xf]  ;;  %v7055_v43 = vld [vmem:[%s13715_s5 + $0x7f8] sm:$0xf0]  ;;  %v7301_v51 = vld [vmem:[%s13716_s4 + $0x1e0] sm:$0xf] }
 0x1f1   :  { %3428 = vmatpush.bf16.msrb.mxu0 %v6642_v4  ;;  %3402 = vmatpush.bf16.msra.mxu2 %v6386_v15  ;;  %v8664_v4 = vld [vmem:[%s13715_s5 + $0x22c] sm:$0xf]  ;;  %v6719_v15 = vld [vmem:[%s13715_s5 + $0x558] sm:$0xf0]  ;;  %v8361_v61 = vld [vmem:[%s13716_s4 + $0xac] sm:$0xf0] }
 0x1f2   :  { %v6322_v41 = vor.u32 %v8664_v4, %v6319_v19  ;;  %v6722_v39 = vor.u32 %v8764_v47, %v6719_v15  ;;  %v8756_v36 = vld [vmem:[%s13715_s5 + $0x50c] sm:$0xf]  ;;  %v6895_v21 = vld [vmem:[%s13715_s5 + $0x6b8] sm:$0xf0]  ;;  %v7302_v47 = vor.u32 %v8401_v55, %v7301_v51  ;;  %v7142_v15 = vor.u32 %v8361_v61, %v7141_v60  ;;  %v7237_v61 = vld [vmem:[%s13716_s4 + $0x160] sm:$0xf] }
 0x1f3   :  { %3414 = vmatpush.bf16.msra.mxu3 %v6530_v53  ;;  %3440 = vmatpush.bf16.msrb.mxu1 %v6786_v13  ;;  %v8724_v53 = vld [vmem:[%s13715_s5 + $0x40c] sm:$0xf]  ;;  %v8369_v13 = vld [vmem:[%s13716_s4 + $0xec] sm:$0xf0]  ;;  %v6879_v37 = vld [vmem:[%s13715_s5 + $0x698] sm:$0xf0] }
 0x1f4   :  { %v6562_v26 = vor.u32 %v8724_v53, %v6559_v9  ;;  %v7174_v12 = vor.u32 %v8369_v13, %v7173_v49  ;;  %v7039_v53 = vld [vmem:[%s13715_s5 + $0x7d8] sm:$0xf0]  ;;  %v7285_v9 = vld [vmem:[%s13716_s4 + $0x1c0] sm:$0xf]  ;;  %v8357_v49 = vld [vmem:[%s13716_s4 + $0x8c] sm:$0xf0]  ;;  %v6898_v13 = vor.u32 %v8808_v30, %v6895_v21 }
 0x1f5   :  { %3429 = vmatpush.bf16.msrb.mxu0 %v6626_v40  ;;  %3403 = vmatpush.bf16.msra.mxu2 %v6370_v32  ;;  %v3138_v40 = vpop.f32.mrf.mxu1  ;;  %v3175_v1 = vpop.f32.mrf.mxu0  ;;  %v6927_v32 = vld [vmem:[%s13715_s5 + $0x6f8] sm:$0xf0]  ;;  %v8832_v60 = vld [vmem:[%s13715_s5 + $0x76c] sm:$0xf] }
 0x1f6   :  { %v6930_v8 = vor.u32 %v8816_v42, %v6927_v32  ;;  %v8393_v32 = vld [vmem:[%s13716_s4 + $0x1ac] sm:$0xf0]  ;;  %v8792_v21 = vld [vmem:[%s13715_s5 + $0x62c] sm:$0xf] }
 0x1f7   :  { %3415 = vmatpush.bf16.msra.mxu3 %v6514_v54  ;;  %3441 = vmatpush.bf16.msrb.mxu1 %v6770_v46  ;;  %v8696_v54 = vld [vmem:[%s13715_s5 + $0x32c] sm:$0xf] }
 0x1f8   :  { %v8760_v46 = vld [vmem:[%s13715_s5 + $0x52c] sm:$0xf]  ;;  %v6450_v17 = vor.u32 %v8696_v54, %v6447_v20  ;;  %v7109_v54 = vld [vmem:[%s13716_s4 + $0x60] sm:$0xf]  ;;  %v8353_v20 = vld [vmem:[%s13716_s4 + $0x6c] sm:$0xf0] }
 0x1f9   :  { %3430 = vmatpush.bf16.msrb.mxu0 %v6610_v33  ;;  %3404 = vmatpush.bf16.msra.mxu2 %v6354_v45  ;;  %v6703_v33 = vld [vmem:[%s13715_s5 + $0x538] sm:$0xf0] }
 0x1fa   :  { %v6911_v45 = vld [vmem:[%s13715_s5 + $0x6d8] sm:$0xf0] }
 0x1fb   :  { %3416 = vmatpush.bf16.msra.mxu3 %v6498_v38  ;;  %3442 = vmatpush.bf16.msrb.mxu1 %v6754_v62  ;;  %v6706_v38 = vor.u32 %v8760_v46, %v6703_v33  ;;  %v7158_v62 = vor.u32 %v8365_v16, %v7157_v6  ;;  %v6863_v6 = vld [vmem:[%s13715_s5 + $0x678] sm:$0xf0] }
 0x1fd   :  { %3431 = vmatpush.bf16.msrb.mxu0 %v6594_v35  ;;  %3405 = vmatpush.bf16.msra.mxu2 %v6338_v18  ;;  %v8848_v35 = vld [vmem:[%s13715_s5 + $0x7ec] sm:$0xf]  ;;  %v3188_v2 = vpop.f32.mrf.mxu1  ;;  %v6914_v18 = vor.u32 %v8812_v29, %v6911_v45  ;;  %v3177_v19 = vpop.f32.mrf.mxu0  ;;  %v7253_v29 = vld [vmem:[%s13716_s4 + $0x180] sm:$0xf]  ;;  %v8389_v45 = vld [vmem:[%s13716_s4 + $0x18c] sm:$0xf0] }
 0x1fe   :  { %v11858_v4 = vadd.f32 %v3188_v2, %v3175_v1  ;;  %v8840_v1 = vld [vmem:[%s13715_s5 + $0x7ac] sm:$0xf]  ;;  %v7254_v51 = vor.u32 %v8389_v45, %v7253_v29  ;;  %v8385_v2 = vld [vmem:[%s13716_s4 + $0x16c] sm:$0xf0]  ;;  %v7669_v29 = vld [vmem:[%s13716_s4 + $0x4c0] sm:$0xf] }
 0x1ff   :  { %3417 = vmatpush.bf16.msra.mxu3 %v6482_v7  ;;  %3443 = vmatpush.bf16.msrb.mxu1 %v6738_v27  ;;  %v6434_v7 = vor.u32 %v8692_v34, %v6431_v24  ;;  %v6690_v27 = vor.u32 %v8756_v36, %v6687_v58  ;;  %v7093_v34 = vld [vmem:[%s13716_s4 + $0x40] sm:$0xf]  ;;  %v8493_v45 = vld [vmem:[%s13716_s4 + $0x4cc] sm:$0xf0] }
 0x201   :  { %3432 = vmatpush.bf16.msrb.mxu0 %v6578_v3  ;;  %3406 = vmatpush.bf16.msra.mxu2 %v6322_v41  ;;  %v7058_v3 = vor.u32 %v8848_v35, %v7055_v43  ;;  %v8397_v41 = vld [vmem:[%s13716_s4 + $0x1cc] sm:$0xf0]  ;;  %v8796_v35 = vld [vmem:[%s13715_s5 + $0x64c] sm:$0xf]  ;;  %v6847_v43 = vld [vmem:[%s13715_s5 + $0x658] sm:$0xf0] }
 0x202   :  { %v7286_v10 = vor.u32 %v8397_v41, %v7285_v9  ;;  %v6975_v9 = vld [vmem:[%s13715_s5 + $0x758] sm:$0xf0]  ;;  %v7221_v41 = vld [vmem:[%s13716_s4 + $0x140] sm:$0xf] }
 0x203   :  { %3418 = vmatpush.bf16.msra.mxu3 %v6466_v11  ;;  %3444 = vmatpush.bf16.msrb.mxu1 %v6722_v39  ;;  %v8804_v11 = vld [vmem:[%s13715_s5 + $0x68c] sm:$0xf]  ;;  %v7023_v39 = vld [vmem:[%s13715_s5 + $0x7b8] sm:$0xf0] }
 0x204   :  { %v6882_v46 = vor.u32 %v8804_v11, %v6879_v37 }
 0x205   :  { %3433 = vmatpush.bf16.msrb.mxu0 %v6562_v26  ;;  %3407 = vmatpush.bf16.msra.mxu2 %v6306_v63  ;;  %v7269_v26 = vld [vmem:[%s13716_s4 + $0x1a0] sm:$0xf]  ;;  %v11912_v33 = vpop.f32.mrf.mxu0  ;;  %v8800_v63 = vld [vmem:[%s13715_s5 + $0x66c] sm:$0xf] }
 0x206   :  { %v7270_v16 = vor.u32 %v8393_v32, %v7269_v26  ;;  %v6866_v36 = vor.u32 %v8800_v63, %v6863_v6  ;;  %v8788_v26 = vld [vmem:[%s13715_s5 + $0x60c] sm:$0xf]  ;;  %v6815_v32 = vld [vmem:[%s13715_s5 + $0x618] sm:$0xf0] }
 0x207   :  { %3419 = vmatpush.bf16.msra.mxu3 %v6450_v17  ;;  %3445 = vmatpush.bf16.msrb.mxu1 %v6706_v38  ;;  %v7007_v17 = vld [vmem:[%s13715_s5 + $0x798] sm:$0xf0]  ;;  %v8349_v38 = vld [vmem:[%s13716_s4 + $0x4c] sm:$0xf0] }
 0x208   :  { %3434 = vmatmul.bf16.vlgmr.msrb.gmra.mxu0 %v10905_v23  ;;  %3408 = vmatmul.bf16.vlgmr.msra.gmra.mxu2 %v10766_v31  ;;  %v8844_v23 = vld [vmem:[%s13715_s5 + $0x7cc] sm:$0xf]  ;;  %v7125_v31 = vld [vmem:[%s13716_s4 + $0x80] sm:$0xf]  ;;  %v7094_v55 = vor.u32 %v8349_v38, %v7093_v34  ;;  %v6959_v63 = vld [vmem:[%s13715_s5 + $0x738] sm:$0xf0] }
 0x209   :  { %4758 = vmatpush.bf16.msra.mxu0 %v7174_v12  ;;  %3452 = vmatpush.bf16.msrb.mxu2 %v6930_v8  ;;  %v7042_v40 = vor.u32 %v8844_v23, %v7039_v53  ;;  %v7126_v42 = vor.u32 %v8357_v49, %v7125_v31  ;;  %v3190_v12 = vpop.f32.mrf.mxu1  ;;  %v7110_v8 = vor.u32 %v8353_v20, %v7109_v54  ;;  %v8828_v53 = vld [vmem:[%s13715_s5 + $0x74c] sm:$0xf]  ;;  %v8381_v49 = vld [vmem:[%s13716_s4 + $0x14c] sm:$0xf0]  ;;  %v7429_v54 = vld [vmem:[%s13716_s4 + $0x2e0] sm:$0xf] }
 0x20a   :  { %v7222_v20 = vor.u32 %v8381_v49, %v7221_v41  ;;  %v8461_v49 = vld [vmem:[%s13716_s4 + $0x3cc] sm:$0xf0] }
 0x20b   :  { %3420 = vmatpush.bf16.msra.mxu3 %v6434_v7  ;;  %3446 = vmatpush.bf16.msrb.mxu1 %v6690_v27  ;;  %v3149_v24 = vpop.f32.mrf.mxu2  ;;  %v8345_v7 = vld [vmem:[%s13716_s4 + $0x2c] sm:$0xf0]  ;;  %v6850_v27 = vor.u32 %v8796_v35, %v6847_v43  ;;  %v6943_v35 = vld [vmem:[%s13715_s5 + $0x718] sm:$0xf0]  ;;  %v7189_v43 = vld [vmem:[%s13716_s4 + $0x100] sm:$0xf] }
 0x20c   :  { %v3150_v58 = vadd.f32 %v3149_v24, %v11742_v56  ;;  %v6991_v56 = vld [vmem:[%s13715_s5 + $0x778] sm:$0xf0]  ;;  %v7413_v24 = vld [vmem:[%s13716_s4 + $0x2c0] sm:$0xf] }
 0x20d   :  { %4759 = vmatpush.bf16.msra.mxu0 %v7158_v62  ;;  %3453 = vmatpush.bf16.msrb.mxu2 %v6914_v18  ;;  %v7077_v18 = vld [vmem:[%s13716_s4 + $0x20] sm:$0xf]  ;;  %v6994_v30 = vor.u32 %v8832_v60, %v6991_v56  ;;  %v7670_v60 = vor.u32 %v8493_v45, %v7669_v29  ;;  %v8417_v45 = vld [vmem:[%s13716_s4 + $0x26c] sm:$0xf0] }
 0x20e   :  { %3421 = vmatmul.bf16.vlgmr.msra.gmra.mxu3 %v10816_v57  ;;  %3447 = vmatmul.bf16.vlgmr.msrb.gmra.mxu1 %v10937_v22  ;;  %v7026_v57 = vor.u32 %v8840_v1, %v7023_v39  ;;  %v8836_v22 = vld [vmem:[%s13715_s5 + $0x78c] sm:$0xf]  ;;  %v7078_v23 = vor.u32 %v8345_v7, %v7077_v18  ;;  %v8497_v1 = vld [vmem:[%s13716_s4 + $0x4ec] sm:$0xf0]  ;;  %v6978_v39 = vor.u32 %v8828_v53, %v6975_v9  ;;  %v7557_v56 = vld [vmem:[%s13716_s4 + $0x3e0] sm:$0xf] }
 0x20f   :  { %3465 = vmatpush.bf16.msrb.mxu3 %v7058_v3  ;;  %4771 = vmatpush.bf16.msra.mxu1 %v7302_v47  ;;  %v7010_v62 = vor.u32 %v8836_v22, %v7007_v17  ;;  %v3229_v3 = vpop.f32.mrf.mxu0  ;;  %v6831_v47 = vld [vmem:[%s13715_s5 + $0x638] sm:$0xf0]  ;;  %v6818_v17 = vor.u32 %v8788_v26, %v6815_v32  ;;  %v12056_v18 = vpack.c.bf16 %v10186_v14, %v10186_v14  ;;  %v8529_v7 = vld [vmem:[%s13716_s4 + $0x5ec] sm:$0xf0]  ;;  %v7397_v53 = vld [vmem:[%s13716_s4 + $0x2a0] sm:$0xf] }
 0x210   :  { %v8489_v3 = vld [vmem:[%s13716_s4 + $0x4ac] sm:$0xf0]  ;;  %v12102_v26 = vpack.c.bf16 %v10195_v59, %v10195_v59  ;;  %v7365_v29 = vld [vmem:[%s13716_s4 + $0x260] sm:$0xf] }
 0x211   :  { %4760 = vmatpush.bf16.msra.mxu0 %v7142_v15  ;;  %3454 = vmatpush.bf16.msrb.mxu2 %v6898_v13  ;;  %v11963_v19 = vpop.f32.mrf.mxu1  ;;  %v7238_v15 = vor.u32 %v8385_v2, %v7237_v61  ;;  %v3162_v31 = vpop.f32.mrf.mxu3  ;;  %v7061_v13 = vld [vmem:[%s13716_s4] sm:$0xf]  ;;  %v8465_v61 = vld [vmem:[%s13716_s4 + $0x3ec] sm:$0xf0] }
 0x212   :  { %v11989_v11 = vadd.f32 %v3162_v31, %v3150_v58  ;;  %v8820_v58 = vld [vmem:[%s13715_s5 + $0x70c] sm:$0xf]  ;;  %v7813_v2 = vld [vmem:[%s13716_s4 + $0x5e0] sm:$0xf]  ;;  %v8425_v9 = vld [vmem:[%s13716_s4 + $0x2ac] sm:$0xf0] }
 0x213   :  { %3466 = vmatpush.bf16.msrb.mxu3 %v7042_v40  ;;  %4772 = vmatpush.bf16.msra.mxu1 %v7286_v10  ;;  %v8341_v40 = vld [vmem:[%s13716_s4 + $0xc] sm:$0xf0]  ;;  %v3151_v37 = vpop.f32.mrf.mxu2  ;;  %v6834_v10 = vor.u32 %v8792_v21, %v6831_v47  ;;  %v6946_v47 = vor.u32 %v8820_v58, %v6943_v35  ;;  %v7814_v41 = vor.u32 %v8529_v7, %v7813_v2  ;;  %v7765_v58 = vld [vmem:[%s13716_s4 + $0x580] sm:$0xf] }
 0x214   :  { %v7062_v12 = vor.u32 %v8341_v40, %v7061_v13  ;;  %v7797_v13 = vld [vmem:[%s13716_s4 + $0x5c0] sm:$0xf]  ;;  %v8525_v40 = vld [vmem:[%s13716_s4 + $0x5cc] sm:$0xf0] }
 0x215   :  { %4761 = vmatpush.bf16.msra.mxu0 %v7126_v42  ;;  %3455 = vmatpush.bf16.msrb.mxu2 %v6882_v46  ;;  %v7685_v42 = vld [vmem:[%s13716_s4 + $0x4e0] sm:$0xf]  ;;  %v8433_v46 = vld [vmem:[%s13716_s4 + $0x2ec] sm:$0xf0] }
 0x216   :  { %v7686_v6 = vor.u32 %v8497_v1, %v7685_v42  ;;  %v7430_v34 = vor.u32 %v8433_v46, %v7429_v54  ;;  %v8485_v37 = vld [vmem:[%s13716_s4 + $0x48c] sm:$0xf0]  ;;  %v7381_v1 = vld [vmem:[%s13716_s4 + $0x280] sm:$0xf]  ;;  %v7798_v54 = vor.u32 %v8525_v40, %v7797_v13 }
 0x217   :  { %3467 = vmatpush.bf16.msrb.mxu3 %v7026_v57  ;;  %4773 = vmatpush.bf16.msra.mxu1 %v7270_v16  ;;  %v8824_v57 = vld [vmem:[%s13715_s5 + $0x72c] sm:$0xf]  ;;  %v7205_v16 = vld [vmem:[%s13716_s4 + $0x120] sm:$0xf]  ;;  %v8457_v46 = vld [vmem:[%s13716_s4 + $0x3ac] sm:$0xf0] }
 0x218   :  { %v6962_v38 = vor.u32 %v8824_v57, %v6959_v63  ;;  %v7781_v57 = vld [vmem:[%s13716_s4 + $0x5a0] sm:$0xf]  ;;  %v8521_v59 = vld [vmem:[%s13716_s4 + $0x5ac] sm:$0xf0] }
 0x219   :  { %4762 = vmatpush.bf16.msra.mxu0 %v7110_v8  ;;  %3456 = vmatpush.bf16.msrb.mxu2 %v6866_v36  ;;  %v8377_v8 = vld [vmem:[%s13716_s4 + $0x12c] sm:$0xf0]  ;;  %v3242_v22 = vpop.f32.mrf.mxu1 }
 0x21a   :  { %v8429_v36 = vld [vmem:[%s13716_s4 + $0x2cc] sm:$0xf0] }
 0x21b   :  { %3468 = vmatpush.bf16.msrb.mxu3 %v7010_v62  ;;  %4774 = vmatpush.bf16.msra.mxu1 %v7254_v51  ;;  %v7206_v62 = vor.u32 %v8377_v8, %v7205_v16  ;;  %v8373_v51 = vld [vmem:[%s13716_s4 + $0x10c] sm:$0xf0]  ;;  %v7414_v21 = vor.u32 %v8429_v36, %v7413_v24  ;;  %v7509_v36 = vld [vmem:[%s13716_s4 + $0x380] sm:$0xf] }
 0x21c   :  { %v8481_v16 = vld [vmem:[%s13716_s4 + $0x46c] sm:$0xf0] }
 0x21d   :  { %4763 = vmatpush.bf16.msra.mxu0 %v7094_v55  ;;  %3457 = vmatpush.bf16.msrb.mxu2 %v6850_v27  ;;  %v3164_v55 = vpop.f32.mrf.mxu3  ;;  %v7653_v27 = vld [vmem:[%s13716_s4 + $0x4a0] sm:$0xf]  ;;  %v8517_v35 = vld [vmem:[%s13716_s4 + $0x58c] sm:$0xf0] }
 0x21e   :  { %v7654_v31 = vor.u32 %v8489_v3, %v7653_v27  ;;  %v7366_v55 = vor.u32 %v8417_v45, %v7365_v29  ;;  %v7766_v2 = vor.u32 %v8517_v35, %v7765_v58  ;;  %v7493_v27 = vld [vmem:[%s13716_s4 + $0x360] sm:$0xf]  ;;  %v8449_v3 = vld [vmem:[%s13716_s4 + $0x36c] sm:$0xf0]  ;;  %v8363_v58 = vld [vmem:[%s13716_s4 + $0xc4] sm:$0xf] }
 0x21f   :  { %3469 = vmatpush.bf16.msrb.mxu3 %v6994_v30  ;;  %4775 = vmatpush.bf16.msra.mxu1 %v7238_v15  ;;  %v3201_v30 = vpop.f32.mrf.mxu2  ;;  %v7190_v15 = vor.u32 %v8373_v51, %v7189_v43  ;;  %v7605_v43 = vld [vmem:[%s13716_s4 + $0x440] sm:$0xf]  ;;  %v8477_v51 = vld [vmem:[%s13716_s4 + $0x44c] sm:$0xf0] }
 0x220   :  { %v3202_v14 = vadd.f32 %v3201_v30, %v11858_v4  ;;  %v7541_v4 = vld [vmem:[%s13716_s4 + $0x3c0] sm:$0xf]  ;;  %v7606_v7 = vor.u32 %v8477_v51, %v7605_v43 }
 0x221   :  { %4764 = vmatpush.bf16.msra.mxu0 %v7078_v23  ;;  %3458 = vmatpush.bf16.msrb.mxu2 %v6834_v10  ;;  %v7558_v23 = vor.u32 %v8465_v61, %v7557_v56  ;;  %v7398_v10 = vor.u32 %v8425_v9, %v7397_v53  ;;  %v7542_v42 = vor.u32 %v8461_v49, %v7541_v4  ;;  %v8413_v56 = vld [vmem:[%s13716_s4 + $0x24c] sm:$0xf0]  ;;  %v7749_v30 = vld [vmem:[%s13716_s4 + $0x560] sm:$0xf] }
 0x222   :  { %v7333_v4 = vld [vmem:[%s13716_s4 + $0x220] sm:$0xf]  ;;  %v8409_v49 = vld [vmem:[%s13716_s4 + $0x22c] sm:$0xf0] }
 0x223   :  { %3470 = vmatpush.bf16.msrb.mxu3 %v6978_v39  ;;  %4776 = vmatpush.bf16.msra.mxu1 %v7222_v20  ;;  %v8421_v39 = vld [vmem:[%s13716_s4 + $0x28c] sm:$0xf0]  ;;  %v7717_v45 = vld [vmem:[%s13716_s4 + $0x520] sm:$0xf] }
 0x224   :  { %v7382_v22 = vor.u32 %v8421_v39, %v7381_v1  ;;  %v8509_v1 = vld [vmem:[%s13716_s4 + $0x54c] sm:$0xf0]  ;;  %v7573_v39 = vld [vmem:[%s13716_s4 + $0x400] sm:$0xf] }
 0x225   :  { %4765 = vmatpush.bf16.msra.mxu0 %v7062_v12  ;;  %3459 = vmatpush.bf16.msrb.mxu2 %v6818_v17  ;;  %v3214_v32 = vpop.f32.mrf.mxu3  ;;  %v7525_v12 = vld [vmem:[%s13716_s4 + $0x3a0] sm:$0xf] }
 0x226   :  { %v3215_v63 = vadd.f32 %v3214_v32, %v3202_v14  ;;  %v8473_v14 = vld [vmem:[%s13716_s4 + $0x42c] sm:$0xf0]  ;;  %v7925_v51 = vld [vmem:[%s13716_s4 + $0x6c0] sm:$0xf] }
 0x227   :  { %3471 = vmatpush.bf16.msrb.mxu3 %v6962_v38  ;;  %4777 = vmatpush.bf16.msra.mxu1 %v7206_v62  ;;  %v3203_v8 = vpop.f32.mrf.mxu2  ;;  %v7782_v38 = vor.u32 %v8521_v59, %v7781_v57  ;;  %v8469_v32 = vld [vmem:[%s13716_s4 + $0x40c] sm:$0xf0]  ;;  %v7317_v57 = vld [vmem:[%s13716_s4 + $0x200] sm:$0xf] }
 0x228   :  { %4766 = vmatmul.bf16.vlgmr.msra.gmra.mxu0 %v12056_v18  ;;  %3460 = vmatmul.bf16.vlgmr.msrb.gmra.mxu2 %v11025_v0  ;;  %v7637_v0 = vld [vmem:[%s13716_s4 + $0x480] sm:$0xf]  ;;  %v3228_v17 = vadd.f32 %v11912_v33, %v3215_v63  ;;  %v8453_v33 = vld [vmem:[%s13716_s4 + $0x38c] sm:$0xf0] }
 0x229   :  { %4810 = vmatpush.bf16.msrb.mxu0 %v7686_v6  ;;  %4784 = vmatpush.bf16.msra.mxu2 %v7430_v34  ;;  %v7638_v20 = vor.u32 %v8485_v37, %v7637_v0  ;;  %v7621_v6 = vld [vmem:[%s13716_s4 + $0x460] sm:$0xf]  ;;  %v3279_v34 = vpop.f32.mrf.mxu0  ;;  %v8405_v63 = vld [vmem:[%s13716_s4 + $0x20c] sm:$0xf0] }
 0x22a   :  { %v7622_v24 = vor.u32 %v8481_v16, %v7621_v6  ;;  %v3241_v62 = vadd.f32 %v11963_v19, %v3228_v17  ;;  %v7349_v19 = vld [vmem:[%s13716_s4 + $0x240] sm:$0xf]  ;;  %v7574_v16 = vor.u32 %v8469_v32, %v7573_v39  ;;  %v8561_v8 = vld [vmem:[%s13716_s4 + $0x6ec] sm:$0xf0]  ;;  %v7127_v39 = vld [vmem:[%s13716_s4 + $0x90] sm:$0xf0] }
 0x22b   :  { %3472 = vmatpush.bf16.msrb.mxu3 %v6946_v47  ;;  %4778 = vmatpush.bf16.msra.mxu1 %v7190_v15  ;;  %v7589_v47 = vld [vmem:[%s13716_s4 + $0x420] sm:$0xf]  ;;  %v3292_v15 = vpop.f32.mrf.mxu1  ;;  %v7350_v53 = vor.u32 %v8413_v56, %v7349_v19  ;;  %v8441_v17 = vld [vmem:[%s13716_s4 + $0x32c] sm:$0xf0] }
 0x22c   :  { %v12174_v9 = vadd.f32 %v3292_v15, %v3279_v34  ;;  %v7590_v0 = vor.u32 %v8473_v14, %v7589_v47  ;;  %v7477_v37 = vld [vmem:[%s13716_s4 + $0x340] sm:$0xf]  ;;  %v8505_v34 = vld [vmem:[%s13716_s4 + $0x52c] sm:$0xf0]  ;;  %v7303_v47 = vld [vmem:[%s13716_s4 + $0x1f0] sm:$0xf0] }
 0x22d   :  { %4811 = vmatpush.bf16.msrb.mxu0 %v7670_v60  ;;  %4785 = vmatpush.bf16.msra.mxu2 %v7414_v21  ;;  %v7510_v60 = vor.u32 %v8453_v33, %v7509_v36  ;;  %v3216_v61 = vpop.f32.mrf.mxu3  ;;  %v8513_v21 = vld [vmem:[%s13716_s4 + $0x56c] sm:$0xf0]  ;;  %v7941_v59 = vld [vmem:[%s13716_s4 + $0x6e0] sm:$0xf]  ;;  %v7318_v33 = vor.u32 %v8405_v63, %v7317_v57  ;;  %v7718_v19 = vor.u32 %v8505_v34, %v7717_v45  ;;  %v8359_v14 = vld [vmem:[%s13716_s4 + $0xa4] sm:$0xf] }
 0x22e   :  { %3473 = vmatmul.bf16.vlgmr.msrb.gmra.mxu3 %v11076_v44  ;;  %4779 = vmatmul.bf16.vlgmr.msra.gmra.mxu1 %v12102_v26  ;;  %v7526_v44 = vor.u32 %v8457_v46, %v7525_v12  ;;  %v7750_v40 = vor.u32 %v8513_v21, %v7749_v30  ;;  %v7175_v12 = vld [vmem:[%s13716_s4 + $0xf0] sm:$0xf0]  ;;  %v7942_v35 = vor.u32 %v8561_v8, %v7941_v59  ;;  %v8437_v56 = vld [vmem:[%s13716_s4 + $0x30c] sm:$0xf0]  ;;  %v7701_v61 = vld [vmem:[%s13716_s4 + $0x500] sm:$0xf] }
 0x22f   :  { %4797 = vmatpush.bf16.msra.mxu3 %v7558_v23  ;;  %4823 = vmatpush.bf16.msrb.mxu1 %v7814_v41  ;;  %v3253_v23 = vpop.f32.mrf.mxu2  ;;  %v8399_v30 = vld [vmem:[%s13716_s4 + $0x1e4] sm:$0xf]  ;;  %v12267_v21 = vpack.c.bf16 %v10270_v25, %v10270_v25  ;;  %v7143_v15 = vld [vmem:[%s13716_s4 + $0xb0] sm:$0xf0]  ;;  %v12320_v57 = vpack.c.bf16 %v10279_v5, %v10279_v5  ;;  %v8037_v59 = vld [vmem:[%s13716_s4 + $0x7a0] sm:$0xf] }
 0x230   :  { %v3254_v41 = vadd.f32 %v3253_v23, %v3241_v62  ;;  %v7159_v62 = vld [vmem:[%s13716_s4 + $0xd0] sm:$0xf0]  ;;  %v12280_v23 = vpack.c.bf16 %v10224_v50, %v10224_v50  ;;  %v8351_v8 = vld [vmem:[%s13716_s4 + $0x64] sm:$0xf]  ;;  %v8545_v45 = vld [vmem:[%s13716_s4 + $0x66c] sm:$0xf0] }
 0x231   :  { %4812 = vmatpush.bf16.msrb.mxu0 %v7654_v31  ;;  %4786 = vmatpush.bf16.msra.mxu2 %v7398_v10  ;;  %v7494_v31 = vor.u32 %v8449_v3, %v7493_v27  ;;  %v3281_v13 = vpop.f32.mrf.mxu0  ;;  %v8445_v10 = vld [vmem:[%s13716_s4 + $0x34c] sm:$0xf0]  ;;  %v8069_v27 = vld [vmem:[%s13716_s4 + $0x7e0] sm:$0xf]  ;;  %v7271_v5 = vld [vmem:[%s13716_s4 + $0x1b0] sm:$0xf0] }
 0x232   :  { %v7478_v46 = vor.u32 %v8445_v10, %v7477_v37  ;;  %v8593_v3 = vld [vmem:[%s13716_s4 + $0x7ec] sm:$0xf0]  ;;  %v7306_v13 = vor.u32 %v8399_v30, %v7303_v47  ;;  %v8395_v10 = vld [vmem:[%s13716_s4 + $0x1c4] sm:$0xf]  ;;  %v7239_v30 = vld [vmem:[%s13716_s4 + $0x170] sm:$0xf0] }
 0x233   :  { %4798 = vmatpush.bf16.msra.mxu3 %v7542_v42  ;;  %4824 = vmatpush.bf16.msrb.mxu1 %v7798_v54  ;;  %v7733_v42 = vld [vmem:[%s13716_s4 + $0x540] sm:$0xf]  ;;  %v7334_v54 = vor.u32 %v8409_v49, %v7333_v4  ;;  %v8553_v49 = vld [vmem:[%s13716_s4 + $0x6ac] sm:$0xf0]  ;;  %v8343_v47 = vld [vmem:[%s13716_s4 + $0x24] sm:$0xf] }
 0x234   :  { %v7734_v6 = vor.u32 %v8509_v1, %v7733_v42  ;;  %v7909_v4 = vld [vmem:[%s13716_s4 + $0x6a0] sm:$0xf]  ;;  %v8589_v37 = vld [vmem:[%s13716_s4 + $0x7cc] sm:$0xf0]  ;;  %v7287_v42 = vld [vmem:[%s13716_s4 + $0x1d0] sm:$0xf0] }
 0x235   :  { %4813 = vmatpush.bf16.msrb.mxu0 %v7638_v20  ;;  %4787 = vmatpush.bf16.msra.mxu2 %v7382_v22  ;;  %v8367_v20 = vld [vmem:[%s13716_s4 + $0xe4] sm:$0xf]  ;;  %v7461_v22 = vld [vmem:[%s13716_s4 + $0x320] sm:$0xf]  ;;  %v7910_v32 = vor.u32 %v8553_v49, %v7909_v4  ;;  %v7290_v63 = vor.u32 %v8395_v10, %v7287_v42  ;;  %v8537_v49 = vld [vmem:[%s13716_s4 + $0x62c] sm:$0xf0] }
 0x236   :  { %v7178_v29 = vor.u32 %v8367_v20, %v7175_v12  ;;  %v7462_v43 = vor.u32 %v8441_v17, %v7461_v22  ;;  %v8355_v1 = vld [vmem:[%s13716_s4 + $0x84] sm:$0xf]  ;;  %v7893_v12 = vld [vmem:[%s13716_s4 + $0x680] sm:$0xf]  ;;  %v7111_v22 = vld [vmem:[%s13716_s4 + $0x70] sm:$0xf0] }
 0x237   :  { %4799 = vmatpush.bf16.msra.mxu3 %v7526_v44  ;;  %4825 = vmatpush.bf16.msrb.mxu1 %v7782_v38  ;;  %v3266_v44 = vpop.f32.mrf.mxu3  ;;  %v3255_v36 = vpop.f32.mrf.mxu2  ;;  %v7845_v4 = vld [vmem:[%s13716_s4 + $0x620] sm:$0xf]  ;;  %v7223_v10 = vld [vmem:[%s13716_s4 + $0x150] sm:$0xf0]  ;;  %v8339_v42 = vld [vmem:[%s13716_s4 + $0x4] sm:$0xf] }
 0x238   :  { %v12230_v38 = vadd.f32 %v3266_v44, %v3254_v41  ;;  %v7114_v36 = vor.u32 %v8351_v8, %v7111_v22  ;;  %v7973_v8 = vld [vmem:[%s13716_s4 + $0x720] sm:$0xf]  ;;  %v8569_v22 = vld [vmem:[%s13716_s4 + $0x72c] sm:$0xf0] }
 0x239   :  { %4814 = vmatpush.bf16.msrb.mxu0 %v7622_v24  ;;  %4788 = vmatpush.bf16.msra.mxu2 %v7366_v55  ;;  %v3294_v24 = vpop.f32.mrf.mxu1  ;;  %v8557_v55 = vld [vmem:[%s13716_s4 + $0x6cc] sm:$0xf0] }
 0x23a   :  { %v7926_v25 = vor.u32 %v8557_v55, %v7925_v51  ;;  %v7095_v51 = vld [vmem:[%s13716_s4 + $0x50] sm:$0xf0] }
 0x23b   :  { %4800 = vmatpush.bf16.msra.mxu3 %v7510_v60  ;;  %4826 = vmatpush.bf16.msrb.mxu1 %v7766_v2  ;;  %v7445_v60 = vld [vmem:[%s13716_s4 + $0x300] sm:$0xf]  ;;  %v8501_v2 = vld [vmem:[%s13716_s4 + $0x50c] sm:$0xf0] }
 0x23c   :  { %v7702_v41 = vor.u32 %v8501_v2, %v7701_v61 }
 0x23d   :  { %4815 = vmatpush.bf16.msrb.mxu0 %v7606_v7  ;;  %4789 = vmatpush.bf16.msra.mxu2 %v7350_v53  ;;  %v7162_v7 = vor.u32 %v8363_v58, %v7159_v62  ;;  %v7446_v53 = vor.u32 %v8437_v56, %v7445_v60  ;;  %v8581_v58 = vld [vmem:[%s13716_s4 + $0x78c] sm:$0xf0]  ;;  %v8387_v62 = vld [vmem:[%s13716_s4 + $0x184] sm:$0xf] }
 0x23e   :  { %v8541_v56 = vld [vmem:[%s13716_s4 + $0x64c] sm:$0xf0] }
 0x23f   :  { %4801 = vmatpush.bf16.msra.mxu3 %v7494_v31  ;;  %4827 = vmatpush.bf16.msrb.mxu1 %v7750_v40  ;;  %v8070_v31 = vor.u32 %v8593_v3, %v8069_v27  ;;  %v3268_v50 = vpop.f32.mrf.mxu3  ;;  %v7146_v40 = vor.u32 %v8359_v14, %v7143_v15  ;;  %v8577_v27 = vld [vmem:[%s13716_s4 + $0x76c] sm:$0xf0]  ;;  %v8383_v3 = vld [vmem:[%s13716_s4 + $0x164] sm:$0xf]  ;;  %v7079_v14 = vld [vmem:[%s13716_s4 + $0x30] sm:$0xf0] }
 0x241   :  { %4816 = vmatpush.bf16.msrb.mxu0 %v7590_v0  ;;  %4790 = vmatpush.bf16.msra.mxu2 %v7334_v54  ;;  %v8053_v0 = vld [vmem:[%s13716_s4 + $0x7c0] sm:$0xf]  ;;  %v12310_v54 = vpack.c.bf16 %v10233_v28, %v10233_v28  ;;  %v7130_v28 = vor.u32 %v8355_v1, %v7127_v39  ;;  %v7063_v1 = vld [vmem:[%s13716_s4 + $0x10] sm:$0xf0]  ;;  %v7846_v39 = vor.u32 %v8537_v49, %v7845_v4 }
 0x242   :  { %v8054_v20 = vor.u32 %v8589_v37, %v8053_v0  ;;  %v7989_v0 = vld [vmem:[%s13716_s4 + $0x740] sm:$0xf]  ;;  %v8379_v37 = vld [vmem:[%s13716_s4 + $0x144] sm:$0xf] }
 0x243   :  { %4802 = vmatpush.bf16.msra.mxu3 %v7478_v46  ;;  %4828 = vmatpush.bf16.msrb.mxu1 %v7734_v6  ;;  %v8549_v46 = vld [vmem:[%s13716_s4 + $0x68c] sm:$0xf0] }
 0x244   :  { %v8585_v6 = vld [vmem:[%s13716_s4 + $0x7ac] sm:$0xf0]  ;;  %v7894_v17 = vor.u32 %v8549_v46, %v7893_v12  ;;  %v7829_v46 = vld [vmem:[%s13716_s4 + $0x600] sm:$0xf] }
 0x245   :  { %4817 = vmatpush.bf16.msrb.mxu0 %v7574_v16  ;;  %4791 = vmatpush.bf16.msra.mxu2 %v7318_v33  ;;  %v8391_v16 = vld [vmem:[%s13716_s4 + $0x1a4] sm:$0xf]  ;;  %v8038_v44 = vor.u32 %v8585_v6, %v8037_v59  ;;  %v12348_v34 = vpop.f32.mrf.mxu0  ;;  %v8021_v33 = vld [vmem:[%s13716_s4 + $0x780] sm:$0xf]  ;;  %v7226_v6 = vor.u32 %v8379_v37, %v7223_v10  ;;  %v7543_v37 = vld [vmem:[%s13716_s4 + $0x3d0] sm:$0xf0] }
 0x246   :  { %v7274_v24 = vor.u32 %v8391_v16, %v7271_v5  ;;  %v8022_v60 = vor.u32 %v8581_v58, %v8021_v33  ;;  %v7066_v16 = vor.u32 %v8339_v42, %v7063_v1  ;;  %v7431_v5 = vld [vmem:[%s13716_s4 + $0x2f0] sm:$0xf0]  ;;  %v8491_v58 = vld [vmem:[%s13716_s4 + $0x4c4] sm:$0xf] }
 0x247   :  { %4803 = vmatpush.bf16.msra.mxu3 %v7462_v43  ;;  %4829 = vmatpush.bf16.msrb.mxu1 %v7718_v19  ;;  %v8347_v43 = vld [vmem:[%s13716_s4 + $0x44] sm:$0xf]  ;;  %v7861_v19 = vld [vmem:[%s13716_s4 + $0x640] sm:$0xf]  ;;  %v7799_v42 = vld [vmem:[%s13716_s4 + $0x5d0] sm:$0xf0] }
 0x248   :  { %4818 = vmatmul.bf16.vlgmr.msrb.gmra.mxu0 %v12267_v21  ;;  %4792 = vmatmul.bf16.vlgmr.msra.gmra.mxu2 %v12280_v23  ;;  %v7098_v2 = vor.u32 %v8347_v43, %v7095_v51  ;;  %v7974_v51 = vor.u32 %v8569_v22, %v7973_v8  ;;  %v8523_v10 = vld [vmem:[%s13716_s4 + $0x5c4] sm:$0xf]  ;;  %v7623_v22 = vld [vmem:[%s13716_s4 + $0x470] sm:$0xf0] }
 0x249   :  { %4862 = vmatpush.bf16.msra.mxu0 %v7178_v29  ;;  %4836 = vmatpush.bf16.msrb.mxu2 %v7942_v35  ;;  %v7877_v29 = vld [vmem:[%s13716_s4 + $0x660] sm:$0xf]  ;;  %v7255_v35 = vld [vmem:[%s13716_s4 + $0x190] sm:$0xf0]  ;;  %v8483_v1 = vld [vmem:[%s13716_s4 + $0x484] sm:$0xf] }
 0x24a   :  { %v7878_v55 = vor.u32 %v8545_v45, %v7877_v29  ;;  %v7258_v61 = vor.u32 %v8387_v62, %v7255_v35  ;;  %v8375_v29 = vld [vmem:[%s13716_s4 + $0x124] sm:$0xf]  ;;  %v7207_v45 = vld [vmem:[%s13716_s4 + $0x130] sm:$0xf0] }
 0x24b   :  { %4804 = vmatpush.bf16.msra.mxu3 %v7446_v53  ;;  %4830 = vmatpush.bf16.msrb.mxu1 %v7702_v41  ;;  %v3305_v15 = vpop.f32.mrf.mxu2  ;;  %v7862_v53 = vor.u32 %v8541_v56, %v7861_v19  ;;  %v7671_v62 = vld [vmem:[%s13716_s4 + $0x4d0] sm:$0xf0]  ;;  %v7957_v19 = vld [vmem:[%s13716_s4 + $0x700] sm:$0xf]  ;;  %v7210_v56 = vor.u32 %v8375_v29, %v7207_v45  ;;  %v8479_v8 = vld [vmem:[%s13716_s4 + $0x464] sm:$0xf] }
 0x24c   :  { %v3306_v41 = vadd.f32 %v3305_v15, %v12174_v9  ;;  %v8573_v9 = vld [vmem:[%s13716_s4 + $0x74c] sm:$0xf0]  ;;  %v8487_v15 = vld [vmem:[%s13716_s4 + $0x4a4] sm:$0xf]  ;;  %v7367_v45 = vld [vmem:[%s13716_s4 + $0x270] sm:$0xf0] }
 0x24d   :  { %4863 = vmatpush.bf16.msra.mxu0 %v7162_v7  ;;  %4837 = vmatpush.bf16.msrb.mxu2 %v7926_v25  ;;  %v8005_v7 = vld [vmem:[%s13716_s4 + $0x760] sm:$0xf]  ;;  %v12392_v25 = vpop.f32.mrf.mxu1  ;;  %v3333_v50 = vpop.f32.mrf.mxu0  ;;  %v7990_v12 = vor.u32 %v8573_v9, %v7989_v0  ;;  %v8459_v9 = vld [vmem:[%s13716_s4 + $0x3c4] sm:$0xf] }
 0x24e   :  { %4805 = vmatmul.bf16.vlgmr.msra.gmra.mxu3 %v12310_v54  ;;  %4831 = vmatmul.bf16.vlgmr.msrb.gmra.mxu1 %v12320_v57  ;;  %v8415_v29 = vld [vmem:[%s13716_s4 + $0x264] sm:$0xf] }
 0x24f   :  { %4849 = vmatpush.bf16.msrb.mxu3 %v8070_v31  ;;  %4875 = vmatpush.bf16.msra.mxu1 %v7306_v13  ;;  %v8006_v31 = vor.u32 %v8577_v27, %v8005_v7  ;;  %v7242_v13 = vor.u32 %v8383_v3, %v7239_v30  ;;  %v7674_v7 = vor.u32 %v8491_v58, %v7671_v62  ;;  %v8463_v27 = vld [vmem:[%s13716_s4 + $0x3e4] sm:$0xf]  ;;  %v7559_v3 = vld [vmem:[%s13716_s4 + $0x3f0] sm:$0xf0] }
 0x250   :  { %v8527_v30 = vld [vmem:[%s13716_s4 + $0x5e4] sm:$0xf]  ;;  %v7562_v50 = vor.u32 %v8463_v27, %v7559_v3  ;;  %v7511_v62 = vld [vmem:[%s13716_s4 + $0x390] sm:$0xf0] }
 0x251   :  { %4864 = vmatpush.bf16.msra.mxu0 %v7146_v40  ;;  %4838 = vmatpush.bf16.msrb.mxu2 %v7910_v32  ;;  %v7082_v40 = vor.u32 %v8343_v47, %v7079_v14  ;;  %v8495_v32 = vld [vmem:[%s13716_s4 + $0x4e4] sm:$0xf]  ;;  %v3318_v59 = vpop.f32.mrf.mxu3  ;;  %v7815_v14 = vld [vmem:[%s13716_s4 + $0x5f0] sm:$0xf0] }
 0x252   :  { %v8451_v58 = vld [vmem:[%s13716_s4 + $0x384] sm:$0xf]  ;;  %v7495_v27 = vld [vmem:[%s13716_s4 + $0x370] sm:$0xf0] }
 0x253   :  { %4850 = vmatpush.bf16.msrb.mxu3 %v8054_v20  ;;  %4876 = vmatpush.bf16.msra.mxu1 %v7290_v63  ;;  %v7687_v20 = vld [vmem:[%s13716_s4 + $0x4f0] sm:$0xf0]  ;;  %v8533_v63 = vld [vmem:[%s13716_s4 + $0x60c] sm:$0xf0]  ;;  %v8511_v3 = vld [vmem:[%s13716_s4 + $0x564] sm:$0xf] }
 0x254   :  { %v7830_v33 = vor.u32 %v8533_v63, %v7829_v46  ;;  %v8419_v46 = vld [vmem:[%s13716_s4 + $0x284] sm:$0xf]  ;;  %v7383_v63 = vld [vmem:[%s13716_s4 + $0x290] sm:$0xf0] }
 0x255   :  { %4865 = vmatpush.bf16.msra.mxu0 %v7130_v28  ;;  %4839 = vmatpush.bf16.msrb.mxu2 %v7894_v17  ;;  %v8431_v28 = vld [vmem:[%s13716_s4 + $0x2e4] sm:$0xf]  ;;  %v3319_v17 = vadd.f32 %v3318_v59, %v3306_v41  ;;  %v12497_v41 = vpack.c.bf16 %v10394_v52, %v10394_v52  ;;  %v7818_v52 = vor.u32 %v8527_v30, %v7815_v14  ;;  %v7751_v30 = vld [vmem:[%s13716_s4 + $0x570] sm:$0xf0] }
 0x256   :  { %v7434_v43 = vor.u32 %v8431_v28, %v7431_v5  ;;  %v7802_v28 = vor.u32 %v8523_v10, %v7799_v42  ;;  %v7783_v5 = vld [vmem:[%s13716_s4 + $0x5b0] sm:$0xf0]  ;;  %v8471_v14 = vld [vmem:[%s13716_s4 + $0x424] sm:$0xf] }
 0x257   :  { %4851 = vmatpush.bf16.msrb.mxu3 %v8038_v44  ;;  %4877 = vmatpush.bf16.msra.mxu1 %v7274_v24  ;;  %v7690_v44 = vor.u32 %v8495_v32, %v7687_v20  ;;  %v3307_v24 = vpop.f32.mrf.mxu2  ;;  %v3332_v35 = vadd.f32 %v12348_v34, %v3319_v17  ;;  %v8565_v34 = vld [vmem:[%s13716_s4 + $0x70c] sm:$0xf0]  ;;  %v12527_v20 = vpack.c.bf16 %v10422_v48, %v10422_v48  ;;  %v8455_v48 = vld [vmem:[%s13716_s4 + $0x3a4] sm:$0xf]  ;;  %v7479_v10 = vld [vmem:[%s13716_s4 + $0x350] sm:$0xf0] }
 0x258   :  { %v7386_v17 = vor.u32 %v8419_v46, %v7383_v63  ;;  %v8507_v42 = vld [vmem:[%s13716_s4 + $0x544] sm:$0xf]  ;;  %v8370_v46 = vld [vmem:[%s13716_s4 + $0xf4] sm:$0xf0] }
 0x259   :  { %4866 = vmatpush.bf16.msra.mxu0 %v7114_v36  ;;  %4840 = vmatpush.bf16.msrb.mxu2 %v7878_v55  ;;  %v3346_v36 = vpop.f32.mrf.mxu1  ;;  %v8427_v55 = vld [vmem:[%s13716_s4 + $0x2c4] sm:$0xf]  ;;  %v12484_v47 = vadd.f32 %v12392_v25, %v3332_v35  ;;  %v3320_v4 = vpop.f32.mrf.mxu3 }
 0x25a   :  { %v8515_v35 = vld [vmem:[%s13716_s4 + $0x584] sm:$0xf] }
 0x25b   :  { %4852 = vmatpush.bf16.msrb.mxu3 %v8022_v60  ;;  %4878 = vmatpush.bf16.msra.mxu1 %v7258_v61  ;;  %v7415_v60 = vld [vmem:[%s13716_s4 + $0x2d0] sm:$0xf0]  ;;  %v8371_v61 = vld [vmem:[%s13716_s4 + $0x104] sm:$0xf] }
 0x25c   :  { %v7418_v25 = vor.u32 %v8427_v55, %v7415_v60  ;;  %v7607_v55 = vld [vmem:[%s13716_s4 + $0x450] sm:$0xf0]  ;;  %v7370_v60 = vor.u32 %v8415_v29, %v7367_v45  ;;  %v8503_v45 = vld [vmem:[%s13716_s4 + $0x524] sm:$0xf] }
 0x25d   :  { %4867 = vmatpush.bf16.msra.mxu0 %v7098_v2  ;;  %4841 = vmatpush.bf16.msrb.mxu2 %v7862_v53  ;;  %v7191_v2 = vld [vmem:[%s13716_s4 + $0x110] sm:$0xf0] }
 0x25e   :  { %v7655_v53 = vld [vmem:[%s13716_s4 + $0x4b0] sm:$0xf0]  ;;  %v7194_v49 = vor.u32 %v8371_v61, %v7191_v2  ;;  %v8447_v61 = vld [vmem:[%s13716_s4 + $0x364] sm:$0xf] }
 0x25f   :  { %4853 = vmatpush.bf16.msrb.mxu3 %v8006_v31  ;;  %4879 = vmatpush.bf16.msra.mxu1 %v7242_v13  ;;  %v7958_v31 = vor.u32 %v8565_v34, %v7957_v19  ;;  %v8423_v13 = vld [vmem:[%s13716_s4 + $0x2a4] sm:$0xf]  ;;  %v7658_v0 = vor.u32 %v8487_v15, %v7655_v53  ;;  %v7514_v19 = vor.u32 %v8451_v58, %v7511_v62  ;;  %v7351_v34 = vld [vmem:[%s13716_s4 + $0x250] sm:$0xf0]  ;;  %v8366_v58 = vld [vmem:[%s13716_s4 + $0xd4] sm:$0xf0] }
 0x260   :  { %v7591_v15 = vld [vmem:[%s13716_s4 + $0x430] sm:$0xf0]  ;;  %v7498_v4 = vor.u32 %v8447_v61, %v7495_v27  ;;  %v8499_v61 = vld [vmem:[%s13716_s4 + $0x504] sm:$0xf] }
 0x261   :  { %4868 = vmatpush.bf16.msra.mxu0 %v7082_v40  ;;  %4842 = vmatpush.bf16.msrb.mxu2 %v7846_v39  ;;  %v7399_v40 = vld [vmem:[%s13716_s4 + $0x2b0] sm:$0xf0]  ;;  %v8591_v27 = vld [vmem:[%s13716_s4 + $0x7e4] sm:$0xf] }
 0x262   :  { %v7639_v39 = vld [vmem:[%s13716_s4 + $0x490] sm:$0xf0]  ;;  %v7402_v32 = vor.u32 %v8423_v13, %v7399_v40 }
 0x263   :  { %4854 = vmatpush.bf16.msrb.mxu3 %v7990_v12  ;;  %4880 = vmatpush.bf16.msra.mxu1 %v7226_v6  ;;  %v7546_v12 = vor.u32 %v8459_v9, %v7543_v37  ;;  %v7642_v59 = vor.u32 %v8483_v1, %v7639_v39  ;;  %v7527_v6 = vld [vmem:[%s13716_s4 + $0x3b0] sm:$0xf0]  ;;  %v7594_v9 = vor.u32 %v8471_v14, %v7591_v15  ;;  %v8443_v37 = vld [vmem:[%s13716_s4 + $0x344] sm:$0xf]  ;;  %v8402_v14 = vld [vmem:[%s13716_s4 + $0x1f4] sm:$0xf0] }
 0x264   :  { %v7335_v13 = vld [vmem:[%s13716_s4 + $0x230] sm:$0xf0]  ;;  %v8467_v1 = vld [vmem:[%s13716_s4 + $0x404] sm:$0xf]  ;;  %v7482_v63 = vor.u32 %v8443_v37, %v7479_v10  ;;  %v7149_v15 = vld [vmem:[%s13716_s4 + $0xa8] sm:$0xf] }
 0x265   :  { %4869 = vmatpush.bf16.msra.mxu0 %v7066_v16  ;;  %4843 = vmatpush.bf16.msrb.mxu2 %v7830_v33  ;;  %v8519_v16 = vld [vmem:[%s13716_s4 + $0x5a4] sm:$0xf]  ;;  %v3383_v24 = vpop.f32.mrf.mxu0  ;;  %v7626_v33 = vor.u32 %v8479_v8, %v7623_v22  ;;  %v7575_v39 = vld [vmem:[%s13716_s4 + $0x410] sm:$0xf0] }
 0x266   :  { %v7786_v36 = vor.u32 %v8519_v16, %v7783_v5  ;;  %v7578_v5 = vor.u32 %v8467_v1, %v7575_v39  ;;  %v7943_v8 = vld [vmem:[%s13716_s4 + $0x6f0] sm:$0xf0]  ;;  %v8439_v22 = vld [vmem:[%s13716_s4 + $0x324] sm:$0xf]  ;;  %v7133_v1 = vld [vmem:[%s13716_s4 + $0x88] sm:$0xf] }
 0x267   :  { %4855 = vmatpush.bf16.msrb.mxu3 %v7974_v51  ;;  %4881 = vmatpush.bf16.msra.mxu1 %v7210_v56  ;;  %v8475_v51 = vld [vmem:[%s13716_s4 + $0x444] sm:$0xf]  ;;  %v8055_v10 = vld [vmem:[%s13716_s4 + $0x7d0] sm:$0xf0]  ;;  %v8358_v39 = vld [vmem:[%s13716_s4 + $0x94] sm:$0xf0] }
 0x268   :  { %4870 = vmatmul.bf16.vlgmr.msra.gmra.mxu0 %v12056_v18  ;;  %4844 = vmatmul.bf16.vlgmr.msrb.gmra.mxu2 %v12497_v41  ;;  %v8411_v56 = vld [vmem:[%s13716_s4 + $0x244] sm:$0xf] }
 0x269   :  { %4914 = vmatpush.bf16.msrb.mxu0 %v7690_v44  ;;  %4888 = vmatpush.bf16.msra.mxu2 %v7434_v43  ;;  %v7530_v44 = vor.u32 %v8455_v48, %v7527_v6  ;;  %v7767_v43 = vld [vmem:[%s13716_s4 + $0x590] sm:$0xf0]  ;;  %v7354_v53 = vor.u32 %v8411_v56, %v7351_v34  ;;  %v8559_v48 = vld [vmem:[%s13716_s4 + $0x6e4] sm:$0xf] }
 0x26a   :  { %v7770_v2 = vor.u32 %v8515_v35, %v7767_v43  ;;  %v7946_v43 = vor.u32 %v8559_v48, %v7943_v8  ;;  %v7447_v34 = vld [vmem:[%s13716_s4 + $0x310] sm:$0xf0]  ;;  %v8587_v37 = vld [vmem:[%s13716_s4 + $0x7c4] sm:$0xf]  ;;  %v7117_v8 = vld [vmem:[%s13716_s4 + $0x68] sm:$0xf] }
 0x26b   :  { %4856 = vmatpush.bf16.msrb.mxu3 %v7958_v31  ;;  %4882 = vmatpush.bf16.msra.mxu1 %v7194_v49  ;;  %v3396_v31 = vpop.f32.mrf.mxu1  ;;  %v7754_v49 = vor.u32 %v8511_v3, %v7751_v30  ;;  %v8071_v3 = vld [vmem:[%s13716_s4 + $0x7f0] sm:$0xf0]  ;;  %v7309_v30 = vld [vmem:[%s13716_s4 + $0x1e8] sm:$0xf]  ;;  %v8583_v48 = vld [vmem:[%s13716_s4 + $0x7a4] sm:$0xf] }
 0x26d   :  { %4915 = vmatpush.bf16.msrb.mxu0 %v7674_v7  ;;  %4889 = vmatpush.bf16.msra.mxu2 %v7418_v25  ;;  %v7610_v7 = vor.u32 %v8475_v51, %v7607_v55  ;;  %v3357_v25 = vpop.f32.mrf.mxu2  ;;  %v8555_v55 = vld [vmem:[%s13716_s4 + $0x6c4] sm:$0xf] }
 0x26e   :  { %4857 = vmatmul.bf16.vlgmr.msrb.gmra.mxu3 %v12527_v20  ;;  %4883 = vmatmul.bf16.vlgmr.msra.gmra.mxu1 %v12102_v26  ;;  %v3358_v40 = vadd.f32 %v3357_v25, %v12484_v47  ;;  %v7735_v47 = vld [vmem:[%s13716_s4 + $0x550] sm:$0xf0] }
 0x26f   :  { %4901 = vmatpush.bf16.msra.mxu3 %v7562_v50  ;;  %4927 = vmatpush.bf16.msrb.mxu1 %v7818_v52  ;;  %v8407_v50 = vld [vmem:[%s13716_s4 + $0x224] sm:$0xf]  ;;  %v12610_v52 = vadd.f32 %v3396_v31, %v3383_v24  ;;  %v7738_v16 = vor.u32 %v8507_v42, %v7735_v47  ;;  %v7719_v24 = vld [vmem:[%s13716_s4 + $0x530] sm:$0xf0]  ;;  %v7293_v42 = vld [vmem:[%s13716_s4 + $0x1c8] sm:$0xf] }
 0x270   :  { %v7722_v56 = vor.u32 %v8503_v45, %v7719_v24  ;;  %v8398_v47 = vld [vmem:[%s13716_s4 + $0x1d4] sm:$0xf0]  ;;  %v8543_v45 = vld [vmem:[%s13716_s4 + $0x664] sm:$0xf]  ;;  %v7879_v24 = vld [vmem:[%s13716_s4 + $0x670] sm:$0xf0] }
 0x271   :  { %4916 = vmatpush.bf16.msrb.mxu0 %v7658_v0  ;;  %4890 = vmatpush.bf16.msra.mxu2 %v7402_v32  ;;  %v3385_v0 = vpop.f32.mrf.mxu0  ;;  %v7338_v32 = vor.u32 %v8407_v50, %v7335_v13  ;;  %v3370_v6 = vpop.f32.mrf.mxu3  ;;  %v8074_v50 = vor.u32 %v8591_v27, %v8071_v3  ;;  %v8551_v13 = vld [vmem:[%s13716_s4 + $0x6a4] sm:$0xf]  ;;  %v8007_v3 = vld [vmem:[%s13716_s4 + $0x770] sm:$0xf0] }
 0x272   :  { %v7310_v0 = vor.u32 %v8402_v14, %v7309_v30  ;;  %v8575_v27 = vld [vmem:[%s13716_s4 + $0x764] sm:$0xf]  ;;  %v7245_v30 = vld [vmem:[%s13716_s4 + $0x168] sm:$0xf]  ;;  %v8386_v14 = vld [vmem:[%s13716_s4 + $0x174] sm:$0xf0] }
 0x273   :  { %4902 = vmatpush.bf16.msra.mxu3 %v7546_v12  ;;  %4928 = vmatpush.bf16.msrb.mxu1 %v7802_v28  ;;  %v7181_v12 = vld [vmem:[%s13716_s4 + $0xe8] sm:$0xf]  ;;  %v8403_v28 = vld [vmem:[%s13716_s4 + $0x204] sm:$0xf]  ;;  %v3398_v35 = vpop.f32.mrf.mxu1 }
 0x274   :  { %v7182_v29 = vor.u32 %v8370_v46, %v7181_v12  ;;  %v8058_v12 = vor.u32 %v8587_v37, %v8055_v10  ;;  %v8547_v46 = vld [vmem:[%s13716_s4 + $0x684] sm:$0xf]  ;;  %v8023_v35 = vld [vmem:[%s13716_s4 + $0x790] sm:$0xf0] }
 0x275   :  { %4917 = vmatpush.bf16.msrb.mxu0 %v7642_v59  ;;  %4891 = vmatpush.bf16.msra.mxu2 %v7386_v17  ;;  %v7319_v59 = vld [vmem:[%s13716_s4 + $0x210] sm:$0xf0]  ;;  %v3359_v62 = vpop.f32.mrf.mxu2  ;;  %v8571_v10 = vld [vmem:[%s13716_s4 + $0x744] sm:$0xf] }
 0x276   :  { %v7463_v17 = vld [vmem:[%s13716_s4 + $0x330] sm:$0xf0]  ;;  %v8579_v62 = vld [vmem:[%s13716_s4 + $0x784] sm:$0xf] }
 0x277   :  { %4903 = vmatpush.bf16.msra.mxu3 %v7530_v44  ;;  %4929 = vmatpush.bf16.msrb.mxu1 %v7786_v36  ;;  %v12654_v44 = vadd.f32 %v3370_v6, %v3358_v40  ;;  %v7322_v36 = vor.u32 %v8403_v28, %v7319_v59  ;;  %v7466_v51 = vor.u32 %v8439_v22, %v7463_v17  ;;  %v7911_v40 = vld [vmem:[%s13716_s4 + $0x6b0] sm:$0xf0]  ;;  %v8354_v22 = vld [vmem:[%s13716_s4 + $0x74] sm:$0xf0] }
 0x278   :  { %v7294_v28 = vor.u32 %v8398_v47, %v7293_v42  ;;  %v7134_v59 = vor.u32 %v8358_v39, %v7133_v1  ;;  %v8039_v6 = vld [vmem:[%s13716_s4 + $0x7b0] sm:$0xf0]  ;;  %v7229_v47 = vld [vmem:[%s13716_s4 + $0x148] sm:$0xf]  ;;  %v8342_v39 = vld [vmem:[%s13716_s4 + $0x14] sm:$0xf0] }
 0x279   :  { %4918 = vmatpush.bf16.msrb.mxu0 %v7626_v33  ;;  %4892 = vmatpush.bf16.msra.mxu2 %v7370_v60  ;;  %v7165_v33 = vld [vmem:[%s13716_s4 + $0xc8] sm:$0xf]  ;;  %v7927_v60 = vld [vmem:[%s13716_s4 + $0x6d0] sm:$0xf0] }
 0x27a   :  { %v7930_v25 = vor.u32 %v8555_v55, %v7927_v60  ;;  %v7101_v55 = vld [vmem:[%s13716_s4 + $0x48] sm:$0xf]  ;;  %v8350_v60 = vld [vmem:[%s13716_s4 + $0x54] sm:$0xf0]  ;;  %v7991_v42 = vld [vmem:[%s13716_s4 + $0x750] sm:$0xf0] }
 0x27b   :  { %4904 = vmatpush.bf16.msra.mxu3 %v7514_v19  ;;  %4930 = vmatpush.bf16.msrb.mxu1 %v7770_v2  ;;  %v8435_v19 = vld [vmem:[%s13716_s4 + $0x304] sm:$0xf]  ;;  %v7703_v2 = vld [vmem:[%s13716_s4 + $0x510] sm:$0xf0]  ;;  %v7069_v1 = vld [vmem:[%s13716_s4 + $0x8] sm:$0xf] }
 0x27c   :  { %v7450_v31 = vor.u32 %v8435_v19, %v7447_v34  ;;  %v7882_v19 = vor.u32 %v8543_v45, %v7879_v24  ;;  %v8539_v34 = vld [vmem:[%s13716_s4 + $0x644] sm:$0xf]  ;;  %v7213_v24 = vld [vmem:[%s13716_s4 + $0x128] sm:$0xf] }
 0x27d   :  { %4919 = vmatpush.bf16.msrb.mxu0 %v7610_v7  ;;  %4893 = vmatpush.bf16.msra.mxu2 %v7354_v53  ;;  %v7166_v7 = vor.u32 %v8366_v58, %v7165_v33  ;;  %v8362_v53 = vld [vmem:[%s13716_s4 + $0xb4] sm:$0xf0]  ;;  %v7118_v58 = vor.u32 %v8354_v22, %v7117_v8  ;;  %v8567_v22 = vld [vmem:[%s13716_s4 + $0x724] sm:$0xf] }
 0x27e   :  { %v8434_v8 = vld [vmem:[%s13716_s4 + $0x2f4] sm:$0xf0] }
 0x27f   :  { %4905 = vmatpush.bf16.msra.mxu3 %v7498_v4  ;;  %4931 = vmatpush.bf16.msrb.mxu1 %v7754_v49  ;;  %v3372_v4 = vpop.f32.mrf.mxu3  ;;  %v7706_v49 = vor.u32 %v8499_v61, %v7703_v2  ;;  %v7863_v61 = vld [vmem:[%s13716_s4 + $0x650] sm:$0xf0] }
 0x281   :  { %4920 = vmatpush.bf16.msrb.mxu0 %v7594_v9  ;;  %4894 = vmatpush.bf16.msra.mxu2 %v7338_v32  ;;  %v7150_v9 = vor.u32 %v8362_v53, %v7149_v15  ;;  %v7914_v32 = vor.u32 %v8551_v13, %v7911_v40  ;;  %v7085_v15 = vld [vmem:[%s13716_s4 + $0x28] sm:$0xf]  ;;  %v8346_v53 = vld [vmem:[%s13716_s4 + $0x34] sm:$0xf0]  ;;  %v7847_v13 = vld [vmem:[%s13716_s4 + $0x630] sm:$0xf0] }
 0x282   :  { %v7086_v37 = vor.u32 %v8346_v53, %v7085_v15  ;;  %v7821_v15 = vld [vmem:[%s13716_s4 + $0x5e8] sm:$0xf] }
 0x283   :  { %4906 = vmatpush.bf16.msra.mxu3 %v7482_v63  ;;  %4932 = vmatpush.bf16.msrb.mxu1 %v7738_v16  ;;  %v7895_v63 = vld [vmem:[%s13716_s4 + $0x690] sm:$0xf0]  ;;  %v7277_v16 = vld [vmem:[%s13716_s4 + $0x1a8] sm:$0xf] }
 0x284   :  { %v7898_v17 = vor.u32 %v8547_v46, %v7895_v63  ;;  %v8498_v46 = vld [vmem:[%s13716_s4 + $0x4f4] sm:$0xf0]  ;;  %v7994_v63 = vor.u32 %v8571_v10, %v7991_v42 }
 0x285   :  { %4921 = vmatpush.bf16.msrb.mxu0 %v7578_v5  ;;  %4895 = vmatpush.bf16.msra.mxu2 %v7322_v36  ;;  %v8394_v5 = vld [vmem:[%s13716_s4 + $0x1b4] sm:$0xf0]  ;;  %v12762_v36 = vpop.f32.mrf.mxu0 }
 0x286   :  { %v7278_v33 = vor.u32 %v8394_v5, %v7277_v16  ;;  %v7070_v5 = vor.u32 %v8342_v39, %v7069_v1  ;;  %v7805_v1 = vld [vmem:[%s13716_s4 + $0x5c8] sm:$0xf]  ;;  %v8526_v39 = vld [vmem:[%s13716_s4 + $0x5d4] sm:$0xf0] }
 0x287   :  { %4907 = vmatpush.bf16.msra.mxu3 %v7466_v51  ;;  %4933 = vmatpush.bf16.msrb.mxu1 %v7722_v56  ;;  %v8390_v51 = vld [vmem:[%s13716_s4 + $0x194] sm:$0xf0]  ;;  %v8026_v56 = vor.u32 %v8579_v62, %v8023_v35  ;;  %v7677_v62 = vld [vmem:[%s13716_s4 + $0x4c8] sm:$0xf] }
 0x288   :  { %4922 = vmatmul.bf16.vlgmr.msrb.gmra.mxu0 %v12267_v21  ;;  %4896 = vmatmul.bf16.vlgmr.msra.gmra.mxu2 %v12280_v23  ;;  %v8494_v35 = vld [vmem:[%s13716_s4 + $0x4d4] sm:$0xf0] }
 0x289   :  { %4966 = vmatpush.bf16.msra.mxu0 %v7182_v29  ;;  %4940 = vmatpush.bf16.msrb.mxu2 %v7946_v43  ;;  %v8042_v29 = vor.u32 %v8583_v48, %v8039_v6  ;;  %v7261_v43 = vld [vmem:[%s13716_s4 + $0x188] sm:$0xf] }
 0x28a   :  { %v7262_v2 = vor.u32 %v8390_v51, %v7261_v43  ;;  %v7437_v48 = vld [vmem:[%s13716_s4 + $0x2e8] sm:$0xf] }
 0x28b   :  { %4908 = vmatpush.bf16.msra.mxu3 %v7450_v31  ;;  %4934 = vmatpush.bf16.msrb.mxu1 %v7706_v49  ;;  %v3409_v31 = vpop.f32.mrf.mxu2  ;;  %v3448_v4 = vpop.f32.mrf.mxu1  ;;  %v8010_v49 = vor.u32 %v8575_v27, %v8007_v3  ;;  %v8374_v27 = vld [vmem:[%s13716_s4 + $0x114] sm:$0xf0]  ;;  %v7678_v3 = vor.u32 %v8494_v35, %v7677_v62 }
 0x28c   :  { %v3410_v40 = vadd.f32 %v3409_v31, %v12610_v52  ;;  %v8382_v52 = vld [vmem:[%s13716_s4 + $0x154] sm:$0xf0]  ;;  %v7661_v31 = vld [vmem:[%s13716_s4 + $0x4a8] sm:$0xf] }
 0x28d   :  { %4967 = vmatpush.bf16.msra.mxu0 %v7166_v7  ;;  %4941 = vmatpush.bf16.msrb.mxu2 %v7930_v25  ;;  %v7102_v7 = vor.u32 %v8350_v60, %v7101_v55  ;;  %v7866_v25 = vor.u32 %v8539_v34, %v7863_v61  ;;  %v7230_v16 = vor.u32 %v8382_v52, %v7229_v47  ;;  %v8430_v34 = vld [vmem:[%s13716_s4 + $0x2d4] sm:$0xf0]  ;;  %v8563_v61 = vld [vmem:[%s13716_s4 + $0x704] sm:$0xf]  ;;  %v7549_v47 = vld [vmem:[%s13716_s4 + $0x3c8] sm:$0xf] }
 0x28e   :  { %4909 = vmatmul.bf16.vlgmr.msra.gmra.mxu3 %v12310_v54  ;;  %4935 = vmatmul.bf16.vlgmr.msrb.gmra.mxu1 %v12320_v57  ;;  %v7438_v60 = vor.u32 %v8434_v8, %v7437_v48  ;;  %v8462_v52 = vld [vmem:[%s13716_s4 + $0x3d4] sm:$0xf0]  ;;  %v7806_v48 = vor.u32 %v8526_v39, %v7805_v1  ;;  %v7789_v8 = vld [vmem:[%s13716_s4 + $0x5a8] sm:$0xf] }
 0x28f   :  { %4953 = vmatpush.bf16.msrb.mxu3 %v8074_v50  ;;  %4979 = vmatpush.bf16.msra.mxu1 %v7310_v0  ;;  %v8535_v50 = vld [vmem:[%s13716_s4 + $0x624] sm:$0xf]  ;;  %v3437_v0 = vpop.f32.mrf.mxu0  ;;  %v7485_v1 = vld [vmem:[%s13716_s4 + $0x348] sm:$0xf]  ;;  %v8446_v39 = vld [vmem:[%s13716_s4 + $0x354] sm:$0xf0] }
 0x291   :  { %4968 = vmatpush.bf16.msra.mxu0 %v7150_v9  ;;  %4942 = vmatpush.bf16.msrb.mxu2 %v7914_v32  ;;  %v7246_v9 = vor.u32 %v8386_v14, %v7245_v30  ;;  %v7850_v32 = vor.u32 %v8535_v50, %v7847_v13  ;;  %v3422_v6 = vpop.f32.mrf.mxu3  ;;  %v7565_v30 = vld [vmem:[%s13716_s4 + $0x3e8] sm:$0xf]  ;;  %v8466_v14 = vld [vmem:[%s13716_s4 + $0x3f4] sm:$0xf0] }
 0x292   :  { %v7566_v0 = vor.u32 %v8466_v14, %v7565_v30  ;;  %v8450_v14 = vld [vmem:[%s13716_s4 + $0x374] sm:$0xf0] }
 0x293   :  { %4954 = vmatpush.bf16.msrb.mxu3 %v8058_v12  ;;  %4980 = vmatpush.bf16.msra.mxu1 %v7294_v28  ;;  %v7693_v12 = vld [vmem:[%s13716_s4 + $0x4e8] sm:$0xf]  ;;  %v8531_v28 = vld [vmem:[%s13716_s4 + $0x604] sm:$0xf]  ;;  %v3411_v51 = vpop.f32.mrf.mxu2  ;;  %v3450_v55 = vpop.f32.mrf.mxu1 }
 0x294   :  { %v7694_v45 = vor.u32 %v8498_v46, %v7693_v12  ;;  %v8486_v12 = vld [vmem:[%s13716_s4 + $0x494] sm:$0xf0]  ;;  %v7517_v51 = vld [vmem:[%s13716_s4 + $0x388] sm:$0xf] }
 0x295   :  { %4969 = vmatpush.bf16.msra.mxu0 %v7134_v59  ;;  %4943 = vmatpush.bf16.msrb.mxu2 %v7898_v17  ;;  %v7831_v59 = vld [vmem:[%s13716_s4 + $0x610] sm:$0xf0]  ;;  %v8454_v55 = vld [vmem:[%s13716_s4 + $0x394] sm:$0xf0] }
 0x296   :  { %v7975_v17 = vld [vmem:[%s13716_s4 + $0x730] sm:$0xf0] }
 0x297   :  { %4955 = vmatpush.bf16.msrb.mxu3 %v8042_v29  ;;  %4981 = vmatpush.bf16.msra.mxu1 %v7278_v33  ;;  %v3423_v29 = vadd.f32 %v3422_v6, %v3410_v40  ;;  %v8378_v33 = vld [vmem:[%s13716_s4 + $0x134] sm:$0xf0] }
 0x299   :  { %4970 = vmatpush.bf16.msra.mxu0 %v7118_v58  ;;  %4944 = vmatpush.bf16.msrb.mxu2 %v7882_v19  ;;  %v7834_v58 = vor.u32 %v8531_v28, %v7831_v59  ;;  %v3436_v43 = vadd.f32 %v12762_v36, %v3423_v29  ;;  %v7978_v19 = vor.u32 %v8567_v22, %v7975_v17  ;;  %v7389_v28 = vld [vmem:[%s13716_s4 + $0x288] sm:$0xf]  ;;  %v8422_v59 = vld [vmem:[%s13716_s4 + $0x294] sm:$0xf0] }
 0x29a   :  { %v7214_v36 = vor.u32 %v8378_v33, %v7213_v24  ;;  %v8522_v22 = vld [vmem:[%s13716_s4 + $0x5b4] sm:$0xf0]  ;;  %v7629_v17 = vld [vmem:[%s13716_s4 + $0x468] sm:$0xf] }
 0x29b   :  { %4956 = vmatpush.bf16.msrb.mxu3 %v8026_v56  ;;  %4982 = vmatpush.bf16.msra.mxu1 %v7262_v2  ;;  %v7421_v56 = vld [vmem:[%s13716_s4 + $0x2c8] sm:$0xf]  ;;  %v7959_v2 = vld [vmem:[%s13716_s4 + $0x710] sm:$0xf0]  ;;  %v12895_v53 = vadd.f32 %v3448_v4, %v3436_v43  ;;  %v3424_v4 = vpop.f32.mrf.mxu3  ;;  %v8482_v29 = vld [vmem:[%s13716_s4 + $0x474] sm:$0xf0]  ;;  %v7790_v35 = vor.u32 %v8522_v22, %v7789_v8 }
 0x29c   :  { %v7422_v50 = vor.u32 %v8430_v34, %v7421_v56  ;;  %v7962_v13 = vor.u32 %v8563_v61, %v7959_v2  ;;  %v7373_v33 = vld [vmem:[%s13716_s4 + $0x268] sm:$0xf]  ;;  %v7630_v43 = vor.u32 %v8482_v29, %v7629_v17  ;;  %v8518_v56 = vld [vmem:[%s13716_s4 + $0x594] sm:$0xf0]  ;;  %v7518_v2 = vor.u32 %v8454_v55, %v7517_v51  ;;  %v8364_v51 = vld [vmem:[%s13716_s4 + $0xcc] sm:$0xf] }
 0x29d   :  { %4971 = vmatpush.bf16.msra.mxu0 %v7102_v7  ;;  %4945 = vmatpush.bf16.msrb.mxu2 %v7866_v25  ;;  %v7197_v7 = vld [vmem:[%s13716_s4 + $0x108] sm:$0xf]  ;;  %v8530_v25 = vld [vmem:[%s13716_s4 + $0x5f4] sm:$0xf0]  ;;  %v7167_v55 = vld [vmem:[%s13716_s4 + $0xd8] sm:$0xf0] }
 0x29e   :  { %v7198_v40 = vor.u32 %v8374_v27, %v7197_v7  ;;  %v7822_v10 = vor.u32 %v8530_v25, %v7821_v15  ;;  %v7613_v34 = vld [vmem:[%s13716_s4 + $0x448] sm:$0xf]  ;;  %v8478_v61 = vld [vmem:[%s13716_s4 + $0x454] sm:$0xf0] }
 0x29f   :  { %4957 = vmatpush.bf16.msrb.mxu3 %v8010_v49  ;;  %4983 = vmatpush.bf16.msra.mxu1 %v7246_v9  ;;  %v8490_v49 = vld [vmem:[%s13716_s4 + $0x4b4] sm:$0xf0]  ;;  %v7405_v9 = vld [vmem:[%s13716_s4 + $0x2a8] sm:$0xf]  ;;  %v7614_v30 = vor.u32 %v8478_v61, %v7613_v34 }
 0x2a0   :  { %v7662_v42 = vor.u32 %v8490_v49, %v7661_v31  ;;  %v8414_v7 = vld [vmem:[%s13716_s4 + $0x254] sm:$0xf0]  ;;  %v7501_v27 = vld [vmem:[%s13716_s4 + $0x368] sm:$0xf] }
 0x2a1   :  { %4972 = vmatpush.bf16.msra.mxu0 %v7086_v37  ;;  %4946 = vmatpush.bf16.msrb.mxu2 %v7850_v32  ;;  %v8426_v37 = vld [vmem:[%s13716_s4 + $0x2b4] sm:$0xf0]  ;;  %v7645_v32 = vld [vmem:[%s13716_s4 + $0x488] sm:$0xf] }
 0x2a2   :  { %v7406_v46 = vor.u32 %v8426_v37, %v7405_v9  ;;  %v7646_v6 = vor.u32 %v8486_v12, %v7645_v32  ;;  %v7757_v15 = vld [vmem:[%s13716_s4 + $0x568] sm:$0xf]  ;;  %v8514_v25 = vld [vmem:[%s13716_s4 + $0x574] sm:$0xf0] }
 0x2a3   :  { %4958 = vmatpush.bf16.msrb.mxu3 %v7994_v63  ;;  %4984 = vmatpush.bf16.msra.mxu1 %v7230_v16  ;;  %v7550_v63 = vor.u32 %v8462_v52, %v7549_v47  ;;  %v7533_v16 = vld [vmem:[%s13716_s4 + $0x3a8] sm:$0xf]  ;;  %v8474_v49 = vld [vmem:[%s13716_s4 + $0x434] sm:$0xf0] }
 0x2a4   :  { %v7597_v31 = vld [vmem:[%s13716_s4 + $0x428] sm:$0xf]  ;;  %v8410_v37 = vld [vmem:[%s13716_s4 + $0x234] sm:$0xf0] }
 0x2a5   :  { %4973 = vmatpush.bf16.msra.mxu0 %v7070_v5  ;;  %4947 = vmatpush.bf16.msrb.mxu2 %v7834_v58  ;;  %v8458_v5 = vld [vmem:[%s13716_s4 + $0x3b4] sm:$0xf0]  ;;  %v4767_v62 = vpop.f32.mrf.mxu0  ;;  %v7341_v9 = vld [vmem:[%s13716_s4 + $0x228] sm:$0xf]  ;;  %v7598_v52 = vor.u32 %v8474_v49, %v7597_v31  ;;  %v7311_v31 = vld [vmem:[%s13716_s4 + $0x1f8] sm:$0xf0] }
 0x2a6   :  { %v7534_v24 = vor.u32 %v8458_v5, %v7533_v16  ;;  %v8418_v58 = vld [vmem:[%s13716_s4 + $0x274] sm:$0xf0]  ;;  %v7741_v32 = vld [vmem:[%s13716_s4 + $0x548] sm:$0xf]  ;;  %v8360_v49 = vld [vmem:[%s13716_s4 + $0xac] sm:$0xf] }
 0x2a7   :  { %4959 = vmatpush.bf16.msrb.mxu3 %v7978_v19  ;;  %4985 = vmatpush.bf16.msra.mxu1 %v7214_v36  ;;  %v4768_v19 = vadd.f32 %v4767_v62, %v11989_v11  ;;  %v7374_v36 = vor.u32 %v8418_v58, %v7373_v33  ;;  %v7357_v11 = vld [vmem:[%s13716_s4 + $0x248] sm:$0xf]  ;;  %v8406_v16 = vld [vmem:[%s13716_s4 + $0x214] sm:$0xf0] }
 0x2a8   :  { %4974 = vmatmul.bf16.vlgmr.msra.gmra.mxu0 %v12056_v18  ;;  %4948 = vmatmul.bf16.vlgmr.msrb.gmra.mxu2 %v12497_v41  ;;  %v7581_v12 = vld [vmem:[%s13716_s4 + $0x408] sm:$0xf]  ;;  %v8562_v29 = vld [vmem:[%s13716_s4 + $0x6f4] sm:$0xf0] }
 0x2a9   :  { %5018 = vmatpush.bf16.msrb.mxu0 %v7694_v45  ;;  %4992 = vmatpush.bf16.msra.mxu2 %v7438_v60  ;;  %v7390_v45 = vor.u32 %v8422_v59, %v7389_v28  ;;  %v7773_v60 = vld [vmem:[%s13716_s4 + $0x588] sm:$0xf]  ;;  %v8368_v28 = vld [vmem:[%s13716_s4 + $0xec] sm:$0xf]  ;;  %v7183_v59 = vld [vmem:[%s13716_s4 + $0xf8] sm:$0xf0] }
 0x2aa   :  { %v7949_v5 = vld [vmem:[%s13716_s4 + $0x6e8] sm:$0xf]  ;;  %v7186_v58 = vor.u32 %v8368_v28, %v7183_v59 }
 0x2ab   :  { %4960 = vmatpush.bf16.msrb.mxu3 %v7962_v13  ;;  %4986 = vmatpush.bf16.msra.mxu1 %v7198_v40  ;;  %v3461_v13 = vpop.f32.mrf.mxu2  ;;  %v4780_v4 = vpop.f32.mrf.mxu1  ;;  %v7502_v40 = vor.u32 %v8450_v14, %v7501_v27  ;;  %v7725_v62 = vld [vmem:[%s13716_s4 + $0x528] sm:$0xf] }
 0x2ac   :  { %v7933_v61 = vld [vmem:[%s13716_s4 + $0x6c8] sm:$0xf] }
 0x2ad   :  { %5019 = vmatpush.bf16.msrb.mxu0 %v7678_v3  ;;  %4993 = vmatpush.bf16.msra.mxu2 %v7422_v50  ;;  %v7774_v3 = vor.u32 %v8518_v56, %v7773_v60  ;;  %v7358_v50 = vor.u32 %v8414_v7, %v7357_v11  ;;  %v4769_v47 = vpop.f32.mrf.mxu0  ;;  %v7950_v56 = vor.u32 %v8562_v29, %v7949_v5  ;;  %v8438_v7 = vld [vmem:[%s13716_s4 + $0x314] sm:$0xf0]  ;;  %v7709_v27 = vld [vmem:[%s13716_s4 + $0x508] sm:$0xf]  ;;  %v8352_v29 = vld [vmem:[%s13716_s4 + $0x6c] sm:$0xf] }
 0x2ae   :  { %4961 = vmatmul.bf16.vlgmr.msrb.gmra.mxu3 %v12527_v20  ;;  %4987 = vmatmul.bf16.vlgmr.msra.gmra.mxu1 %v12102_v26  ;;  %v8077_v14 = vld [vmem:[%s13716_s4 + $0x7e8] sm:$0xf] }
 0x2af   :  { %5005 = vmatpush.bf16.msra.mxu3 %v7566_v0  ;;  %5031 = vmatpush.bf16.msrb.mxu1 %v7822_v10  ;;  %v7758_v0 = vor.u32 %v8514_v25, %v7757_v15  ;;  %v3462_v10 = vadd.f32 %v3461_v13, %v12895_v53  ;;  %v8510_v53 = vld [vmem:[%s13716_s4 + $0x554] sm:$0xf0]  ;;  %v8400_v25 = vld [vmem:[%s13716_s4 + $0x1ec] sm:$0xf]  ;;  %v7901_v59 = vld [vmem:[%s13716_s4 + $0x688] sm:$0xf] }
 0x2b0   :  { %v7742_v22 = vor.u32 %v8510_v53, %v7741_v32  ;;  %v8594_v15 = vld [vmem:[%s13716_s4 + $0x7f4] sm:$0xf0]  ;;  %v7314_v47 = vor.u32 %v8400_v25, %v7311_v31  ;;  %v8396_v32 = vld [vmem:[%s13716_s4 + $0x1cc] sm:$0xf]  ;;  %v7295_v53 = vld [vmem:[%s13716_s4 + $0x1d8] sm:$0xf0] }
 0x2b1   :  { %5020 = vmatpush.bf16.msrb.mxu0 %v7662_v42  ;;  %4994 = vmatpush.bf16.msra.mxu2 %v7406_v46  ;;  %v13014_v42 = vadd.f32 %v4780_v4, %v4768_v19  ;;  %v8470_v46 = vld [vmem:[%s13716_s4 + $0x414] sm:$0xf0]  ;;  %v3474_v8 = vpop.f32.mrf.mxu3  ;;  %v8045_v5 = vld [vmem:[%s13716_s4 + $0x7a8] sm:$0xf]  ;;  %v8384_v25 = vld [vmem:[%s13716_s4 + $0x16c] sm:$0xf] }
 0x2b2   :  { %v7582_v17 = vor.u32 %v8470_v46, %v7581_v12  ;;  %v13058_v33 = vadd.f32 %v3474_v8, %v3462_v10  ;;  %v8554_v10 = vld [vmem:[%s13716_s4 + $0x6b4] sm:$0xf0]  ;;  %v8356_v12 = vld [vmem:[%s13716_s4 + $0x8c] sm:$0xf]  ;;  %v7135_v46 = vld [vmem:[%s13716_s4 + $0x98] sm:$0xf0] }
 0x2b3   :  { %5006 = vmatpush.bf16.msra.mxu3 %v7550_v63  ;;  %5032 = vmatpush.bf16.msrb.mxu1 %v7806_v48  ;;  %v7342_v63 = vor.u32 %v8410_v37, %v7341_v9  ;;  %v7486_v48 = vor.u32 %v8446_v39, %v7485_v1  ;;  %v3463_v60 = vpop.f32.mrf.mxu2  ;;  %v4782_v19 = vpop.f32.mrf.mxu1  ;;  %v8078_v9 = vor.u32 %v8594_v15, %v8077_v14  ;;  %v7917_v37 = vld [vmem:[%s13716_s4 + $0x6a8] sm:$0xf]  ;;  %v8590_v39 = vld [vmem:[%s13716_s4 + $0x7d4] sm:$0xf0]  ;;  %v7247_v31 = vld [vmem:[%s13716_s4 + $0x178] sm:$0xf0] }
 0x2b4   :  { %v8061_v1 = vld [vmem:[%s13716_s4 + $0x7c8] sm:$0xf]  ;;  %v8586_v8 = vld [vmem:[%s13716_s4 + $0x7b4] sm:$0xf0] }
 0x2b5   :  { %5021 = vmatpush.bf16.msrb.mxu0 %v7646_v6  ;;  %4995 = vmatpush.bf16.msra.mxu2 %v7390_v45  ;;  %v7325_v6 = vld [vmem:[%s13716_s4 + $0x208] sm:$0xf]  ;;  %v8062_v28 = vor.u32 %v8590_v39, %v8061_v1  ;;  %v8582_v19 = vld [vmem:[%s13716_s4 + $0x794] sm:$0xf0] }
 0x2b6   :  { %v7469_v45 = vld [vmem:[%s13716_s4 + $0x328] sm:$0xf]  ;;  %v8578_v15 = vld [vmem:[%s13716_s4 + $0x774] sm:$0xf0] }
 0x2b7   :  { %5007 = vmatpush.bf16.msra.mxu3 %v7534_v24  ;;  %5033 = vmatpush.bf16.msrb.mxu1 %v7790_v35  ;;  %v8442_v24 = vld [vmem:[%s13716_s4 + $0x334] sm:$0xf0]  ;;  %v8029_v60 = vld [vmem:[%s13716_s4 + $0x788] sm:$0xf] }
 0x2b8   :  { %v8506_v35 = vld [vmem:[%s13716_s4 + $0x534] sm:$0xf0]  ;;  %v7470_v34 = vor.u32 %v8442_v24, %v7469_v45  ;;  %v7119_v45 = vld [vmem:[%s13716_s4 + $0x78] sm:$0xf0]  ;;  %v8013_v14 = vld [vmem:[%s13716_s4 + $0x768] sm:$0xf] }
 0x2b9   :  { %5022 = vmatpush.bf16.msrb.mxu0 %v7630_v43  ;;  %4996 = vmatpush.bf16.msra.mxu2 %v7374_v36  ;;  %v7326_v43 = vor.u32 %v8406_v16, %v7325_v6  ;;  %v8558_v36 = vld [vmem:[%s13716_s4 + $0x6d4] sm:$0xf0]  ;;  %v7726_v11 = vor.u32 %v8506_v35, %v7725_v62  ;;  %v7298_v6 = vor.u32 %v8396_v32, %v7295_v53  ;;  %v7885_v62 = vld [vmem:[%s13716_s4 + $0x668] sm:$0xf]  ;;  %v8380_v32 = vld [vmem:[%s13716_s4 + $0x14c] sm:$0xf] }
 0x2ba   :  { %v7934_v13 = vor.u32 %v8558_v36, %v7933_v61  ;;  %v7138_v16 = vor.u32 %v8356_v12, %v7135_v46  ;;  %v8546_v35 = vld [vmem:[%s13716_s4 + $0x674] sm:$0xf0]  ;;  %v8348_v61 = vld [vmem:[%s13716_s4 + $0x4c] sm:$0xf]  ;;  %v7103_v36 = vld [vmem:[%s13716_s4 + $0x58] sm:$0xf0] }
 0x2bb   :  { %5008 = vmatpush.bf16.msra.mxu3 %v7518_v2  ;;  %5034 = vmatpush.bf16.msrb.mxu1 %v7774_v3  ;;  %v7453_v2 = vld [vmem:[%s13716_s4 + $0x308] sm:$0xf]  ;;  %v8502_v3 = vld [vmem:[%s13716_s4 + $0x514] sm:$0xf0]  ;;  %v7231_v53 = vld [vmem:[%s13716_s4 + $0x158] sm:$0xf0] }
 0x2bc   :  { %v7454_v4 = vor.u32 %v8438_v7, %v7453_v2  ;;  %v7886_v2 = vor.u32 %v8546_v35, %v7885_v62  ;;  %v7869_v7 = vld [vmem:[%s13716_s4 + $0x648] sm:$0xf]  ;;  %v8574_v39 = vld [vmem:[%s13716_s4 + $0x754] sm:$0xf0]  ;;  %v8340_v12 = vld [vmem:[%s13716_s4 + $0xc] sm:$0xf] }
 0x2bd   :  { %5023 = vmatpush.bf16.msrb.mxu0 %v7614_v30  ;;  %4997 = vmatpush.bf16.msra.mxu2 %v7358_v50  ;;  %v7170_v30 = vor.u32 %v8364_v51, %v7167_v55  ;;  %v7151_v50 = vld [vmem:[%s13716_s4 + $0xb8] sm:$0xf0]  ;;  %v7122_v55 = vor.u32 %v8352_v29, %v7119_v45  ;;  %v7997_v1 = vld [vmem:[%s13716_s4 + $0x748] sm:$0xf]  ;;  %v8376_v62 = vld [vmem:[%s13716_s4 + $0x12c] sm:$0xf] }
 0x2be   :  { %v7071_v46 = vld [vmem:[%s13716_s4 + $0x18] sm:$0xf0]  ;;  %v7981_v45 = vld [vmem:[%s13716_s4 + $0x728] sm:$0xf] }
 0x2bf   :  { %5009 = vmatpush.bf16.msra.mxu3 %v7502_v40  ;;  %5035 = vmatpush.bf16.msrb.mxu1 %v7758_v0  ;;  %v3476_v40 = vpop.f32.mrf.mxu3  ;;  %v7710_v0 = vor.u32 %v8502_v3, %v7709_v27  ;;  %v8542_v27 = vld [vmem:[%s13716_s4 + $0x654] sm:$0xf0]  ;;  %v7439_v29 = vld [vmem:[%s13716_s4 + $0x2f8] sm:$0xf0] }
 0x2c0   :  { %v7215_v35 = vld [vmem:[%s13716_s4 + $0x138] sm:$0xf0] }
 0x2c1   :  { %5024 = vmatpush.bf16.msrb.mxu0 %v7598_v52  ;;  %4998 = vmatpush.bf16.msra.mxu2 %v7342_v63  ;;  %v7154_v52 = vor.u32 %v8360_v49, %v7151_v50  ;;  %v7918_v63 = vor.u32 %v8554_v10, %v7917_v37  ;;  %v8344_v49 = vld [vmem:[%s13716_s4 + $0x2c] sm:$0xf]  ;;  %v7087_v50 = vld [vmem:[%s13716_s4 + $0x38] sm:$0xf0]  ;;  %v8538_v37 = vld [vmem:[%s13716_s4 + $0x634] sm:$0xf0] }
 0x2c3   :  { %5010 = vmatpush.bf16.msra.mxu3 %v7486_v48  ;;  %5036 = vmatpush.bf16.msrb.mxu1 %v7742_v22  ;;  %v8550_v48 = vld [vmem:[%s13716_s4 + $0x694] sm:$0xf0]  ;;  %v8392_v22 = vld [vmem:[%s13716_s4 + $0x1ac] sm:$0xf] }
 0x2c4   :  { %v7902_v24 = vor.u32 %v8550_v48, %v7901_v59  ;;  %v7695_v59 = vld [vmem:[%s13716_s4 + $0x4f8] sm:$0xf0]  ;;  %v7998_v48 = vor.u32 %v8574_v39, %v7997_v1 }
 0x2c5   :  { %5025 = vmatpush.bf16.msrb.mxu0 %v7582_v17  ;;  %4999 = vmatpush.bf16.msra.mxu2 %v7326_v43  ;;  %v7279_v17 = vld [vmem:[%s13716_s4 + $0x1b8] sm:$0xf0]  ;;  %v13166_v43 = vpop.f32.mrf.mxu0 }
 0x2c6   :  { %v7282_v51 = vor.u32 %v8392_v22, %v7279_v17  ;;  %v7234_v22 = vor.u32 %v8380_v32, %v7231_v53  ;;  %v7074_v17 = vor.u32 %v8340_v12, %v7071_v46  ;;  %v7407_v1 = vld [vmem:[%s13716_s4 + $0x2b8] sm:$0xf0]  ;;  %v8460_v53 = vld [vmem:[%s13716_s4 + $0x3cc] sm:$0xf] }
 0x2c7   :  { %5011 = vmatpush.bf16.msra.mxu3 %v7470_v34  ;;  %5037 = vmatpush.bf16.msrb.mxu1 %v7726_v11  ;;  %v7263_v34 = vld [vmem:[%s13716_s4 + $0x198] sm:$0xf0]  ;;  %v8030_v11 = vor.u32 %v8582_v19, %v8029_v60  ;;  %v8524_v12 = vld [vmem:[%s13716_s4 + $0x5cc] sm:$0xf] }
 0x2c8   :  { %5026 = vmatmul.bf16.vlgmr.msrb.gmra.mxu0 %v12267_v21  ;;  %5000 = vmatmul.bf16.vlgmr.msra.gmra.mxu2 %v12280_v23  ;;  %v7679_v60 = vld [vmem:[%s13716_s4 + $0x4d8] sm:$0xf0] }
 0x2c9   :  { %5070 = vmatpush.bf16.msra.mxu0 %v7186_v58  ;;  %5044 = vmatpush.bf16.msrb.mxu2 %v7950_v56  ;;  %v8046_v58 = vor.u32 %v8586_v8, %v8045_v5  ;;  %v8388_v56 = vld [vmem:[%s13716_s4 + $0x18c] sm:$0xf]  ;;  %v7807_v46 = vld [vmem:[%s13716_s4 + $0x5d8] sm:$0xf0] }
 0x2ca   :  { %v7266_v3 = vor.u32 %v8388_v56, %v7263_v34  ;;  %v8432_v5 = vld [vmem:[%s13716_s4 + $0x2ec] sm:$0xf] }
 0x2cb   :  { %5012 = vmatpush.bf16.msra.mxu3 %v7454_v4  ;;  %5038 = vmatpush.bf16.msrb.mxu1 %v7710_v0  ;;  %v13210_v4 = vpop.f32.mrf.mxu2  ;;  %v13212_v40 = vpop.f32.mrf.mxu1  ;;  %v8014_v0 = vor.u32 %v8578_v15, %v8013_v14  ;;  %v7442_v34 = vor.u32 %v8432_v5, %v7439_v29  ;;  %v8464_v15 = vld [vmem:[%s13716_s4 + $0x3ec] sm:$0xf]  ;;  %v7810_v5 = vor.u32 %v8524_v12, %v7807_v46  ;;  %v7535_v29 = vld [vmem:[%s13716_s4 + $0x3b8] sm:$0xf0] }
 0x2cc   :  { %v8444_v12 = vld [vmem:[%s13716_s4 + $0x34c] sm:$0xf]  ;;  %v7487_v46 = vld [vmem:[%s13716_s4 + $0x358] sm:$0xf0] }
 0x2cd   :  { %5071 = vmatpush.bf16.msra.mxu0 %v7170_v30  ;;  %5045 = vmatpush.bf16.msrb.mxu2 %v7934_v13  ;;  %v7106_v30 = vor.u32 %v8348_v61, %v7103_v36  ;;  %v7870_v13 = vor.u32 %v8542_v27, %v7869_v7  ;;  %v4821_v10 = vpop.f32.mrf.mxu0  ;;  %v8428_v36 = vld [vmem:[%s13716_s4 + $0x2cc] sm:$0xf]  ;;  %v7218_v7 = vor.u32 %v8376_v62, %v7215_v35  ;;  %v8566_v27 = vld [vmem:[%s13716_s4 + $0x714] sm:$0xf0]  ;;  %v7631_v62 = vld [vmem:[%s13716_s4 + $0x478] sm:$0xf0] }
 0x2ce   :  { %5013 = vmatmul.bf16.vlgmr.msra.gmra.mxu3 %v12310_v54  ;;  %5039 = vmatmul.bf16.vlgmr.msrb.gmra.mxu1 %v12320_v57 }
 0x2cf   :  { %5057 = vmatpush.bf16.msrb.mxu3 %v8078_v9  ;;  %5083 = vmatpush.bf16.msra.mxu1 %v7314_v47  ;;  %v7853_v9 = vld [vmem:[%s13716_s4 + $0x628] sm:$0xf]  ;;  %v7250_v47 = vor.u32 %v8384_v25, %v7247_v31  ;;  %v7567_v25 = vld [vmem:[%s13716_s4 + $0x3f8] sm:$0xf0]  ;;  %v8528_v31 = vld [vmem:[%s13716_s4 + $0x5ec] sm:$0xf] }
 0x2d1   :  { %5072 = vmatpush.bf16.msra.mxu0 %v7154_v52  ;;  %5046 = vmatpush.bf16.msrb.mxu2 %v7918_v63  ;;  %v7090_v52 = vor.u32 %v8344_v49, %v7087_v50  ;;  %v7854_v63 = vor.u32 %v8538_v37, %v7853_v9  ;;  %v13253_v8 = vpop.f32.mrf.mxu3  ;;  %v7823_v49 = vld [vmem:[%s13716_s4 + $0x5f8] sm:$0xf0]  ;;  %v8488_v50 = vld [vmem:[%s13716_s4 + $0x4ac] sm:$0xf] }
 0x2d2   :  { %v7826_v39 = vor.u32 %v8528_v31, %v7823_v49  ;;  %v8448_v31 = vld [vmem:[%s13716_s4 + $0x36c] sm:$0xf]  ;;  %v7503_v49 = vld [vmem:[%s13716_s4 + $0x378] sm:$0xf0] }
 0x2d3   :  { %5058 = vmatpush.bf16.msrb.mxu3 %v8062_v28  ;;  %5084 = vmatpush.bf16.msra.mxu1 %v7298_v6  ;;  %v8496_v28 = vld [vmem:[%s13716_s4 + $0x4ec] sm:$0xf]  ;;  %v7837_v6 = vld [vmem:[%s13716_s4 + $0x608] sm:$0xf]  ;;  %v4795_v19 = vpop.f32.mrf.mxu2  ;;  %v4834_v56 = vpop.f32.mrf.mxu1 }
 0x2d5   :  { %5073 = vmatpush.bf16.msra.mxu0 %v7138_v16  ;;  %5047 = vmatpush.bf16.msrb.mxu2 %v7902_v24  ;;  %v8534_v16 = vld [vmem:[%s13716_s4 + $0x614] sm:$0xf0] }
 0x2d6   :  { %v8570_v24 = vld [vmem:[%s13716_s4 + $0x734] sm:$0xf0] }
 0x2d7   :  { %5059 = vmatpush.bf16.msrb.mxu3 %v8046_v58  ;;  %5085 = vmatpush.bf16.msra.mxu1 %v7282_v51  ;;  %v7698_v58 = vor.u32 %v8496_v28, %v7695_v59  ;;  %v7838_v51 = vor.u32 %v8534_v16, %v7837_v6  ;;  %v7982_v61 = vor.u32 %v8570_v24, %v7981_v45  ;;  %v7647_v28 = vld [vmem:[%s13716_s4 + $0x498] sm:$0xf0]  ;;  %v8420_v6 = vld [vmem:[%s13716_s4 + $0x28c] sm:$0xf] }
 0x2d8   :  { %v7391_v16 = vld [vmem:[%s13716_s4 + $0x298] sm:$0xf0]  ;;  %v8520_v45 = vld [vmem:[%s13716_s4 + $0x5ac] sm:$0xf] }
 0x2d9   :  { %5074 = vmatpush.bf16.msra.mxu0 %v7122_v55  ;;  %5048 = vmatpush.bf16.msrb.mxu2 %v7886_v2  ;;  %v8492_v55 = vld [vmem:[%s13716_s4 + $0x4cc] sm:$0xf]  ;;  %v7423_v2 = vld [vmem:[%s13716_s4 + $0x2d8] sm:$0xf0]  ;;  %v4808_v37 = vpop.f32.mrf.mxu3  ;;  %v7394_v35 = vor.u32 %v8420_v6, %v7391_v16  ;;  %v7490_v16 = vor.u32 %v8444_v12, %v7487_v46  ;;  %v8855_v46 = vld [vmem:[%s13717_s8 + $0x20] sm:$0xff] }
 0x2da   :  { %v7682_v14 = vor.u32 %v8492_v55, %v7679_v60  ;;  %v7791_v24 = vld [vmem:[%s13716_s4 + $0x5b8] sm:$0xf0]  ;;  %v8416_v55 = vld [vmem:[%s13716_s4 + $0x26c] sm:$0xf] }
 0x2db   :  { %5060 = vmatpush.bf16.msrb.mxu3 %v8030_v11  ;;  %5086 = vmatpush.bf16.msra.mxu1 %v7266_v3  ;;  %v7965_v11 = vld [vmem:[%s13716_s4 + $0x708] sm:$0xf]  ;;  %v8372_v3 = vld [vmem:[%s13716_s4 + $0x10c] sm:$0xf]  ;;  %v7375_v60 = vld [vmem:[%s13716_s4 + $0x278] sm:$0xf0]  ;;  %v7794_v56 = vor.u32 %v8520_v45, %v7791_v24 }
 0x2dc   :  { %v7966_v9 = vor.u32 %v8566_v27, %v7965_v11  ;;  %v8476_v11 = vld [vmem:[%s13716_s4 + $0x44c] sm:$0xf]  ;;  %v7378_v27 = vor.u32 %v8416_v55, %v7375_v60  ;;  %v7727_v60 = vld [vmem:[%s13716_s4 + $0x538] sm:$0xf0] }
 0x2dd   :  { %5075 = vmatpush.bf16.msra.mxu0 %v7106_v30  ;;  %5049 = vmatpush.bf16.msrb.mxu2 %v7870_v13  ;;  %v7199_v30 = vld [vmem:[%s13716_s4 + $0x118] sm:$0xf0]  ;;  %v8504_v55 = vld [vmem:[%s13716_s4 + $0x52c] sm:$0xf] }
 0x2de   :  { %v7663_v13 = vld [vmem:[%s13716_s4 + $0x4b8] sm:$0xf0]  ;;  %v7202_v10 = vor.u32 %v8372_v3, %v7199_v30  ;;  %v8412_v30 = vld [vmem:[%s13716_s4 + $0x24c] sm:$0xf] }
 0x2df   :  { %5061 = vmatpush.bf16.msrb.mxu3 %v8014_v0  ;;  %5087 = vmatpush.bf16.msra.mxu1 %v7250_v47  ;;  %v7426_v0 = vor.u32 %v8428_v36, %v7423_v2  ;;  %v7570_v47 = vor.u32 %v8464_v15, %v7567_v25  ;;  %v7666_v32 = vor.u32 %v8488_v50, %v7663_v13  ;;  %v8516_v36 = vld [vmem:[%s13716_s4 + $0x58c] sm:$0xf]  ;;  %v7775_v2 = vld [vmem:[%s13716_s4 + $0x598] sm:$0xf0] }
 0x2e0   :  { %v7778_v15 = vor.u32 %v8516_v36, %v7775_v2  ;;  %v8512_v50 = vld [vmem:[%s13716_s4 + $0x56c] sm:$0xf]  ;;  %v7759_v13 = vld [vmem:[%s13716_s4 + $0x578] sm:$0xf0] }
 0x2e1   :  { %5076 = vmatpush.bf16.msra.mxu0 %v7090_v52  ;;  %5050 = vmatpush.bf16.msrb.mxu2 %v7854_v63  ;;  %v8424_v52 = vld [vmem:[%s13716_s4 + $0x2ac] sm:$0xf]  ;;  %v7903_v12 = vld [vmem:[%s13716_s4 + $0x698] sm:$0xf0] }
 0x2e2   :  { %v8484_v63 = vld [vmem:[%s13716_s4 + $0x48c] sm:$0xf]  ;;  %v7410_v59 = vor.u32 %v8424_v52, %v7407_v1  ;;  %v7506_v52 = vor.u32 %v8448_v31, %v7503_v49  ;;  %v8079_v49 = vld [vmem:[%s13716_s4 + $0x7f8] sm:$0xf0] }
 0x2e3   :  { %5062 = vmatpush.bf16.msrb.mxu3 %v7998_v48  ;;  %5088 = vmatpush.bf16.msra.mxu1 %v7234_v22  ;;  %v7650_v22 = vor.u32 %v8484_v63, %v7647_v28  ;;  %v8408_v1 = vld [vmem:[%s13716_s4 + $0x22c] sm:$0xf]  ;;  %v7743_v28 = vld [vmem:[%s13716_s4 + $0x558] sm:$0xf0] }
 0x2e4   :  { %v8508_v63 = vld [vmem:[%s13716_s4 + $0x54c] sm:$0xf] }
 0x2e5   :  { %5077 = vmatpush.bf16.msra.mxu0 %v7074_v17  ;;  %5051 = vmatpush.bf16.msrb.mxu2 %v7838_v51  ;;  %v8456_v17 = vld [vmem:[%s13716_s4 + $0x3ac] sm:$0xf]  ;;  %v13370_v19 = vpop.f32.mrf.mxu0  ;;  %v7746_v45 = vor.u32 %v8508_v63, %v7743_v28  ;;  %v8047_v63 = vld [vmem:[%s13716_s4 + $0x7b8] sm:$0xf0]  ;;  %v8865_v28 = vld [vmem:[%s13717_s8 + $0x70] sm:$0xff] }
 0x2e6   :  { %v7538_v51 = vor.u32 %v8456_v17, %v7535_v29  ;;  %v8560_v17 = vld [vmem:[%s13716_s4 + $0x6ec] sm:$0xf] }
 0x2e7   :  { %5063 = vmatpush.bf16.msrb.mxu3 %v7982_v61  ;;  %5089 = vmatpush.bf16.msra.mxu1 %v7218_v7  ;;  %v7519_v61 = vld [vmem:[%s13716_s4 + $0x398] sm:$0xf0]  ;;  %v8556_v2 = vld [vmem:[%s13716_s4 + $0x6cc] sm:$0xf] }
 0x2e8   :  { %5078 = vmatmul.bf16.vlgmr.msra.gmra.mxu0 %v12056_v18  ;;  %5052 = vmatmul.bf16.vlgmr.msrb.gmra.mxu2 %v12497_v41  ;;  %v7551_v18 = vld [vmem:[%s13716_s4 + $0x3d8] sm:$0xf0]  ;;  %v8592_v31 = vld [vmem:[%s13716_s4 + $0x7ec] sm:$0xf] }
 0x2e9   :  { %5122 = vmatpush.bf16.msrb.mxu0 %v7698_v58  ;;  %5096 = vmatpush.bf16.msra.mxu2 %v7442_v34  ;;  %v7554_v48 = vor.u32 %v8460_v53, %v7551_v18  ;;  %v8480_v58 = vld [vmem:[%s13716_s4 + $0x46c] sm:$0xf]  ;;  %v7615_v7 = vld [vmem:[%s13716_s4 + $0x458] sm:$0xf0]  ;;  %v7762_v53 = vor.u32 %v8512_v50, %v7759_v13 }
 0x2ea   :  { %v7634_v34 = vor.u32 %v8480_v58, %v7631_v62  ;;  %v7618_v25 = vor.u32 %v8476_v11, %v7615_v7  ;;  %v7951_v58 = vld [vmem:[%s13716_s4 + $0x6f8] sm:$0xf0]  ;;  %v8440_v62 = vld [vmem:[%s13716_s4 + $0x32c] sm:$0xf]  ;;  %v8857_v7 = vld [vmem:[%s13717_s8 + $0x30] sm:$0xff] }
 0x2eb   :  { %5064 = vmatpush.bf16.msrb.mxu3 %v7966_v9  ;;  %5090 = vmatpush.bf16.msra.mxu1 %v7202_v10  ;;  %v7599_v9 = vld [vmem:[%s13716_s4 + $0x438] sm:$0xf0]  ;;  %v13414_v10 = vpop.f32.mrf.mxu2 }
 0x2ec   :  { %v7935_v11 = vld [vmem:[%s13716_s4 + $0x6d8] sm:$0xf0] }
 0x2ed   :  { %5123 = vmatpush.bf16.msrb.mxu0 %v7682_v14  ;;  %5097 = vmatpush.bf16.msra.mxu2 %v7426_v0  ;;  %v7359_v14 = vld [vmem:[%s13716_s4 + $0x258] sm:$0xf0]  ;;  %v8472_v0 = vld [vmem:[%s13716_s4 + $0x42c] sm:$0xf]  ;;  %v7938_v13 = vor.u32 %v8556_v2, %v7935_v11 }
 0x2ee   :  { %5065 = vmatmul.bf16.vlgmr.msrb.gmra.mxu3 %v12527_v20  ;;  %5091 = vmatmul.bf16.vlgmr.msra.gmra.mxu1 %v12102_v26  ;;  %v8452_v26 = vld [vmem:[%s13716_s4 + $0x38c] sm:$0xf]  ;;  %v7362_v37 = vor.u32 %v8412_v30, %v7359_v14  ;;  %v7602_v18 = vor.u32 %v8472_v0, %v7599_v9  ;;  %v7455_v30 = vld [vmem:[%s13716_s4 + $0x318] sm:$0xf0]  ;;  %v8082_v9 = vor.u32 %v8592_v31, %v8079_v49 }
 0x2ef   :  { %5109 = vmatpush.bf16.msra.mxu3 %v7570_v47  ;;  %5135 = vmatpush.bf16.msrb.mxu1 %v7826_v39  ;;  %v7522_v3 = vor.u32 %v8452_v26, %v7519_v61  ;;  %v13416_v47 = vpop.f32.mrf.mxu1  ;;  %v7343_v39 = vld [vmem:[%s13716_s4 + $0x238] sm:$0xf0]  ;;  %v7954_v61 = vor.u32 %v8560_v17, %v7951_v58  ;;  %v8500_v14 = vld [vmem:[%s13716_s4 + $0x50c] sm:$0xf] }
 0x2f0   :  { %v7346_v6 = vor.u32 %v8408_v1, %v7343_v39  ;;  %v8063_v1 = vld [vmem:[%s13716_s4 + $0x7d8] sm:$0xf0] }
 0x2f1   :  { %5124 = vmatpush.bf16.msrb.mxu0 %v7666_v32  ;;  %5098 = vmatpush.bf16.msra.mxu2 %v7410_v59  ;;  %v4873_v32 = vpop.f32.mrf.mxu0  ;;  %v8468_v59 = vld [vmem:[%s13716_s4 + $0x40c] sm:$0xf]  ;;  %v13451_v29 = vpop.f32.mrf.mxu3  ;;  %v8866_v39 = vld [vmem:[%s13717_s8 + $0x78] sm:$0xff] }
 0x2f2   :  { %v8862_v31 = vld [vmem:[%s13717_s8 + $0x58] sm:$0xff] }
 0x2f3   :  { %5110 = vmatpush.bf16.msra.mxu3 %v7554_v48  ;;  %5136 = vmatpush.bf16.msrb.mxu1 %v7810_v5  ;;  %v7583_v48 = vld [vmem:[%s13716_s4 + $0x418] sm:$0xf0]  ;;  %v8404_v5 = vld [vmem:[%s13716_s4 + $0x20c] sm:$0xf] }
 0x2f4   :  { %v7586_v24 = vor.u32 %v8468_v59, %v7583_v48  ;;  %v13545_v48 = vld [vmem:[%s13718_s6] sm:$0xf] }
 0x2f5   :  { %5125 = vmatpush.bf16.msrb.mxu0 %v7650_v22  ;;  %5099 = vmatpush.bf16.msra.mxu2 %v7394_v35  ;;  %v7327_v22 = vld [vmem:[%s13716_s4 + $0x218] sm:$0xf0] }
 0x2f6   :  { %v7471_v35 = vld [vmem:[%s13716_s4 + $0x338] sm:$0xf0] }
 0x2f7   :  { %5111 = vmatpush.bf16.msra.mxu3 %v7538_v51  ;;  %5137 = vmatpush.bf16.msrb.mxu1 %v7794_v56  ;;  %v8858_v51 = vld [vmem:[%s13717_s8 + $0x38] sm:$0xff]  ;;  %v7330_v56 = vor.u32 %v8404_v5, %v7327_v22  ;;  %v4886_v26 = vpop.f32.mrf.mxu1  ;;  %v7474_v36 = vor.u32 %v8440_v62, %v7471_v35  ;;  %v8544_v5 = vld [vmem:[%s13716_s4 + $0x66c] sm:$0xf] }
 0x2f9   :  { %5126 = vmatpush.bf16.msrb.mxu0 %v7634_v34  ;;  %5100 = vmatpush.bf16.msra.mxu2 %v7378_v27  ;;  %v4847_v34 = vpop.f32.mrf.mxu2  ;;  %v7730_v27 = vor.u32 %v8504_v55, %v7727_v60  ;;  %v7871_v55 = vld [vmem:[%s13716_s4 + $0x658] sm:$0xf0]  ;;  %v8853_v60 = vld [vmem:[%s13717_s8 + $0x10] sm:$0xff] }
 0x2fa   :  { %v8863_v34 = vld [vmem:[%s13717_s8 + $0x60] sm:$0xff] }
 0x2fb   :  { %5112 = vmatpush.bf16.msra.mxu3 %v7522_v3  ;;  %5138 = vmatpush.bf16.msrb.mxu1 %v7778_v15  ;;  %v8436_v3 = vld [vmem:[%s13716_s4 + $0x30c] sm:$0xf]  ;;  %v4794_v15 = vadd.f32 %v13210_v4, %v13014_v42  ;;  %v4860_v4 = vpop.f32.mrf.mxu3 }
 0x2fc   :  { %v7458_v42 = vor.u32 %v8436_v3, %v7455_v30  ;;  %v7855_v3 = vld [vmem:[%s13716_s4 + $0x638] sm:$0xf0]  ;;  %v8852_v30 = vld [vmem:[%s13717_s8 + $0x8] sm:$0xff] }
 0x2fd   :  { %5127 = vmatpush.bf16.msrb.mxu0 %v7618_v25  ;;  %5101 = vmatpush.bf16.msra.mxu2 %v7362_v37  ;;  %v7711_v25 = vld [vmem:[%s13716_s4 + $0x518] sm:$0xf0]  ;;  %v4807_v50 = vadd.f32 %v13253_v8, %v4794_v15  ;;  %v8552_v37 = vld [vmem:[%s13716_s4 + $0x6ac] sm:$0xf] }
 0x2fe   :  { %v7714_v0 = vor.u32 %v8500_v14, %v7711_v25  ;;  %v8856_v8 = vld [vmem:[%s13717_s8 + $0x28] sm:$0xff]  ;;  %v7999_v25 = vld [vmem:[%s13716_s4 + $0x758] sm:$0xf0] }
 0x2ff   :  { %5113 = vmatpush.bf16.msra.mxu3 %v7506_v52  ;;  %5139 = vmatpush.bf16.msrb.mxu1 %v7762_v53  ;;  %v7919_v52 = vld [vmem:[%s13716_s4 + $0x6b8] sm:$0xf0]  ;;  %v4820_v32 = vadd.f32 %v13166_v43, %v4807_v50  ;;  %v8584_v43 = vld [vmem:[%s13716_s4 + $0x7ac] sm:$0xf] }
 0x300   :  { %v7922_v53 = vor.u32 %v8552_v37, %v7919_v52  ;;  %v8572_v15 = vld [vmem:[%s13716_s4 + $0x74c] sm:$0xf]  ;;  %v7839_v4 = vld [vmem:[%s13716_s4 + $0x618] sm:$0xf0] }
 0x301   :  { %5128 = vmatpush.bf16.msrb.mxu0 %v7602_v18  ;;  %5102 = vmatpush.bf16.msra.mxu2 %v7346_v6  ;;  %v8548_v18 = vld [vmem:[%s13716_s4 + $0x68c] sm:$0xf]  ;;  %v4833_v59 = vadd.f32 %v13212_v40, %v4820_v32  ;;  %v8854_v40 = vld [vmem:[%s13717_s8 + $0x18] sm:$0xff] }
 0x302   :  { %v7906_v6 = vor.u32 %v8548_v18, %v7903_v12  ;;  %v8568_v37 = vld [vmem:[%s13716_s4 + $0x72c] sm:$0xf]  ;;  %v7983_v52 = vld [vmem:[%s13716_s4 + $0x738] sm:$0xf0] }
 0x303   :  { %5114 = vmatpush.bf16.msra.mxu3 %v7490_v16  ;;  %5140 = vmatpush.bf16.msrb.mxu1 %v7746_v45  ;;  %v8050_v16 = vor.u32 %v8584_v43, %v8047_v63  ;;  %v4846_v22 = vadd.f32 %v13414_v10, %v4833_v59  ;;  %v8031_v45 = vld [vmem:[%s13716_s4 + $0x798] sm:$0xf0]  ;;  %v5176_v10 = vperm.slane %v13545_v48, 0  ;;  %v8860_v12 = vld [vmem:[%s13717_s8 + $0x48] sm:$0xff]  ;;  %v4872_v59 = vadd.f32 %v13370_v19, %v12230_v38 }
 0x304   :  { %v7967_v18 = vld [vmem:[%s13716_s4 + $0x718] sm:$0xf0] }
 0x305   :  { %5129 = vmatpush.bf16.msrb.mxu0 %v7586_v24  ;;  %5103 = vmatpush.bf16.msra.mxu2 %v7330_v56  ;;  %v13558_v17 = vpop.f32.mrf.mxu0  ;;  %v8864_v24 = vld [vmem:[%s13717_s8 + $0x68] sm:$0xff]  ;;  %v4859_v58 = vadd.f32 %v13451_v29, %v4846_v22  ;;  %v8015_v56 = vld [vmem:[%s13716_s4 + $0x778] sm:$0xf0] }
 0x306   :  { %v8576_v29 = vld [vmem:[%s13716_s4 + $0x76c] sm:$0xf] }
 0x307   :  { %5115 = vmatpush.bf16.msra.mxu3 %v7474_v36  ;;  %5141 = vmatpush.bf16.msrb.mxu1 %v7730_v27  ;;  %v5184_v26 = vadd.f32 %v5176_v10, %v4859_v58  ;;  %v13592_v36 = vstv %s13719_s7  ;;  %v8536_v27 = vld [vmem:[%s13716_s4 + $0x62c] sm:$0xf] }
 0x308   :  { %5130 = vmatmul.bf16.vlgmr.msrb.gmra.mxu0 %v12267_v21  ;;  %5104 = vmatmul.bf16.vlgmr.msra.gmra.mxu2 %v12280_v23  ;;  %v8588_v21 = vld [vmem:[%s13716_s4 + $0x7cc] sm:$0xf]  ;;  %v7858_v50 = vor.u32 %v8536_v27, %v7855_v3 }
 0x309   :  { %5466 = vmatpush.bf16.msra.mxu0 %v8858_v51  ;;  %5148 = vmatpush.bf16.msrb.mxu2 %v7954_v61  ;;  %v8066_v23 = vor.u32 %v8588_v21, %v8063_v1  ;;  %v8540_v51 = vld [vmem:[%s13716_s4 + $0x64c] sm:$0xf]  ;;  %v5194_v49 = vmul.f32 %v13592_v36, %v5184_v26  ;;  %vm5189_vm0 = vcmp.gt.f32.partialorder %v5184_v26, 0.0 }
 0x30a   :  { %v7874_v61 = vor.u32 %v8540_v51, %v7871_v55  ;;  %v8868_v27 = vld [vmem:[%s13717_s8 + $0x88] sm:$0xff] }
 0x30b   :  { %5116 = vmatpush.bf16.msra.mxu3 %v7458_v42  ;;  %5142 = vmatpush.bf16.msrb.mxu1 %v7714_v0  ;;  %v4897_v2 = vpop.f32.mrf.mxu2  ;;  %v4936_v11 = vpop.f32.mrf.mxu1  ;;  %v8532_v42 = vld [vmem:[%s13716_s4 + $0x60c] sm:$0xf]  ;;  %v8851_v0 = vld [vmem:[%s13717_s8] sm:$0xff]  ;;  %v5198_v21 = vsel %vm5189_vm0, %v5184_v26, %v5194_v49  ;;  %v8870_v26 = vld [vmem:[%s13717_s8 + $0x98] sm:$0xff] }
 0x30c   :  { %v7842_v1 = vor.u32 %v8532_v42, %v7839_v4 }
 0x30d   :  { %5467 = vmatpush.bf16.msra.mxu0 %v8857_v7  ;;  %5149 = vmatpush.bf16.msrb.mxu2 %v7938_v13  ;;  %v8018_v7 = vor.u32 %v8576_v29, %v8015_v56  ;;  %v4925_v14 = vpop.f32.mrf.mxu0  ;;  %v8002_v13 = vor.u32 %v8572_v15, %v7999_v25  ;;  %v8872_v29 = vld [vmem:[%s13717_s8 + $0xa8] sm:$0xff]  ;;  %v8871_v56 = vld [vmem:[%s13717_s8 + $0xa0] sm:$0xff] }
 0x30e   :  { %5117 = vmatmul.bf16.vlgmr.msra.gmra.mxu3 %v12310_v54  ;;  %5143 = vmatmul.bf16.vlgmr.msrb.gmra.mxu1 %v12320_v57  ;;  %v7887_v54 = vld [vmem:[%s13716_s4 + $0x678] sm:$0xf0]  ;;  %v8580_v57 = vld [vmem:[%s13716_s4 + $0x78c] sm:$0xf]  ;;  %v8867_v15 = vld [vmem:[%s13717_s8 + $0x80] sm:$0xff] }
 0x30f   :  { %5161 = vmatpush.bf16.msrb.mxu3 %v8082_v9  ;;  %5479 = vmatpush.bf16.msra.mxu1 %v8866_v39  ;;  %v7890_v62 = vor.u32 %v8544_v5, %v7887_v54  ;;  %v8034_v35 = vor.u32 %v8580_v57, %v8031_v45 }
 0x311   :  { %5468 = vmatpush.bf16.msra.mxu0 %v8856_v8  ;;  %5150 = vmatpush.bf16.msrb.mxu2 %v7922_v53  ;;  %v4910_v9 = vpop.f32.mrf.mxu3  ;;  %v8861_v8 = vld [vmem:[%s13717_s8 + $0x50] sm:$0xff]  ;;  %v7986_v53 = vor.u32 %v8568_v37, %v7983_v52 }
 0x313   :  { %5162 = vmatpush.bf16.msrb.mxu3 %v8066_v23  ;;  %5480 = vmatpush.bf16.msra.mxu1 %v8865_v28  ;;  %v4899_v39 = vpop.f32.mrf.mxu2  ;;  %v4938_v32 = vpop.f32.mrf.mxu1  ;;  %v8564_v23 = vld [vmem:[%s13716_s4 + $0x70c] sm:$0xf]  ;;  %v8859_v28 = vld [vmem:[%s13717_s8 + $0x40] sm:$0xff] }
 0x314   :  { %v7970_v43 = vor.u32 %v8564_v23, %v7967_v18 }
 0x315   :  { %5469 = vmatpush.bf16.msra.mxu0 %v8855_v46  ;;  %5151 = vmatpush.bf16.msrb.mxu2 %v7906_v6  ;;  %v5202_v46 = vpack.c.bf16 %v5198_v21, %v5198_v21  ;;  %v4885_v6 = vadd.f32 %v13416_v47, %v4872_v59  ;;  %v5178_v21 = vperm.slane %v13545_v48, 2  ;;  %v8879_v59 = vld [vmem:[%s13717_s8 + $0xe0] sm:$0xff] }
 0x317   :  { %5163 = vmatpush.bf16.msrb.mxu3 %v8050_v16  ;;  %5481 = vmatpush.bf16.msra.mxu1 %v8864_v24  ;;  %v4898_v16 = vadd.f32 %v4897_v2, %v4885_v6 }
 0x319   :  { %5470 = vmatpush.bf16.msra.mxu0 %v8854_v40  ;;  %5152 = vmatpush.bf16.msrb.mxu2 %v7890_v62  ;;  %v4912_v63 = vpop.f32.mrf.mxu3  ;;  %v4911_v54 = vadd.f32 %v4910_v9, %v4898_v16  ;;  %v8878_v16 = vld [vmem:[%s13717_s8 + $0xd8] sm:$0xff] }
 0x31b   :  { %5164 = vmatpush.bf16.msrb.mxu3 %v8034_v35  ;;  %5482 = vmatpush.bf16.msra.mxu1 %v8863_v34  ;;  %v4924_v40 = vadd.f32 %v13558_v17, %v4911_v54  ;;  %v8873_v17 = vld [vmem:[%s13717_s8 + $0xb0] sm:$0xff] }
 0x31d   :  { %5471 = vmatpush.bf16.msra.mxu0 %v8853_v60  ;;  %5153 = vmatpush.bf16.msrb.mxu2 %v7874_v61  ;;  %v4937_v24 = vadd.f32 %v4936_v11, %v4924_v40  ;;  %v8869_v61 = vld [vmem:[%s13717_s8 + $0x90] sm:$0xff] }
 0x31f   :  { %5165 = vmatpush.bf16.msrb.mxu3 %v8018_v7  ;;  %5483 = vmatpush.bf16.msra.mxu1 %v8862_v31 }
 0x321   :  { %5472 = vmatpush.bf16.msra.mxu0 %v8852_v30  ;;  %5154 = vmatpush.bf16.msrb.mxu2 %v7858_v50 }
 0x323   :  { %5166 = vmatpush.bf16.msrb.mxu3 %v8002_v13  ;;  %5484 = vmatpush.bf16.msra.mxu1 %v8861_v8 }
 0x325   :  { %5473 = vmatpush.bf16.msra.mxu0 %v8851_v0  ;;  %5155 = vmatpush.bf16.msrb.mxu2 %v7842_v1  ;;  %v4975_v5 = vpop.f32.mrf.mxu0 }
 0x326   :  { %v4976_v31 = vadd.f32 %v4975_v5, %v12654_v44  ;;  %v8882_v44 = vld [vmem:[%s13717_s8 + $0xf8] sm:$0xff]  ;;  %v8877_v5 = vld [vmem:[%s13717_s8 + $0xd0] sm:$0xff] }
 0x327   :  { %5167 = vmatpush.bf16.msrb.mxu3 %v7986_v53  ;;  %5485 = vmatpush.bf16.msra.mxu1 %v8860_v12  ;;  %v8881_v12 = vld [vmem:[%s13717_s8 + $0xf0] sm:$0xff] }
 0x328   :  { %5474 = vmatmul.bf16.vlgmr.msra.gmra.mxu0 %v5202_v46  ;;  %5156 = vmatmul.bf16.vlgmr.msrb.gmra.mxu2 %v12497_v41  ;;  %v5177_v41 = vperm.slane %v13545_v48, 1 }
 0x32b   :  { %5168 = vmatpush.bf16.msrb.mxu3 %v7970_v43  ;;  %5486 = vmatpush.bf16.msra.mxu1 %v8859_v28  ;;  %v4949_v22 = vpop.f32.mrf.mxu2  ;;  %v4988_v57 = vpop.f32.mrf.mxu1  ;;  %v8880_v28 = vld [vmem:[%s13717_s8 + $0xe8] sm:$0xff] }
 0x32c   :  { %v4950_v58 = vadd.f32 %v4949_v22, %v4937_v24  ;;  %v4989_v49 = vadd.f32 %v4988_v57, %v4976_v31  ;;  %v8876_v57 = vld [vmem:[%s13717_s8 + $0xc8] sm:$0xff] }
 0x32d   :  { %v4977_v45 = vpop.f32.mrf.mxu0 }
 0x32e   :  { %5169 = vmatmul.bf16.vlgmr.msrb.gmra.mxu3 %v12527_v20  ;;  %v8874_v20 = vld [vmem:[%s13717_s8 + $0xb8] sm:$0xff] }
 0x32f   :  { %5492 = vmatpush.bf16.msra.mxu2 %v8874_v20  ;;  %5505 = vmatpush.bf16.msra.mxu3 %v8882_v44 }
 0x331   :  { %v4962_v10 = vpop.f32.mrf.mxu3 }
 0x332   :  { %v4963_v62 = vadd.f32 %v4962_v10, %v4950_v58 }
 0x333   :  { %v4951_v19 = vpop.f32.mrf.mxu2  ;;  %v4990_v35 = vpop.f32.mrf.mxu1  ;;  %5493 = vmatpush.bf16.msra.mxu2 %v8873_v17  ;;  %5506 = vmatpush.bf16.msra.mxu3 %v8881_v12 }
 0x334   :  { %v5185_v38 = vadd.f32 %v5177_v41, %v4963_v62  ;;  %v8875_v41 = vld [vmem:[%s13717_s8 + $0xc0] sm:$0xff] }
 0x336   :  { %vm5190_vm1 = vcmp.gt.f32.partialorder %v5185_v38, 0.0  ;;  %v5195_v47 = vmul.f32 %v13592_v36, %v5185_v38 }
 0x337   :  { %5494 = vmatpush.bf16.msra.mxu2 %v8872_v29  ;;  %5507 = vmatpush.bf16.msra.mxu3 %v8880_v28  ;;  %v5179_v29 = vperm.slane %v13545_v48, 3 }
 0x338   :  { %v5199_v51 = vsel %vm5190_vm1, %v5185_v38, %v5195_v47 }
 0x339   :  { %v5203_v55 = vpack.c.bf16 %v5199_v51, %v5199_v51  ;;  %v4964_v60 = vpop.f32.mrf.mxu3 }
 0x33b   :  { %5487 = vmatmul.bf16.vlgmr.msra.gmra.mxu1 %v5203_v55  ;;  %5495 = vmatpush.bf16.msra.mxu2 %v8871_v56 }
 0x33c   :  { %5508 = vmatpush.bf16.msra.mxu3 %v8879_v59 }
 0x33f   :  { %5496 = vmatpush.bf16.msra.mxu2 %v8870_v26 }
 0x340   :  { %5509 = vmatpush.bf16.msra.mxu3 %v8878_v16 }
 0x343   :  { %5497 = vmatpush.bf16.msra.mxu2 %v8869_v61 }
 0x344   :  { %5510 = vmatpush.bf16.msra.mxu3 %v8877_v5 }
 0x345   :  { %v5027_v34 = vpop.f32.mrf.mxu0 }
 0x347   :  { %5498 = vmatpush.bf16.msra.mxu2 %v8868_v27  ;;  %v8883_v27 = vld [vmem:[%s13720_s9] ss:$0 sm:$0xff] }
 0x348   :  { %5511 = vmatpush.bf16.msra.mxu3 %v8876_v57 }
 0x34b   :  { %v5001_v2 = vpop.f32.mrf.mxu2  ;;  %v5040_v11 = vpop.f32.mrf.mxu1  ;;  %5499 = vmatpush.bf16.msra.mxu2 %v8867_v15 }
 0x34c   :  { %v5002_v50 = vadd.f32 %v5001_v2, %v4989_v49  ;;  %5512 = vmatpush.bf16.msra.mxu3 %v8875_v41 }
 0x34d   :  { %v5029_v7 = vpop.f32.mrf.mxu0 }
 0x351   :  { %v5014_v3 = vpop.f32.mrf.mxu3 }
 0x352   :  { %v5015_v42 = vadd.f32 %v5014_v3, %v5002_v50 }
 0x353   :  { %v5003_v30 = vpop.f32.mrf.mxu2  ;;  %v5042_v14 = vpop.f32.mrf.mxu1 }
 0x354   :  { %v5028_v4 = vadd.f32 %v5027_v34, %v5015_v42 }
 0x356   :  { %v5041_v52 = vadd.f32 %v5040_v11, %v5028_v4 }
 0x359   :  { %v5016_v25 = vpop.f32.mrf.mxu3 }
 0x365   :  { %v5079_v13 = vpop.f32.mrf.mxu0 }
 0x366   :  { %v5080_v62 = vadd.f32 %v5079_v13, %v13058_v33 }
 0x36b   :  { %v5053_v0 = vpop.f32.mrf.mxu2  ;;  %v5092_v9 = vpop.f32.mrf.mxu1 }
 0x36c   :  { %v5054_v8 = vadd.f32 %v5053_v0, %v5041_v52  ;;  %v5093_v38 = vadd.f32 %v5092_v9, %v5080_v62 }
 0x36d   :  { %v5081_v37 = vpop.f32.mrf.mxu0 }
 0x371   :  { %v5066_v1 = vpop.f32.mrf.mxu3 }
 0x372   :  { %v5067_v39 = vadd.f32 %v5066_v1, %v5054_v8 }
 0x373   :  { %v5055_v53 = vpop.f32.mrf.mxu2  ;;  %v5094_v23 = vpop.f32.mrf.mxu1 }
 0x374   :  { %v5186_v32 = vadd.f32 %v5178_v21, %v5067_v39 }
 0x376   :  { %vm5191_vm2 = vcmp.gt.f32.partialorder %v5186_v32, 0.0  ;;  %v5196_v18 = vmul.f32 %v13592_v36, %v5186_v32 }
 0x378   :  { %v5200_v46 = vsel %vm5191_vm2, %v5186_v32, %v5196_v18 }
 0x379   :  { %v5204_v43 = vpack.c.bf16 %v5200_v46, %v5200_v46  ;;  %v5068_v63 = vpop.f32.mrf.mxu3 }
 0x37b   :  { %5500 = vmatmul.bf16.vlgmr.msra.gmra.mxu2 %v5204_v43 }
 0x385   :  { %v5131_v6 = vpop.f32.mrf.mxu0 }
 0x38b   :  { %v5105_v54 = vpop.f32.mrf.mxu2  ;;  %v5144_v40 = vpop.f32.mrf.mxu1 }
 0x38c   :  { %v5106_v19 = vadd.f32 %v5105_v54, %v5093_v38 }
 0x38d   :  { %v5133_v22 = vpop.f32.mrf.mxu0 }
 0x391   :  { %v5118_v45 = vpop.f32.mrf.mxu3 }
 0x392   :  { %v5119_v20 = vadd.f32 %v5118_v45, %v5106_v19 }
 0x393   :  { %v5107_v24 = vpop.f32.mrf.mxu2  ;;  %v5146_v58 = vpop.f32.mrf.mxu1 }
 0x394   :  { %v5132_v47 = vadd.f32 %v5131_v6, %v5119_v20 }
 0x396   :  { %v5145_v55 = vadd.f32 %v5144_v40, %v5132_v47 }
 0x399   :  { %v5120_v10 = vpop.f32.mrf.mxu3 }
 0x3a5   :  { %v5475_v35 = vpop.f32.mrf.mxu0 }
 0x3a6   :  { %v5476_v3 = vadd.f32 %v8883_v27, %v5475_v35 }
 0x3ab   :  { %v5157_v17 = vpop.f32.mrf.mxu2 }
 0x3ac   :  { %v5158_v60 = vadd.f32 %v5157_v17, %v5145_v55 }
 0x3ad   :  { %v5477_v51 = vpop.f32.mrf.mxu0 }
 0x3b1   :  { %v5170_v56 = vpop.f32.mrf.mxu3 }
 0x3b2   :  { %v5171_v34 = vadd.f32 %v5170_v56, %v5158_v60 }
 0x3b3   :  { %v5159_v61 = vpop.f32.mrf.mxu2 }
 0x3b4   :  { %v5187_v26 = vadd.f32 %v5179_v29, %v5171_v34 }
 0x3b6   :  { %vm5192_vm3 = vcmp.gt.f32.partialorder %v5187_v26, 0.0  ;;  %v5197_v2 = vmul.f32 %v13592_v36, %v5187_v26 }
 0x3b8   :  { %v5201_v11 = vsel %vm5192_vm3, %v5187_v26, %v5197_v2  ;;  %v5488_v30 = vpop.f32.mrf.mxu1 }
 0x3b9   :  { %v5205_v33 = vpack.c.bf16 %v5201_v11, %v5201_v11  ;;  %v5172_v7 = vpop.f32.mrf.mxu3  ;;  %v5489_v14 = vadd.f32 %v5488_v30, %v5476_v3 }
 0x3bb   :  { %5513 = vmatmul.bf16.vlgmr.msra.gmra.mxu3 %v5205_v33 }
 0x3c0   :  { %v5490_v15 = vpop.f32.mrf.mxu1 }
 0x3fe   :  { %v5501_v48 = vpop.f32.mrf.mxu2 }
 0x3ff   :  { %v5502_v31 = vadd.f32 %v5501_v48, %v5489_v14 }
 0x406   :  { %v5503_v25 = vpop.f32.mrf.mxu2 }
 0x43e   :  { %v5514_v49 = vpop.f32.mrf.mxu3 }
 0x43f   :  { %v5515_v50 = vadd.f32 %v5514_v49, %v5502_v31 }
 0x441   :  { %5518 = vst [vmem:[%s13721_s10] sm:$0xff] %v5515_v50 }
 0x446   :  { %v5516_v36 = vpop.f32.mrf.mxu3 }

</bundles_post_ra>
